<compile_context>
chip_gen: v7x
topology: tpu7x:2x2x1
jax: 0.10.0
libtpu: 0.0.40
codegen_flags: <defaults>
</compile_context>

<pallas_src>
import functools

import jax
import jax.numpy as jnp
from jax.experimental import pallas as pl
from jax.experimental.pallas import tpu as pltpu

_OFF = 128  # front/back zero pad (in lanes) of the flattened spatial axis


def _downblock_kernel(x_ref, w1_ref, w2_ref, wres_ref, g1_ref, b1_ref,
                      g2_ref, b2_ref, ml_ref, mr_ref, o_ref, hbuf,
                      *, cin, cout, hh, ww, eps):
    f32 = jnp.float32
    hw = hh * ww
    inv_cnt = 1.0 / float(cout * hw)

    def mean_all(v):  # (C, HW) -> (1, 1); two single-axis reductions
        return jnp.sum(jnp.sum(v, axis=1, keepdims=True),
                       axis=0, keepdims=True) * inv_cnt

    # Column-boundary masks in destination coordinates, shape (1, HW).
    ml = ml_ref[...]   # zero where x == 0      (used for dx == -1 taps)
    mr = mr_ref[...]   # zero where x == W - 1  (used for dx == +1 taps)

    # Parameters (already f32, channel-on-sublane layouts).
    w1 = w1_ref[...]       # (cout, cin * 9)
    w2 = w2_ref[...]       # (cout, cout * 9)
    wres = wres_ref[...]   # (cout, cin)
    g1, b1 = g1_ref[...], b1_ref[...]   # (cout, 1)
    g2, b2 = g2_ref[...], b2_ref[...]   # (cout, 1)

    # Centre (unshifted) view of the input; also feeds the 1x1 residual conv.
    xc = x_ref[0, :, _OFF:_OFF + hw].astype(f32)            # (cin, HW)

    # ---- conv1: 3x3, stride 1, pad 1, bias=False ------------------------
    acc1 = jnp.zeros((cout, hw), f32)
    for t in range(9):
        dy, dx = t // 3 - 1, t % 3 - 1
        if dy == 0 and dx == 0:
            slab = xc
        else:
            s = _OFF + dy * ww + dx
            slab = x_ref[0, :, s:s + hw].astype(f32)         # (cin, HW)
            if dx == 1:
                slab = slab * mr
            elif dx == -1:
                slab = slab * ml
        for i in range(cin):
            c = i * 9 + t
            acc1 = acc1 + w1[:, c:c + 1] * slab[i:i + 1, :]

    # ---- GroupNorm(1, cout) #1 + affine + ReLU ---------------------------
    mean1 = mean_all(acc1)
    d1 = acc1 - mean1
    rstd1 = jax.lax.rsqrt(mean_all(d1 * d1) + eps)
    h1 = jnp.maximum(d1 * rstd1 * g1 + b1, 0.0)              # (cout, HW)

    # Stage h1 into the zero-padded flat buffer for conv2 (aligned stores).
    hbuf[...] = jnp.zeros(hbuf.shape, f32)
    hbuf[:, _OFF:_OFF + hw] = h1

    # ---- conv2: 3x3, stride 1, pad 1, bias=False -------------------------
    acc2 = jnp.zeros((cout, hw), f32)
    for t in range(9):
        dy, dx = t // 3 - 1, t % 3 - 1
        s = _OFF + dy * ww + dx
        slab = hbuf[:, s:s + hw]                             # (cout, HW)
        if dx == 1:
            slab = slab * mr
        elif dx == -1:
            slab = slab * ml
        for i in range(cout):
            c = i * 9 + t
            acc2 = acc2 + w2[:, c:c + 1] * slab[i:i + 1, :]

    # ---- GroupNorm(1, cout) #2 (Dropout == identity in eval mode) --------
    mean2 = mean_all(acc2)
    d2 = acc2 - mean2
    rstd2 = jax.lax.rsqrt(mean_all(d2 * d2) + eps)
    h2 = d2 * rstd2 * g2 + b2
    # TODO(synk): nn.Dropout is treated as identity (inference); training-time
    # random masking is not implemented here.

    # ---- residual 1x1 conv + add + final ReLU -----------------------------
    res = jnp.zeros((cout, hw), f32)
    for i in range(cin):
        res = res + wres[:, i:i + 1] * xc[i:i + 1, :]
    x1 = jnp.maximum(h2 + res, 0.0)                          # (cout, HW)

    # ---- MaxPool2d(kernel=2, stride=2): one dense pass --------------------
    # pooled[p] = max(x1[p], x1[p+1], x1[p+W], x1[p+W+1]); only even-row /
    # even-column positions are meaningful — the wrapper does the ::2 select.
    hbuf[:, 0:hw] = x1
    p1 = hbuf[:, 1:1 + hw]
    p2 = hbuf[:, ww:ww + hw]
    p3 = hbuf[:, ww + 1:ww + 1 + hw]
    pooled = jnp.maximum(jnp.maximum(x1, p1), jnp.maximum(p2, p3))
    o_ref[0] = pooled.astype(o_ref.dtype)


def down_block(x, w1, g1, b1, w2, g2, b2, w_res=None, *, eps=1e-5):
    """x: (N, Cin, H, W) NCHW.  w1: (Cout, Cin, 3, 3), w2: (Cout, Cout, 3, 3),
    w_res: (Cout, Cin, 1, 1) or None (identity; requires Cin == Cout).
    g*/b*: (Cout,) GroupNorm affine params.  Returns (N, Cout, H//2, W//2)."""
    n, cin, hh, ww = x.shape
    cout = w1.shape[0]
    hw = hh * ww
    assert w1.shape == (cout, cin, 3, 3)
    assert w2.shape == (cout, cout, 3, 3)
    assert hh % 2 == 0 and ww % 2 == 0
    assert ww + 1 <= _OFF, "flat-pad scheme assumes W <= 127"
    padlen = hw + 2 * _OFF

    # --- parameters: cast / reshape once (channel-on-sublane layouts) -----
    w1v = w1.astype(jnp.float32).reshape(cout, cin * 9)
    w2v = w2.astype(jnp.float32).reshape(cout, cout * 9)
    if w_res is None:
        assert cin == cout, "identity residual requires in_ch == out_ch"
        wresv = jnp.eye(cout, dtype=jnp.float32)
    else:
        assert w_res.shape == (cout, cin, 1, 1)
        wresv = w_res.reshape(cout, cin).astype(jnp.float32)
    g1v = g1.astype(jnp.float32).reshape(cout, 1)
    b1v = b1.astype(jnp.float32).reshape(cout, 1)
    g2v = g2.astype(jnp.float32).reshape(cout, 1)
    b2v = b2.astype(jnp.float32).reshape(cout, 1)

    # --- flat, lane-dense, pre-padded input and column masks --------------
    x_pad = jnp.pad(x.reshape(n, cin, hw), ((0, 0), (0, 0), (_OFF, _OFF)))
    col = jnp.arange(hw, dtype=jnp.int32) % ww
    ml = (col != 0).astype(jnp.float32).reshape(1, hw)
    mr = (col != ww - 1).astype(jnp.float32).reshape(1, hw)

    kernel = functools.partial(_downblock_kernel, cin=cin, cout=cout,
                               hh=hh, ww=ww, eps=float(eps))
    const2d = lambda shape: pl.BlockSpec(shape, lambda b: (0, 0))

    out_flat = pl.pallas_call(
        kernel,
        out_shape=jax.ShapeDtypeStruct((n, cout, hw), x.dtype),
        grid=(n,),
        in_specs=[
            pl.BlockSpec((1, cin, padlen), lambda b: (b, 0, 0)),
            const2d((cout, cin * 9)),
            const2d((cout, cout * 9)),
            const2d((cout, cin)),
            const2d((cout, 1)), const2d((cout, 1)),
            const2d((cout, 1)), const2d((cout, 1)),
            const2d((1, hw)), const2d((1, hw)),
        ],
        out_specs=pl.BlockSpec((1, cout, hw), lambda b: (b, 0, 0)),
        scratch_shapes=[pltpu.VMEM((cout, padlen), jnp.float32)],
        compiler_params=pltpu.CompilerParams(
            dimension_semantics=("parallel",),
        ),
    )(x_pad, w1v, w2v, wresv, g1v, b1v, g2v, b2v, ml, mr)

    # ::2 downselect of the dense pooled slab + back to NCHW (cheap XLA ops).
    return out_flat.reshape(n, cout, hh, ww)[:, :, ::2, ::2]


def down_block_ref(x, w1, g1, b1, w2, g2, b2, w_res=None, eps=1e-5):
    """Pure-JAX reference matching the PyTorch DownBlock forward (eval mode)."""
    dn = ("NCHW", "OIHW", "NCHW")

    def gn(v, gamma, beta):
        mu = jnp.mean(v, axis=(1, 2, 3), keepdims=True)
        var = jnp.mean(jnp.square(v - mu), axis=(1, 2, 3), keepdims=True)
        vh = (v - mu) * jax.lax.rsqrt(var + eps)
        return vh * gamma[None, :, None, None] + beta[None, :, None, None]

    h = jax.lax.conv_general_dilated(x, w1, (1, 1), ((1, 1), (1, 1)),
                                     dimension_numbers=dn)
    h = jnp.maximum(gn(h, g1, b1), 0.0)
    h = jax.lax.conv_general_dilated(h, w2, (1, 1), ((1, 1), (1, 1)),
                                     dimension_numbers=dn)
    h = gn(h, g2, b2)
    res = x if w_res is None else jax.lax.conv_general_dilated(
        x, w_res, (1, 1), "VALID", dimension_numbers=dn)
    x1 = jnp.maximum(h + res, 0.0)
    return jax.lax.reduce_window(x1, -jnp.inf, jax.lax.max,
                                 (1, 1, 2, 2), (1, 1, 2, 2), "VALID")


if __name__ == "__main__":
    key = jax.random.PRNGKey(0)
    ks = jax.random.split(key, 8)

    N, Cin, Cout, H, W = 2, 4, 8, 16, 16

    x = jax.random.normal(ks[0], (N, Cin, H, W), jnp.float32)
    w1 = jax.random.normal(ks[1], (Cout, Cin, 3, 3), jnp.float32) / jnp.sqrt(Cin * 9.0)
    w2 = jax.random.normal(ks[2], (Cout, Cout, 3, 3), jnp.float32) / jnp.sqrt(Cout * 9.0)
    w_res = jax.random.normal(ks[3], (Cout, Cin, 1, 1), jnp.float32) / jnp.sqrt(float(Cin))
    g1 = 1.0 + 0.1 * jax.random.normal(ks[4], (Cout,), jnp.float32)
    b1 = 0.1 * jax.random.normal(ks[5], (Cout,), jnp.float32)
    g2 = 1.0 + 0.1 * jax.random.normal(ks[6], (Cout,), jnp.float32)
    b2 = 0.1 * jax.random.normal(ks[7], (Cout,), jnp.float32)

    out = down_block(x, w1, g1, b1, w2, g2, b2, w_res)
    out = jax.block_until_ready(out)

    ref = down_block_ref(x, w1, g1, b1, w2, g2, b2, w_res)
    assert out.shape == (N, Cout, H // 2, W // 2)
    assert jnp.allclose(out, ref, atol=1e-4, rtol=1e-4), float(
        jnp.max(jnp.abs(out - ref)))

    print("KERNEL_OK")
</pallas_src>

<mosaic_0001>
module attributes {stable_mosaic.version = 11 : i64} {
  func.func @_downblock_kernel(%arg0: i32, %arg1: memref<1x4x512xf32, #tpu.memory_space<vmem>>, %arg2: memref<8x36xf32, #tpu.memory_space<vmem>>, %arg3: memref<8x72xf32, #tpu.memory_space<vmem>>, %arg4: memref<8x4xf32, #tpu.memory_space<vmem>>, %arg5: memref<8x1xf32, #tpu.memory_space<vmem>>, %arg6: memref<8x1xf32, #tpu.memory_space<vmem>>, %arg7: memref<8x1xf32, #tpu.memory_space<vmem>>, %arg8: memref<8x1xf32, #tpu.memory_space<vmem>>, %arg9: memref<1x256xf32, #tpu.memory_space<vmem>>, %arg10: memref<1x256xf32, #tpu.memory_space<vmem>>, %arg11: memref<1x8x256xf32, #tpu.memory_space<vmem>>, %arg12: memref<8x512xf32, #tpu.memory_space<vmem>>) attributes {dimension_semantics = [#tpu.dimension_semantics<parallel>], iteration_bounds = array<i64: 2>, scalar_prefetch = 0 : i64, scratch_operands = 1 : i64, tpu.core_type = #tpu.core_type<tc>, window_params = [{transform_indices = @transform_0, window_bounds = array<i64: 1, 4, 512>}, {pipeline_mode = #tpu.pipeline_mode<synchronous>, transform_indices = @transform_1, window_bounds = array<i64: 8, 36>}, {pipeline_mode = #tpu.pipeline_mode<synchronous>, transform_indices = @transform_2, window_bounds = array<i64: 8, 72>}, {pipeline_mode = #tpu.pipeline_mode<synchronous>, transform_indices = @transform_3, window_bounds = array<i64: 8, 4>}, {pipeline_mode = #tpu.pipeline_mode<synchronous>, transform_indices = @transform_4, window_bounds = array<i64: 8, 1>}, {pipeline_mode = #tpu.pipeline_mode<synchronous>, transform_indices = @transform_5, window_bounds = array<i64: 8, 1>}, {pipeline_mode = #tpu.pipeline_mode<synchronous>, transform_indices = @transform_6, window_bounds = array<i64: 8, 1>}, {pipeline_mode = #tpu.pipeline_mode<synchronous>, transform_indices = @transform_7, window_bounds = array<i64: 8, 1>}, {pipeline_mode = #tpu.pipeline_mode<synchronous>, transform_indices = @transform_8, window_bounds = array<i64: 1, 256>}, {pipeline_mode = #tpu.pipeline_mode<synchronous>, transform_indices = @transform_9, window_bounds = array<i64: 1, 256>}, {transform_indices = @transform_10, window_bounds = array<i64: 1, 8, 256>}]} {
    %c0 = arith.constant 0 : index
    %c0_0 = arith.constant 0 : index
    %0 = vector.load %arg9[%c0, %c0_0] : memref<1x256xf32, #tpu.memory_space<vmem>>, vector<1x256xf32>
    %c0_1 = arith.constant 0 : index
    %c0_2 = arith.constant 0 : index
    %1 = vector.load %arg10[%c0_1, %c0_2] : memref<1x256xf32, #tpu.memory_space<vmem>>, vector<1x256xf32>
    %c0_3 = arith.constant 0 : index
    %c0_4 = arith.constant 0 : index
    %2 = vector.load %arg2[%c0_3, %c0_4] : memref<8x36xf32, #tpu.memory_space<vmem>>, vector<8x36xf32>
    %c0_5 = arith.constant 0 : index
    %c0_6 = arith.constant 0 : index
    %3 = vector.load %arg3[%c0_5, %c0_6] : memref<8x72xf32, #tpu.memory_space<vmem>>, vector<8x72xf32>
    %c0_7 = arith.constant 0 : index
    %c0_8 = arith.constant 0 : index
    %4 = vector.load %arg4[%c0_7, %c0_8] : memref<8x4xf32, #tpu.memory_space<vmem>>, vector<8x4xf32>
    %c0_9 = arith.constant 0 : index
    %c0_10 = arith.constant 0 : index
    %5 = vector.load %arg5[%c0_9, %c0_10] : memref<8x1xf32, #tpu.memory_space<vmem>>, vector<8x1xf32>
    %c0_11 = arith.constant 0 : index
    %c0_12 = arith.constant 0 : index
    %6 = vector.load %arg6[%c0_11, %c0_12] : memref<8x1xf32, #tpu.memory_space<vmem>>, vector<8x1xf32>
    %c0_13 = arith.constant 0 : index
    %c0_14 = arith.constant 0 : index
    %7 = vector.load %arg7[%c0_13, %c0_14] : memref<8x1xf32, #tpu.memory_space<vmem>>, vector<8x1xf32>
    %c0_15 = arith.constant 0 : index
    %c0_16 = arith.constant 0 : index
    %8 = vector.load %arg8[%c0_15, %c0_16] : memref<8x1xf32, #tpu.memory_space<vmem>>, vector<8x1xf32>
    %c0_17 = arith.constant 0 : index
    %c0_18 = arith.constant 0 : index
    %c128 = arith.constant 128 : index
    %9 = vector.load %arg1[%c0_17, %c0_18, %c128] : memref<1x4x512xf32, #tpu.memory_space<vmem>>, vector<1x4x256xf32>
    %10 = vector.shape_cast %9 : vector<1x4x256xf32> to vector<4x256xf32>
    %cst = arith.constant 0.000000e+00 : f32
    %11 = vector.broadcast %cst : f32 to vector<8x256xf32>
    %c0_19 = arith.constant 0 : index
    %c0_20 = arith.constant 0 : index
    %c111 = arith.constant 111 : index
    %12 = vector.load %arg1[%c0_19, %c0_20, %c111] : memref<1x4x512xf32, #tpu.memory_space<vmem>>, vector<1x4x256xf32>
    %13 = vector.shape_cast %12 : vector<1x4x256xf32> to vector<4x256xf32>
    %14 = vector.broadcast %0 : vector<1x256xf32> to vector<4x256xf32>
    %15 = arith.mulf %13, %14 : vector<4x256xf32>
    %16 = vector.extract_strided_slice %2 {offsets = [0, 0], sizes = [8, 1], strides = [1, 1]} : vector<8x36xf32> to vector<8x1xf32>
    %17 = vector.extract_strided_slice %15 {offsets = [0, 0], sizes = [1, 256], strides = [1, 1]} : vector<4x256xf32> to vector<1x256xf32>
    %18 = vector.broadcast %16 : vector<8x1xf32> to vector<8x256xf32>
    %19 = vector.broadcast %17 : vector<1x256xf32> to vector<8x256xf32>
    %20 = arith.mulf %18, %19 : vector<8x256xf32>
    %21 = arith.addf %11, %20 : vector<8x256xf32>
    %22 = vector.extract_strided_slice %2 {offsets = [0, 9], sizes = [8, 1], strides = [1, 1]} : vector<8x36xf32> to vector<8x1xf32>
    %23 = vector.extract_strided_slice %15 {offsets = [1, 0], sizes = [1, 256], strides = [1, 1]} : vector<4x256xf32> to vector<1x256xf32>
    %24 = vector.broadcast %22 : vector<8x1xf32> to vector<8x256xf32>
    %25 = vector.broadcast %23 : vector<1x256xf32> to vector<8x256xf32>
    %26 = arith.mulf %24, %25 : vector<8x256xf32>
    %27 = arith.addf %21, %26 : vector<8x256xf32>
    %28 = vector.extract_strided_slice %2 {offsets = [0, 18], sizes = [8, 1], strides = [1, 1]} : vector<8x36xf32> to vector<8x1xf32>
    %29 = vector.extract_strided_slice %15 {offsets = [2, 0], sizes = [1, 256], strides = [1, 1]} : vector<4x256xf32> to vector<1x256xf32>
    %30 = vector.broadcast %28 : vector<8x1xf32> to vector<8x256xf32>
    %31 = vector.broadcast %29 : vector<1x256xf32> to vector<8x256xf32>
    %32 = arith.mulf %30, %31 : vector<8x256xf32>
    %33 = arith.addf %27, %32 : vector<8x256xf32>
    %34 = vector.extract_strided_slice %2 {offsets = [0, 27], sizes = [8, 1], strides = [1, 1]} : vector<8x36xf32> to vector<8x1xf32>
    %35 = vector.extract_strided_slice %15 {offsets = [3, 0], sizes = [1, 256], strides = [1, 1]} : vector<4x256xf32> to vector<1x256xf32>
    %36 = vector.broadcast %34 : vector<8x1xf32> to vector<8x256xf32>
    %37 = vector.broadcast %35 : vector<1x256xf32> to vector<8x256xf32>
    %38 = arith.mulf %36, %37 : vector<8x256xf32>
    %39 = arith.addf %33, %38 : vector<8x256xf32>
    %c0_21 = arith.constant 0 : index
    %c0_22 = arith.constant 0 : index
    %c112 = arith.constant 112 : index
    %40 = vector.load %arg1[%c0_21, %c0_22, %c112] : memref<1x4x512xf32, #tpu.memory_space<vmem>>, vector<1x4x256xf32>
    %41 = vector.shape_cast %40 : vector<1x4x256xf32> to vector<4x256xf32>
    %42 = vector.extract_strided_slice %2 {offsets = [0, 1], sizes = [8, 1], strides = [1, 1]} : vector<8x36xf32> to vector<8x1xf32>
    %43 = vector.extract_strided_slice %41 {offsets = [0, 0], sizes = [1, 256], strides = [1, 1]} : vector<4x256xf32> to vector<1x256xf32>
    %44 = vector.broadcast %42 : vector<8x1xf32> to vector<8x256xf32>
    %45 = vector.broadcast %43 : vector<1x256xf32> to vector<8x256xf32>
    %46 = arith.mulf %44, %45 : vector<8x256xf32>
    %47 = arith.addf %39, %46 : vector<8x256xf32>
    %48 = vector.extract_strided_slice %2 {offsets = [0, 10], sizes = [8, 1], strides = [1, 1]} : vector<8x36xf32> to vector<8x1xf32>
    %49 = vector.extract_strided_slice %41 {offsets = [1, 0], sizes = [1, 256], strides = [1, 1]} : vector<4x256xf32> to vector<1x256xf32>
    %50 = vector.broadcast %48 : vector<8x1xf32> to vector<8x256xf32>
    %51 = vector.broadcast %49 : vector<1x256xf32> to vector<8x256xf32>
    %52 = arith.mulf %50, %51 : vector<8x256xf32>
    %53 = arith.addf %47, %52 : vector<8x256xf32>
    %54 = vector.extract_strided_slice %2 {offsets = [0, 19], sizes = [8, 1], strides = [1, 1]} : vector<8x36xf32> to vector<8x1xf32>
    %55 = vector.extract_strided_slice %41 {offsets = [2, 0], sizes = [1, 256], strides = [1, 1]} : vector<4x256xf32> to vector<1x256xf32>
    %56 = vector.broadcast %54 : vector<8x1xf32> to vector<8x256xf32>
    %57 = vector.broadcast %55 : vector<1x256xf32> to vector<8x256xf32>
    %58 = arith.mulf %56, %57 : vector<8x256xf32>
    %59 = arith.addf %53, %58 : vector<8x256xf32>
    %60 = vector.extract_strided_slice %2 {offsets = [0, 28], sizes = [8, 1], strides = [1, 1]} : vector<8x36xf32> to vector<8x1xf32>
    %61 = vector.extract_strided_slice %41 {offsets = [3, 0], sizes = [1, 256], strides = [1, 1]} : vector<4x256xf32> to vector<1x256xf32>
    %62 = vector.broadcast %60 : vector<8x1xf32> to vector<8x256xf32>
    %63 = vector.broadcast %61 : vector<1x256xf32> to vector<8x256xf32>
    %64 = arith.mulf %62, %63 : vector<8x256xf32>
    %65 = arith.addf %59, %64 : vector<8x256xf32>
    %c0_23 = arith.constant 0 : index
    %c0_24 = arith.constant 0 : index
    %c113 = arith.constant 113 : index
    %66 = vector.load %arg1[%c0_23, %c0_24, %c113] : memref<1x4x512xf32, #tpu.memory_space<vmem>>, vector<1x4x256xf32>
    %67 = vector.shape_cast %66 : vector<1x4x256xf32> to vector<4x256xf32>
    %68 = vector.broadcast %1 : vector<1x256xf32> to vector<4x256xf32>
    %69 = arith.mulf %67, %68 : vector<4x256xf32>
    %70 = vector.extract_strided_slice %2 {offsets = [0, 2], sizes = [8, 1], strides = [1, 1]} : vector<8x36xf32> to vector<8x1xf32>
    %71 = vector.extract_strided_slice %69 {offsets = [0, 0], sizes = [1, 256], strides = [1, 1]} : vector<4x256xf32> to vector<1x256xf32>
    %72 = vector.broadcast %70 : vector<8x1xf32> to vector<8x256xf32>
    %73 = vector.broadcast %71 : vector<1x256xf32> to vector<8x256xf32>
    %74 = arith.mulf %72, %73 : vector<8x256xf32>
    %75 = arith.addf %65, %74 : vector<8x256xf32>
    %76 = vector.extract_strided_slice %2 {offsets = [0, 11], sizes = [8, 1], strides = [1, 1]} : vector<8x36xf32> to vector<8x1xf32>
    %77 = vector.extract_strided_slice %69 {offsets = [1, 0], sizes = [1, 256], strides = [1, 1]} : vector<4x256xf32> to vector<1x256xf32>
    %78 = vector.broadcast %76 : vector<8x1xf32> to vector<8x256xf32>
    %79 = vector.broadcast %77 : vector<1x256xf32> to vector<8x256xf32>
    %80 = arith.mulf %78, %79 : vector<8x256xf32>
    %81 = arith.addf %75, %80 : vector<8x256xf32>
    %82 = vector.extract_strided_slice %2 {offsets = [0, 20], sizes = [8, 1], strides = [1, 1]} : vector<8x36xf32> to vector<8x1xf32>
    %83 = vector.extract_strided_slice %69 {offsets = [2, 0], sizes = [1, 256], strides = [1, 1]} : vector<4x256xf32> to vector<1x256xf32>
    %84 = vector.broadcast %82 : vector<8x1xf32> to vector<8x256xf32>
    %85 = vector.broadcast %83 : vector<1x256xf32> to vector<8x256xf32>
    %86 = arith.mulf %84, %85 : vector<8x256xf32>
    %87 = arith.addf %81, %86 : vector<8x256xf32>
    %88 = vector.extract_strided_slice %2 {offsets = [0, 29], sizes = [8, 1], strides = [1, 1]} : vector<8x36xf32> to vector<8x1xf32>
    %89 = vector.extract_strided_slice %69 {offsets = [3, 0], sizes = [1, 256], strides = [1, 1]} : vector<4x256xf32> to vector<1x256xf32>
    %90 = vector.broadcast %88 : vector<8x1xf32> to vector<8x256xf32>
    %91 = vector.broadcast %89 : vector<1x256xf32> to vector<8x256xf32>
    %92 = arith.mulf %90, %91 : vector<8x256xf32>
    %93 = arith.addf %87, %92 : vector<8x256xf32>
    %c0_25 = arith.constant 0 : index
    %c0_26 = arith.constant 0 : index
    %c127 = arith.constant 127 : index
    %94 = vector.load %arg1[%c0_25, %c0_26, %c127] : memref<1x4x512xf32, #tpu.memory_space<vmem>>, vector<1x4x256xf32>
    %95 = vector.shape_cast %94 : vector<1x4x256xf32> to vector<4x256xf32>
    %96 = vector.broadcast %0 : vector<1x256xf32> to vector<4x256xf32>
    %97 = arith.mulf %95, %96 : vector<4x256xf32>
    %98 = vector.extract_strided_slice %2 {offsets = [0, 3], sizes = [8, 1], strides = [1, 1]} : vector<8x36xf32> to vector<8x1xf32>
    %99 = vector.extract_strided_slice %97 {offsets = [0, 0], sizes = [1, 256], strides = [1, 1]} : vector<4x256xf32> to vector<1x256xf32>
    %100 = vector.broadcast %98 : vector<8x1xf32> to vector<8x256xf32>
    %101 = vector.broadcast %99 : vector<1x256xf32> to vector<8x256xf32>
    %102 = arith.mulf %100, %101 : vector<8x256xf32>
    %103 = arith.addf %93, %102 : vector<8x256xf32>
    %104 = vector.extract_strided_slice %2 {offsets = [0, 12], sizes = [8, 1], strides = [1, 1]} : vector<8x36xf32> to vector<8x1xf32>
    %105 = vector.extract_strided_slice %97 {offsets = [1, 0], sizes = [1, 256], strides = [1, 1]} : vector<4x256xf32> to vector<1x256xf32>
    %106 = vector.broadcast %104 : vector<8x1xf32> to vector<8x256xf32>
    %107 = vector.broadcast %105 : vector<1x256xf32> to vector<8x256xf32>
    %108 = arith.mulf %106, %107 : vector<8x256xf32>
    %109 = arith.addf %103, %108 : vector<8x256xf32>
    %110 = vector.extract_strided_slice %2 {offsets = [0, 21], sizes = [8, 1], strides = [1, 1]} : vector<8x36xf32> to vector<8x1xf32>
    %111 = vector.extract_strided_slice %97 {offsets = [2, 0], sizes = [1, 256], strides = [1, 1]} : vector<4x256xf32> to vector<1x256xf32>
    %112 = vector.broadcast %110 : vector<8x1xf32> to vector<8x256xf32>
    %113 = vector.broadcast %111 : vector<1x256xf32> to vector<8x256xf32>
    %114 = arith.mulf %112, %113 : vector<8x256xf32>
    %115 = arith.addf %109, %114 : vector<8x256xf32>
    %116 = vector.extract_strided_slice %2 {offsets = [0, 30], sizes = [8, 1], strides = [1, 1]} : vector<8x36xf32> to vector<8x1xf32>
    %117 = vector.extract_strided_slice %97 {offsets = [3, 0], sizes = [1, 256], strides = [1, 1]} : vector<4x256xf32> to vector<1x256xf32>
    %118 = vector.broadcast %116 : vector<8x1xf32> to vector<8x256xf32>
    %119 = vector.broadcast %117 : vector<1x256xf32> to vector<8x256xf32>
    %120 = arith.mulf %118, %119 : vector<8x256xf32>
    %121 = arith.addf %115, %120 : vector<8x256xf32>
    %122 = vector.extract_strided_slice %2 {offsets = [0, 4], sizes = [8, 1], strides = [1, 1]} : vector<8x36xf32> to vector<8x1xf32>
    %123 = vector.extract_strided_slice %10 {offsets = [0, 0], sizes = [1, 256], strides = [1, 1]} : vector<4x256xf32> to vector<1x256xf32>
    %124 = vector.broadcast %122 : vector<8x1xf32> to vector<8x256xf32>
    %125 = vector.broadcast %123 : vector<1x256xf32> to vector<8x256xf32>
    %126 = arith.mulf %124, %125 : vector<8x256xf32>
    %127 = arith.addf %121, %126 : vector<8x256xf32>
    %128 = vector.extract_strided_slice %2 {offsets = [0, 13], sizes = [8, 1], strides = [1, 1]} : vector<8x36xf32> to vector<8x1xf32>
    %129 = vector.extract_strided_slice %10 {offsets = [1, 0], sizes = [1, 256], strides = [1, 1]} : vector<4x256xf32> to vector<1x256xf32>
    %130 = vector.broadcast %128 : vector<8x1xf32> to vector<8x256xf32>
    %131 = vector.broadcast %129 : vector<1x256xf32> to vector<8x256xf32>
    %132 = arith.mulf %130, %131 : vector<8x256xf32>
    %133 = arith.addf %127, %132 : vector<8x256xf32>
    %134 = vector.extract_strided_slice %2 {offsets = [0, 22], sizes = [8, 1], strides = [1, 1]} : vector<8x36xf32> to vector<8x1xf32>
    %135 = vector.extract_strided_slice %10 {offsets = [2, 0], sizes = [1, 256], strides = [1, 1]} : vector<4x256xf32> to vector<1x256xf32>
    %136 = vector.broadcast %134 : vector<8x1xf32> to vector<8x256xf32>
    %137 = vector.broadcast %135 : vector<1x256xf32> to vector<8x256xf32>
    %138 = arith.mulf %136, %137 : vector<8x256xf32>
    %139 = arith.addf %133, %138 : vector<8x256xf32>
    %140 = vector.extract_strided_slice %2 {offsets = [0, 31], sizes = [8, 1], strides = [1, 1]} : vector<8x36xf32> to vector<8x1xf32>
    %141 = vector.extract_strided_slice %10 {offsets = [3, 0], sizes = [1, 256], strides = [1, 1]} : vector<4x256xf32> to vector<1x256xf32>
    %142 = vector.broadcast %140 : vector<8x1xf32> to vector<8x256xf32>
    %143 = vector.broadcast %141 : vector<1x256xf32> to vector<8x256xf32>
    %144 = arith.mulf %142, %143 : vector<8x256xf32>
    %145 = arith.addf %139, %144 : vector<8x256xf32>
    %c0_27 = arith.constant 0 : index
    %c0_28 = arith.constant 0 : index
    %c129 = arith.constant 129 : index
    %146 = vector.load %arg1[%c0_27, %c0_28, %c129] : memref<1x4x512xf32, #tpu.memory_space<vmem>>, vector<1x4x256xf32>
    %147 = vector.shape_cast %146 : vector<1x4x256xf32> to vector<4x256xf32>
    %148 = vector.broadcast %1 : vector<1x256xf32> to vector<4x256xf32>
    %149 = arith.mulf %147, %148 : vector<4x256xf32>
    %150 = vector.extract_strided_slice %2 {offsets = [0, 5], sizes = [8, 1], strides = [1, 1]} : vector<8x36xf32> to vector<8x1xf32>
    %151 = vector.extract_strided_slice %149 {offsets = [0, 0], sizes = [1, 256], strides = [1, 1]} : vector<4x256xf32> to vector<1x256xf32>
    %152 = vector.broadcast %150 : vector<8x1xf32> to vector<8x256xf32>
    %153 = vector.broadcast %151 : vector<1x256xf32> to vector<8x256xf32>
    %154 = arith.mulf %152, %153 : vector<8x256xf32>
    %155 = arith.addf %145, %154 : vector<8x256xf32>
    %156 = vector.extract_strided_slice %2 {offsets = [0, 14], sizes = [8, 1], strides = [1, 1]} : vector<8x36xf32> to vector<8x1xf32>
    %157 = vector.extract_strided_slice %149 {offsets = [1, 0], sizes = [1, 256], strides = [1, 1]} : vector<4x256xf32> to vector<1x256xf32>
    %158 = vector.broadcast %156 : vector<8x1xf32> to vector<8x256xf32>
    %159 = vector.broadcast %157 : vector<1x256xf32> to vector<8x256xf32>
    %160 = arith.mulf %158, %159 : vector<8x256xf32>
    %161 = arith.addf %155, %160 : vector<8x256xf32>
    %162 = vector.extract_strided_slice %2 {offsets = [0, 23], sizes = [8, 1], strides = [1, 1]} : vector<8x36xf32> to vector<8x1xf32>
    %163 = vector.extract_strided_slice %149 {offsets = [2, 0], sizes = [1, 256], strides = [1, 1]} : vector<4x256xf32> to vector<1x256xf32>
    %164 = vector.broadcast %162 : vector<8x1xf32> to vector<8x256xf32>
    %165 = vector.broadcast %163 : vector<1x256xf32> to vector<8x256xf32>
    %166 = arith.mulf %164, %165 : vector<8x256xf32>
    %167 = arith.addf %161, %166 : vector<8x256xf32>
    %168 = vector.extract_strided_slice %2 {offsets = [0, 32], sizes = [8, 1], strides = [1, 1]} : vector<8x36xf32> to vector<8x1xf32>
    %169 = vector.extract_strided_slice %149 {offsets = [3, 0], sizes = [1, 256], strides = [1, 1]} : vector<4x256xf32> to vector<1x256xf32>
    %170 = vector.broadcast %168 : vector<8x1xf32> to vector<8x256xf32>
    %171 = vector.broadcast %169 : vector<1x256xf32> to vector<8x256xf32>
    %172 = arith.mulf %170, %171 : vector<8x256xf32>
    %173 = arith.addf %167, %172 : vector<8x256xf32>
    %c0_29 = arith.constant 0 : index
    %c0_30 = arith.constant 0 : index
    %c143 = arith.constant 143 : index
    %174 = vector.load %arg1[%c0_29, %c0_30, %c143] : memref<1x4x512xf32, #tpu.memory_space<vmem>>, vector<1x4x256xf32>
    %175 = vector.shape_cast %174 : vector<1x4x256xf32> to vector<4x256xf32>
    %176 = vector.broadcast %0 : vector<1x256xf32> to vector<4x256xf32>
    %177 = arith.mulf %175, %176 : vector<4x256xf32>
    %178 = vector.extract_strided_slice %2 {offsets = [0, 6], sizes = [8, 1], strides = [1, 1]} : vector<8x36xf32> to vector<8x1xf32>
    %179 = vector.extract_strided_slice %177 {offsets = [0, 0], sizes = [1, 256], strides = [1, 1]} : vector<4x256xf32> to vector<1x256xf32>
    %180 = vector.broadcast %178 : vector<8x1xf32> to vector<8x256xf32>
    %181 = vector.broadcast %179 : vector<1x256xf32> to vector<8x256xf32>
    %182 = arith.mulf %180, %181 : vector<8x256xf32>
    %183 = arith.addf %173, %182 : vector<8x256xf32>
    %184 = vector.extract_strided_slice %2 {offsets = [0, 15], sizes = [8, 1], strides = [1, 1]} : vector<8x36xf32> to vector<8x1xf32>
    %185 = vector.extract_strided_slice %177 {offsets = [1, 0], sizes = [1, 256], strides = [1, 1]} : vector<4x256xf32> to vector<1x256xf32>
    %186 = vector.broadcast %184 : vector<8x1xf32> to vector<8x256xf32>
    %187 = vector.broadcast %185 : vector<1x256xf32> to vector<8x256xf32>
    %188 = arith.mulf %186, %187 : vector<8x256xf32>
    %189 = arith.addf %183, %188 : vector<8x256xf32>
    %190 = vector.extract_strided_slice %2 {offsets = [0, 24], sizes = [8, 1], strides = [1, 1]} : vector<8x36xf32> to vector<8x1xf32>
    %191 = vector.extract_strided_slice %177 {offsets = [2, 0], sizes = [1, 256], strides = [1, 1]} : vector<4x256xf32> to vector<1x256xf32>
    %192 = vector.broadcast %190 : vector<8x1xf32> to vector<8x256xf32>
    %193 = vector.broadcast %191 : vector<1x256xf32> to vector<8x256xf32>
    %194 = arith.mulf %192, %193 : vector<8x256xf32>
    %195 = arith.addf %189, %194 : vector<8x256xf32>
    %196 = vector.extract_strided_slice %2 {offsets = [0, 33], sizes = [8, 1], strides = [1, 1]} : vector<8x36xf32> to vector<8x1xf32>
    %197 = vector.extract_strided_slice %177 {offsets = [3, 0], sizes = [1, 256], strides = [1, 1]} : vector<4x256xf32> to vector<1x256xf32>
    %198 = vector.broadcast %196 : vector<8x1xf32> to vector<8x256xf32>
    %199 = vector.broadcast %197 : vector<1x256xf32> to vector<8x256xf32>
    %200 = arith.mulf %198, %199 : vector<8x256xf32>
    %201 = arith.addf %195, %200 : vector<8x256xf32>
    %c0_31 = arith.constant 0 : index
    %c0_32 = arith.constant 0 : index
    %c144 = arith.constant 144 : index
    %202 = vector.load %arg1[%c0_31, %c0_32, %c144] : memref<1x4x512xf32, #tpu.memory_space<vmem>>, vector<1x4x256xf32>
    %203 = vector.shape_cast %202 : vector<1x4x256xf32> to vector<4x256xf32>
    %204 = vector.extract_strided_slice %2 {offsets = [0, 7], sizes = [8, 1], strides = [1, 1]} : vector<8x36xf32> to vector<8x1xf32>
    %205 = vector.extract_strided_slice %203 {offsets = [0, 0], sizes = [1, 256], strides = [1, 1]} : vector<4x256xf32> to vector<1x256xf32>
    %206 = vector.broadcast %204 : vector<8x1xf32> to vector<8x256xf32>
    %207 = vector.broadcast %205 : vector<1x256xf32> to vector<8x256xf32>
    %208 = arith.mulf %206, %207 : vector<8x256xf32>
    %209 = arith.addf %201, %208 : vector<8x256xf32>
    %210 = vector.extract_strided_slice %2 {offsets = [0, 16], sizes = [8, 1], strides = [1, 1]} : vector<8x36xf32> to vector<8x1xf32>
    %211 = vector.extract_strided_slice %203 {offsets = [1, 0], sizes = [1, 256], strides = [1, 1]} : vector<4x256xf32> to vector<1x256xf32>
    %212 = vector.broadcast %210 : vector<8x1xf32> to vector<8x256xf32>
    %213 = vector.broadcast %211 : vector<1x256xf32> to vector<8x256xf32>
    %214 = arith.mulf %212, %213 : vector<8x256xf32>
    %215 = arith.addf %209, %214 : vector<8x256xf32>
    %216 = vector.extract_strided_slice %2 {offsets = [0, 25], sizes = [8, 1], strides = [1, 1]} : vector<8x36xf32> to vector<8x1xf32>
    %217 = vector.extract_strided_slice %203 {offsets = [2, 0], sizes = [1, 256], strides = [1, 1]} : vector<4x256xf32> to vector<1x256xf32>
    %218 = vector.broadcast %216 : vector<8x1xf32> to vector<8x256xf32>
    %219 = vector.broadcast %217 : vector<1x256xf32> to vector<8x256xf32>
    %220 = arith.mulf %218, %219 : vector<8x256xf32>
    %221 = arith.addf %215, %220 : vector<8x256xf32>
    %222 = vector.extract_strided_slice %2 {offsets = [0, 34], sizes = [8, 1], strides = [1, 1]} : vector<8x36xf32> to vector<8x1xf32>
    %223 = vector.extract_strided_slice %203 {offsets = [3, 0], sizes = [1, 256], strides = [1, 1]} : vector<4x256xf32> to vector<1x256xf32>
    %224 = vector.broadcast %222 : vector<8x1xf32> to vector<8x256xf32>
    %225 = vector.broadcast %223 : vector<1x256xf32> to vector<8x256xf32>
    %226 = arith.mulf %224, %225 : vector<8x256xf32>
    %227 = arith.addf %221, %226 : vector<8x256xf32>
    %c0_33 = arith.constant 0 : index
    %c0_34 = arith.constant 0 : index
    %c145 = arith.constant 145 : index
    %228 = vector.load %arg1[%c0_33, %c0_34, %c145] : memref<1x4x512xf32, #tpu.memory_space<vmem>>, vector<1x4x256xf32>
    %229 = vector.shape_cast %228 : vector<1x4x256xf32> to vector<4x256xf32>
    %230 = vector.broadcast %1 : vector<1x256xf32> to vector<4x256xf32>
    %231 = arith.mulf %229, %230 : vector<4x256xf32>
    %232 = vector.extract_strided_slice %2 {offsets = [0, 8], sizes = [8, 1], strides = [1, 1]} : vector<8x36xf32> to vector<8x1xf32>
    %233 = vector.extract_strided_slice %231 {offsets = [0, 0], sizes = [1, 256], strides = [1, 1]} : vector<4x256xf32> to vector<1x256xf32>
    %234 = vector.broadcast %232 : vector<8x1xf32> to vector<8x256xf32>
    %235 = vector.broadcast %233 : vector<1x256xf32> to vector<8x256xf32>
    %236 = arith.mulf %234, %235 : vector<8x256xf32>
    %237 = arith.addf %227, %236 : vector<8x256xf32>
    %238 = vector.extract_strided_slice %2 {offsets = [0, 17], sizes = [8, 1], strides = [1, 1]} : vector<8x36xf32> to vector<8x1xf32>
    %239 = vector.extract_strided_slice %231 {offsets = [1, 0], sizes = [1, 256], strides = [1, 1]} : vector<4x256xf32> to vector<1x256xf32>
    %240 = vector.broadcast %238 : vector<8x1xf32> to vector<8x256xf32>
    %241 = vector.broadcast %239 : vector<1x256xf32> to vector<8x256xf32>
    %242 = arith.mulf %240, %241 : vector<8x256xf32>
    %243 = arith.addf %237, %242 : vector<8x256xf32>
    %244 = vector.extract_strided_slice %2 {offsets = [0, 26], sizes = [8, 1], strides = [1, 1]} : vector<8x36xf32> to vector<8x1xf32>
    %245 = vector.extract_strided_slice %231 {offsets = [2, 0], sizes = [1, 256], strides = [1, 1]} : vector<4x256xf32> to vector<1x256xf32>
    %246 = vector.broadcast %244 : vector<8x1xf32> to vector<8x256xf32>
    %247 = vector.broadcast %245 : vector<1x256xf32> to vector<8x256xf32>
    %248 = arith.mulf %246, %247 : vector<8x256xf32>
    %249 = arith.addf %243, %248 : vector<8x256xf32>
    %250 = vector.extract_strided_slice %2 {offsets = [0, 35], sizes = [8, 1], strides = [1, 1]} : vector<8x36xf32> to vector<8x1xf32>
    %251 = vector.extract_strided_slice %231 {offsets = [3, 0], sizes = [1, 256], strides = [1, 1]} : vector<4x256xf32> to vector<1x256xf32>
    %252 = vector.broadcast %250 : vector<8x1xf32> to vector<8x256xf32>
    %253 = vector.broadcast %251 : vector<1x256xf32> to vector<8x256xf32>
    %254 = arith.mulf %252, %253 : vector<8x256xf32>
    %255 = arith.addf %249, %254 : vector<8x256xf32>
    %cst_35 = arith.constant dense<0.000000e+00> : vector<8xf32>
    %256 = vector.multi_reduction <add>, %255, %cst_35 [1] : vector<8x256xf32> to vector<8xf32>
    %257 = vector.shape_cast %256 : vector<8xf32> to vector<8x1xf32>
    %cst_36 = arith.constant dense<0.000000e+00> : vector<1xf32>
    %258 = vector.multi_reduction <add>, %257, %cst_36 [0] : vector<8x1xf32> to vector<1xf32>
    %259 = vector.shape_cast %258 : vector<1xf32> to vector<1x1xf32>
    %cst_37 = arith.constant 4.8828125E-4 : f32
    %260 = vector.broadcast %cst_37 : f32 to vector<1x1xf32>
    %261 = arith.mulf %259, %260 : vector<1x1xf32>
    %262 = vector.broadcast %261 : vector<1x1xf32> to vector<8x256xf32>
    %263 = arith.subf %255, %262 : vector<8x256xf32>
    %264 = arith.mulf %263, %263 : vector<8x256xf32>
    %cst_38 = arith.constant dense<0.000000e+00> : vector<8xf32>
    %265 = vector.multi_reduction <add>, %264, %cst_38 [1] : vector<8x256xf32> to vector<8xf32>
    %266 = vector.shape_cast %265 : vector<8xf32> to vector<8x1xf32>
    %cst_39 = arith.constant dense<0.000000e+00> : vector<1xf32>
    %267 = vector.multi_reduction <add>, %266, %cst_39 [0] : vector<8x1xf32> to vector<1xf32>
    %268 = vector.shape_cast %267 : vector<1xf32> to vector<1x1xf32>
    %cst_40 = arith.constant 4.8828125E-4 : f32
    %269 = vector.broadcast %cst_40 : f32 to vector<1x1xf32>
    %270 = arith.mulf %268, %269 : vector<1x1xf32>
    %cst_41 = arith.constant 9.99999974E-6 : f32
    %271 = vector.broadcast %cst_41 : f32 to vector<1x1xf32>
    %272 = arith.addf %270, %271 : vector<1x1xf32>
    %273 = math.rsqrt %272 : vector<1x1xf32>
    %274 = vector.broadcast %273 : vector<1x1xf32> to vector<8x256xf32>
    %275 = arith.mulf %263, %274 : vector<8x256xf32>
    %276 = vector.broadcast %5 : vector<8x1xf32> to vector<8x256xf32>
    %277 = arith.mulf %275, %276 : vector<8x256xf32>
    %278 = vector.broadcast %6 : vector<8x1xf32> to vector<8x256xf32>
    %279 = arith.addf %277, %278 : vector<8x256xf32>
    %cst_42 = arith.constant 0.000000e+00 : f32
    %280 = vector.broadcast %cst_42 : f32 to vector<8x256xf32>
    %281 = arith.maximumf %279, %280 : vector<8x256xf32>
    %cst_43 = arith.constant 0.000000e+00 : f32
    %282 = vector.broadcast %cst_43 : f32 to vector<8x512xf32>
    %c0_44 = arith.constant 0 : index
    %c0_45 = arith.constant 0 : index
    %283 = vector.load %arg12[%c0_44, %c0_45] : memref<8x512xf32, #tpu.memory_space<vmem>>, vector<8x512xf32>
    tpu.vector_store %arg12[%c0_44, %c0_45], %282 {strides = array<i32>} : memref<8x512xf32, #tpu.memory_space<vmem>>, vector<8x512xf32>,
    %c0_46 = arith.constant 0 : index
    %c128_47 = arith.constant 128 : index
    %284 = vector.load %arg12[%c0_46, %c128_47] : memref<8x512xf32, #tpu.memory_space<vmem>>, vector<8x256xf32>
    tpu.vector_store %arg12[%c0_46, %c128_47], %281 {strides = array<i32>} : memref<8x512xf32, #tpu.memory_space<vmem>>, vector<8x256xf32>,
    %cst_48 = arith.constant 0.000000e+00 : f32
    %285 = vector.broadcast %cst_48 : f32 to vector<8x256xf32>
    %c0_49 = arith.constant 0 : index
    %c111_50 = arith.constant 111 : index
    %286 = vector.load %arg12[%c0_49, %c111_50] : memref<8x512xf32, #tpu.memory_space<vmem>>, vector<8x256xf32>
    %287 = vector.broadcast %0 : vector<1x256xf32> to vector<8x256xf32>
    %288 = arith.mulf %286, %287 : vector<8x256xf32>
    %289 = vector.extract_strided_slice %3 {offsets = [0, 0], sizes = [8, 1], strides = [1, 1]} : vector<8x72xf32> to vector<8x1xf32>
    %290 = vector.extract_strided_slice %288 {offsets = [0, 0], sizes = [1, 256], strides = [1, 1]} : vector<8x256xf32> to vector<1x256xf32>
    %291 = vector.broadcast %289 : vector<8x1xf32> to vector<8x256xf32>
    %292 = vector.broadcast %290 : vector<1x256xf32> to vector<8x256xf32>
    %293 = arith.mulf %291, %292 : vector<8x256xf32>
    %294 = arith.addf %285, %293 : vector<8x256xf32>
    %295 = vector.extract_strided_slice %3 {offsets = [0, 9], sizes = [8, 1], strides = [1, 1]} : vector<8x72xf32> to vector<8x1xf32>
    %296 = vector.extract_strided_slice %288 {offsets = [1, 0], sizes = [1, 256], strides = [1, 1]} : vector<8x256xf32> to vector<1x256xf32>
    %297 = vector.broadcast %295 : vector<8x1xf32> to vector<8x256xf32>
    %298 = vector.broadcast %296 : vector<1x256xf32> to vector<8x256xf32>
    %299 = arith.mulf %297, %298 : vector<8x256xf32>
    %300 = arith.addf %294, %299 : vector<8x256xf32>
    %301 = vector.extract_strided_slice %3 {offsets = [0, 18], sizes = [8, 1], strides = [1, 1]} : vector<8x72xf32> to vector<8x1xf32>
    %302 = vector.extract_strided_slice %288 {offsets = [2, 0], sizes = [1, 256], strides = [1, 1]} : vector<8x256xf32> to vector<1x256xf32>
    %303 = vector.broadcast %301 : vector<8x1xf32> to vector<8x256xf32>
    %304 = vector.broadcast %302 : vector<1x256xf32> to vector<8x256xf32>
    %305 = arith.mulf %303, %304 : vector<8x256xf32>
    %306 = arith.addf %300, %305 : vector<8x256xf32>
    %307 = vector.extract_strided_slice %3 {offsets = [0, 27], sizes = [8, 1], strides = [1, 1]} : vector<8x72xf32> to vector<8x1xf32>
    %308 = vector.extract_strided_slice %288 {offsets = [3, 0], sizes = [1, 256], strides = [1, 1]} : vector<8x256xf32> to vector<1x256xf32>
    %309 = vector.broadcast %307 : vector<8x1xf32> to vector<8x256xf32>
    %310 = vector.broadcast %308 : vector<1x256xf32> to vector<8x256xf32>
    %311 = arith.mulf %309, %310 : vector<8x256xf32>
    %312 = arith.addf %306, %311 : vector<8x256xf32>
    %313 = vector.extract_strided_slice %3 {offsets = [0, 36], sizes = [8, 1], strides = [1, 1]} : vector<8x72xf32> to vector<8x1xf32>
    %314 = vector.extract_strided_slice %288 {offsets = [4, 0], sizes = [1, 256], strides = [1, 1]} : vector<8x256xf32> to vector<1x256xf32>
    %315 = vector.broadcast %313 : vector<8x1xf32> to vector<8x256xf32>
    %316 = vector.broadcast %314 : vector<1x256xf32> to vector<8x256xf32>
    %317 = arith.mulf %315, %316 : vector<8x256xf32>
    %318 = arith.addf %312, %317 : vector<8x256xf32>
    %319 = vector.extract_strided_slice %3 {offsets = [0, 45], sizes = [8, 1], strides = [1, 1]} : vector<8x72xf32> to vector<8x1xf32>
    %320 = vector.extract_strided_slice %288 {offsets = [5, 0], sizes = [1, 256], strides = [1, 1]} : vector<8x256xf32> to vector<1x256xf32>
    %321 = vector.broadcast %319 : vector<8x1xf32> to vector<8x256xf32>
    %322 = vector.broadcast %320 : vector<1x256xf32> to vector<8x256xf32>
    %323 = arith.mulf %321, %322 : vector<8x256xf32>
    %324 = arith.addf %318, %323 : vector<8x256xf32>
    %325 = vector.extract_strided_slice %3 {offsets = [0, 54], sizes = [8, 1], strides = [1, 1]} : vector<8x72xf32> to vector<8x1xf32>
    %326 = vector.extract_strided_slice %288 {offsets = [6, 0], sizes = [1, 256], strides = [1, 1]} : vector<8x256xf32> to vector<1x256xf32>
    %327 = vector.broadcast %325 : vector<8x1xf32> to vector<8x256xf32>
    %328 = vector.broadcast %326 : vector<1x256xf32> to vector<8x256xf32>
    %329 = arith.mulf %327, %328 : vector<8x256xf32>
    %330 = arith.addf %324, %329 : vector<8x256xf32>
    %331 = vector.extract_strided_slice %3 {offsets = [0, 63], sizes = [8, 1], strides = [1, 1]} : vector<8x72xf32> to vector<8x1xf32>
    %332 = vector.extract_strided_slice %288 {offsets = [7, 0], sizes = [1, 256], strides = [1, 1]} : vector<8x256xf32> to vector<1x256xf32>
    %333 = vector.broadcast %331 : vector<8x1xf32> to vector<8x256xf32>
    %334 = vector.broadcast %332 : vector<1x256xf32> to vector<8x256xf32>
    %335 = arith.mulf %333, %334 : vector<8x256xf32>
    %336 = arith.addf %330, %335 : vector<8x256xf32>
    %c0_51 = arith.constant 0 : index
    %c112_52 = arith.constant 112 : index
    %337 = vector.load %arg12[%c0_51, %c112_52] : memref<8x512xf32, #tpu.memory_space<vmem>>, vector<8x256xf32>
    %338 = vector.extract_strided_slice %3 {offsets = [0, 1], sizes = [8, 1], strides = [1, 1]} : vector<8x72xf32> to vector<8x1xf32>
    %339 = vector.extract_strided_slice %337 {offsets = [0, 0], sizes = [1, 256], strides = [1, 1]} : vector<8x256xf32> to vector<1x256xf32>
    %340 = vector.broadcast %338 : vector<8x1xf32> to vector<8x256xf32>
    %341 = vector.broadcast %339 : vector<1x256xf32> to vector<8x256xf32>
    %342 = arith.mulf %340, %341 : vector<8x256xf32>
    %343 = arith.addf %336, %342 : vector<8x256xf32>
    %344 = vector.extract_strided_slice %3 {offsets = [0, 10], sizes = [8, 1], strides = [1, 1]} : vector<8x72xf32> to vector<8x1xf32>
    %345 = vector.extract_strided_slice %337 {offsets = [1, 0], sizes = [1, 256], strides = [1, 1]} : vector<8x256xf32> to vector<1x256xf32>
    %346 = vector.broadcast %344 : vector<8x1xf32> to vector<8x256xf32>
    %347 = vector.broadcast %345 : vector<1x256xf32> to vector<8x256xf32>
    %348 = arith.mulf %346, %347 : vector<8x256xf32>
    %349 = arith.addf %343, %348 : vector<8x256xf32>
    %350 = vector.extract_strided_slice %3 {offsets = [0, 19], sizes = [8, 1], strides = [1, 1]} : vector<8x72xf32> to vector<8x1xf32>
    %351 = vector.extract_strided_slice %337 {offsets = [2, 0], sizes = [1, 256], strides = [1, 1]} : vector<8x256xf32> to vector<1x256xf32>
    %352 = vector.broadcast %350 : vector<8x1xf32> to vector<8x256xf32>
    %353 = vector.broadcast %351 : vector<1x256xf32> to vector<8x256xf32>
    %354 = arith.mulf %352, %353 : vector<8x256xf32>
    %355 = arith.addf %349, %354 : vector<8x256xf32>
    %356 = vector.extract_strided_slice %3 {offsets = [0, 28], sizes = [8, 1], strides = [1, 1]} : vector<8x72xf32> to vector<8x1xf32>
    %357 = vector.extract_strided_slice %337 {offsets = [3, 0], sizes = [1, 256], strides = [1, 1]} : vector<8x256xf32> to vector<1x256xf32>
    %358 = vector.broadcast %356 : vector<8x1xf32> to vector<8x256xf32>
    %359 = vector.broadcast %357 : vector<1x256xf32> to vector<8x256xf32>
    %360 = arith.mulf %358, %359 : vector<8x256xf32>
    %361 = arith.addf %355, %360 : vector<8x256xf32>
    %362 = vector.extract_strided_slice %3 {offsets = [0, 37], sizes = [8, 1], strides = [1, 1]} : vector<8x72xf32> to vector<8x1xf32>
    %363 = vector.extract_strided_slice %337 {offsets = [4, 0], sizes = [1, 256], strides = [1, 1]} : vector<8x256xf32> to vector<1x256xf32>
    %364 = vector.broadcast %362 : vector<8x1xf32> to vector<8x256xf32>
    %365 = vector.broadcast %363 : vector<1x256xf32> to vector<8x256xf32>
    %366 = arith.mulf %364, %365 : vector<8x256xf32>
    %367 = arith.addf %361, %366 : vector<8x256xf32>
    %368 = vector.extract_strided_slice %3 {offsets = [0, 46], sizes = [8, 1], strides = [1, 1]} : vector<8x72xf32> to vector<8x1xf32>
    %369 = vector.extract_strided_slice %337 {offsets = [5, 0], sizes = [1, 256], strides = [1, 1]} : vector<8x256xf32> to vector<1x256xf32>
    %370 = vector.broadcast %368 : vector<8x1xf32> to vector<8x256xf32>
    %371 = vector.broadcast %369 : vector<1x256xf32> to vector<8x256xf32>
    %372 = arith.mulf %370, %371 : vector<8x256xf32>
    %373 = arith.addf %367, %372 : vector<8x256xf32>
    %374 = vector.extract_strided_slice %3 {offsets = [0, 55], sizes = [8, 1], strides = [1, 1]} : vector<8x72xf32> to vector<8x1xf32>
    %375 = vector.extract_strided_slice %337 {offsets = [6, 0], sizes = [1, 256], strides = [1, 1]} : vector<8x256xf32> to vector<1x256xf32>
    %376 = vector.broadcast %374 : vector<8x1xf32> to vector<8x256xf32>
    %377 = vector.broadcast %375 : vector<1x256xf32> to vector<8x256xf32>
    %378 = arith.mulf %376, %377 : vector<8x256xf32>
    %379 = arith.addf %373, %378 : vector<8x256xf32>
    %380 = vector.extract_strided_slice %3 {offsets = [0, 64], sizes = [8, 1], strides = [1, 1]} : vector<8x72xf32> to vector<8x1xf32>
    %381 = vector.extract_strided_slice %337 {offsets = [7, 0], sizes = [1, 256], strides = [1, 1]} : vector<8x256xf32> to vector<1x256xf32>
    %382 = vector.broadcast %380 : vector<8x1xf32> to vector<8x256xf32>
    %383 = vector.broadcast %381 : vector<1x256xf32> to vector<8x256xf32>
    %384 = arith.mulf %382, %383 : vector<8x256xf32>
    %385 = arith.addf %379, %384 : vector<8x256xf32>
    %c0_53 = arith.constant 0 : index
    %c113_54 = arith.constant 113 : index
    %386 = vector.load %arg12[%c0_53, %c113_54] : memref<8x512xf32, #tpu.memory_space<vmem>>, vector<8x256xf32>
    %387 = vector.broadcast %1 : vector<1x256xf32> to vector<8x256xf32>
    %388 = arith.mulf %386, %387 : vector<8x256xf32>
    %389 = vector.extract_strided_slice %3 {offsets = [0, 2], sizes = [8, 1], strides = [1, 1]} : vector<8x72xf32> to vector<8x1xf32>
    %390 = vector.extract_strided_slice %388 {offsets = [0, 0], sizes = [1, 256], strides = [1, 1]} : vector<8x256xf32> to vector<1x256xf32>
    %391 = vector.broadcast %389 : vector<8x1xf32> to vector<8x256xf32>
    %392 = vector.broadcast %390 : vector<1x256xf32> to vector<8x256xf32>
    %393 = arith.mulf %391, %392 : vector<8x256xf32>
    %394 = arith.addf %385, %393 : vector<8x256xf32>
    %395 = vector.extract_strided_slice %3 {offsets = [0, 11], sizes = [8, 1], strides = [1, 1]} : vector<8x72xf32> to vector<8x1xf32>
    %396 = vector.extract_strided_slice %388 {offsets = [1, 0], sizes = [1, 256], strides = [1, 1]} : vector<8x256xf32> to vector<1x256xf32>
    %397 = vector.broadcast %395 : vector<8x1xf32> to vector<8x256xf32>
    %398 = vector.broadcast %396 : vector<1x256xf32> to vector<8x256xf32>
    %399 = arith.mulf %397, %398 : vector<8x256xf32>
    %400 = arith.addf %394, %399 : vector<8x256xf32>
    %401 = vector.extract_strided_slice %3 {offsets = [0, 20], sizes = [8, 1], strides = [1, 1]} : vector<8x72xf32> to vector<8x1xf32>
    %402 = vector.extract_strided_slice %388 {offsets = [2, 0], sizes = [1, 256], strides = [1, 1]} : vector<8x256xf32> to vector<1x256xf32>
    %403 = vector.broadcast %401 : vector<8x1xf32> to vector<8x256xf32>
    %404 = vector.broadcast %402 : vector<1x256xf32> to vector<8x256xf32>
    %405 = arith.mulf %403, %404 : vector<8x256xf32>
    %406 = arith.addf %400, %405 : vector<8x256xf32>
    %407 = vector.extract_strided_slice %3 {offsets = [0, 29], sizes = [8, 1], strides = [1, 1]} : vector<8x72xf32> to vector<8x1xf32>
    %408 = vector.extract_strided_slice %388 {offsets = [3, 0], sizes = [1, 256], strides = [1, 1]} : vector<8x256xf32> to vector<1x256xf32>
    %409 = vector.broadcast %407 : vector<8x1xf32> to vector<8x256xf32>
    %410 = vector.broadcast %408 : vector<1x256xf32> to vector<8x256xf32>
    %411 = arith.mulf %409, %410 : vector<8x256xf32>
    %412 = arith.addf %406, %411 : vector<8x256xf32>
    %413 = vector.extract_strided_slice %3 {offsets = [0, 38], sizes = [8, 1], strides = [1, 1]} : vector<8x72xf32> to vector<8x1xf32>
    %414 = vector.extract_strided_slice %388 {offsets = [4, 0], sizes = [1, 256], strides = [1, 1]} : vector<8x256xf32> to vector<1x256xf32>
    %415 = vector.broadcast %413 : vector<8x1xf32> to vector<8x256xf32>
    %416 = vector.broadcast %414 : vector<1x256xf32> to vector<8x256xf32>
    %417 = arith.mulf %415, %416 : vector<8x256xf32>
    %418 = arith.addf %412, %417 : vector<8x256xf32>
    %419 = vector.extract_strided_slice %3 {offsets = [0, 47], sizes = [8, 1], strides = [1, 1]} : vector<8x72xf32> to vector<8x1xf32>
    %420 = vector.extract_strided_slice %388 {offsets = [5, 0], sizes = [1, 256], strides = [1, 1]} : vector<8x256xf32> to vector<1x256xf32>
    %421 = vector.broadcast %419 : vector<8x1xf32> to vector<8x256xf32>
    %422 = vector.broadcast %420 : vector<1x256xf32> to vector<8x256xf32>
    %423 = arith.mulf %421, %422 : vector<8x256xf32>
    %424 = arith.addf %418, %423 : vector<8x256xf32>
    %425 = vector.extract_strided_slice %3 {offsets = [0, 56], sizes = [8, 1], strides = [1, 1]} : vector<8x72xf32> to vector<8x1xf32>
    %426 = vector.extract_strided_slice %388 {offsets = [6, 0], sizes = [1, 256], strides = [1, 1]} : vector<8x256xf32> to vector<1x256xf32>
    %427 = vector.broadcast %425 : vector<8x1xf32> to vector<8x256xf32>
    %428 = vector.broadcast %426 : vector<1x256xf32> to vector<8x256xf32>
    %429 = arith.mulf %427, %428 : vector<8x256xf32>
    %430 = arith.addf %424, %429 : vector<8x256xf32>
    %431 = vector.extract_strided_slice %3 {offsets = [0, 65], sizes = [8, 1], strides = [1, 1]} : vector<8x72xf32> to vector<8x1xf32>
    %432 = vector.extract_strided_slice %388 {offsets = [7, 0], sizes = [1, 256], strides = [1, 1]} : vector<8x256xf32> to vector<1x256xf32>
    %433 = vector.broadcast %431 : vector<8x1xf32> to vector<8x256xf32>
    %434 = vector.broadcast %432 : vector<1x256xf32> to vector<8x256xf32>
    %435 = arith.mulf %433, %434 : vector<8x256xf32>
    %436 = arith.addf %430, %435 : vector<8x256xf32>
    %c0_55 = arith.constant 0 : index
    %c127_56 = arith.constant 127 : index
    %437 = vector.load %arg12[%c0_55, %c127_56] : memref<8x512xf32, #tpu.memory_space<vmem>>, vector<8x256xf32>
    %438 = vector.broadcast %0 : vector<1x256xf32> to vector<8x256xf32>
    %439 = arith.mulf %437, %438 : vector<8x256xf32>
    %440 = vector.extract_strided_slice %3 {offsets = [0, 3], sizes = [8, 1], strides = [1, 1]} : vector<8x72xf32> to vector<8x1xf32>
    %441 = vector.extract_strided_slice %439 {offsets = [0, 0], sizes = [1, 256], strides = [1, 1]} : vector<8x256xf32> to vector<1x256xf32>
    %442 = vector.broadcast %440 : vector<8x1xf32> to vector<8x256xf32>
    %443 = vector.broadcast %441 : vector<1x256xf32> to vector<8x256xf32>
    %444 = arith.mulf %442, %443 : vector<8x256xf32>
    %445 = arith.addf %436, %444 : vector<8x256xf32>
    %446 = vector.extract_strided_slice %3 {offsets = [0, 12], sizes = [8, 1], strides = [1, 1]} : vector<8x72xf32> to vector<8x1xf32>
    %447 = vector.extract_strided_slice %439 {offsets = [1, 0], sizes = [1, 256], strides = [1, 1]} : vector<8x256xf32> to vector<1x256xf32>
    %448 = vector.broadcast %446 : vector<8x1xf32> to vector<8x256xf32>
    %449 = vector.broadcast %447 : vector<1x256xf32> to vector<8x256xf32>
    %450 = arith.mulf %448, %449 : vector<8x256xf32>
    %451 = arith.addf %445, %450 : vector<8x256xf32>
    %452 = vector.extract_strided_slice %3 {offsets = [0, 21], sizes = [8, 1], strides = [1, 1]} : vector<8x72xf32> to vector<8x1xf32>
    %453 = vector.extract_strided_slice %439 {offsets = [2, 0], sizes = [1, 256], strides = [1, 1]} : vector<8x256xf32> to vector<1x256xf32>
    %454 = vector.broadcast %452 : vector<8x1xf32> to vector<8x256xf32>
    %455 = vector.broadcast %453 : vector<1x256xf32> to vector<8x256xf32>
    %456 = arith.mulf %454, %455 : vector<8x256xf32>
    %457 = arith.addf %451, %456 : vector<8x256xf32>
    %458 = vector.extract_strided_slice %3 {offsets = [0, 30], sizes = [8, 1], strides = [1, 1]} : vector<8x72xf32> to vector<8x1xf32>
    %459 = vector.extract_strided_slice %439 {offsets = [3, 0], sizes = [1, 256], strides = [1, 1]} : vector<8x256xf32> to vector<1x256xf32>
    %460 = vector.broadcast %458 : vector<8x1xf32> to vector<8x256xf32>
    %461 = vector.broadcast %459 : vector<1x256xf32> to vector<8x256xf32>
    %462 = arith.mulf %460, %461 : vector<8x256xf32>
    %463 = arith.addf %457, %462 : vector<8x256xf32>
    %464 = vector.extract_strided_slice %3 {offsets = [0, 39], sizes = [8, 1], strides = [1, 1]} : vector<8x72xf32> to vector<8x1xf32>
    %465 = vector.extract_strided_slice %439 {offsets = [4, 0], sizes = [1, 256], strides = [1, 1]} : vector<8x256xf32> to vector<1x256xf32>
    %466 = vector.broadcast %464 : vector<8x1xf32> to vector<8x256xf32>
    %467 = vector.broadcast %465 : vector<1x256xf32> to vector<8x256xf32>
    %468 = arith.mulf %466, %467 : vector<8x256xf32>
    %469 = arith.addf %463, %468 : vector<8x256xf32>
    %470 = vector.extract_strided_slice %3 {offsets = [0, 48], sizes = [8, 1], strides = [1, 1]} : vector<8x72xf32> to vector<8x1xf32>
    %471 = vector.extract_strided_slice %439 {offsets = [5, 0], sizes = [1, 256], strides = [1, 1]} : vector<8x256xf32> to vector<1x256xf32>
    %472 = vector.broadcast %470 : vector<8x1xf32> to vector<8x256xf32>
    %473 = vector.broadcast %471 : vector<1x256xf32> to vector<8x256xf32>
    %474 = arith.mulf %472, %473 : vector<8x256xf32>
    %475 = arith.addf %469, %474 : vector<8x256xf32>
    %476 = vector.extract_strided_slice %3 {offsets = [0, 57], sizes = [8, 1], strides = [1, 1]} : vector<8x72xf32> to vector<8x1xf32>
    %477 = vector.extract_strided_slice %439 {offsets = [6, 0], sizes = [1, 256], strides = [1, 1]} : vector<8x256xf32> to vector<1x256xf32>
    %478 = vector.broadcast %476 : vector<8x1xf32> to vector<8x256xf32>
    %479 = vector.broadcast %477 : vector<1x256xf32> to vector<8x256xf32>
    %480 = arith.mulf %478, %479 : vector<8x256xf32>
    %481 = arith.addf %475, %480 : vector<8x256xf32>
    %482 = vector.extract_strided_slice %3 {offsets = [0, 66], sizes = [8, 1], strides = [1, 1]} : vector<8x72xf32> to vector<8x1xf32>
    %483 = vector.extract_strided_slice %439 {offsets = [7, 0], sizes = [1, 256], strides = [1, 1]} : vector<8x256xf32> to vector<1x256xf32>
    %484 = vector.broadcast %482 : vector<8x1xf32> to vector<8x256xf32>
    %485 = vector.broadcast %483 : vector<1x256xf32> to vector<8x256xf32>
    %486 = arith.mulf %484, %485 : vector<8x256xf32>
    %487 = arith.addf %481, %486 : vector<8x256xf32>
    %c0_57 = arith.constant 0 : index
    %c128_58 = arith.constant 128 : index
    %488 = vector.load %arg12[%c0_57, %c128_58] : memref<8x512xf32, #tpu.memory_space<vmem>>, vector<8x256xf32>
    %489 = vector.extract_strided_slice %3 {offsets = [0, 4], sizes = [8, 1], strides = [1, 1]} : vector<8x72xf32> to vector<8x1xf32>
    %490 = vector.extract_strided_slice %488 {offsets = [0, 0], sizes = [1, 256], strides = [1, 1]} : vector<8x256xf32> to vector<1x256xf32>
    %491 = vector.broadcast %489 : vector<8x1xf32> to vector<8x256xf32>
    %492 = vector.broadcast %490 : vector<1x256xf32> to vector<8x256xf32>
    %493 = arith.mulf %491, %492 : vector<8x256xf32>
    %494 = arith.addf %487, %493 : vector<8x256xf32>
    %495 = vector.extract_strided_slice %3 {offsets = [0, 13], sizes = [8, 1], strides = [1, 1]} : vector<8x72xf32> to vector<8x1xf32>
    %496 = vector.extract_strided_slice %488 {offsets = [1, 0], sizes = [1, 256], strides = [1, 1]} : vector<8x256xf32> to vector<1x256xf32>
    %497 = vector.broadcast %495 : vector<8x1xf32> to vector<8x256xf32>
    %498 = vector.broadcast %496 : vector<1x256xf32> to vector<8x256xf32>
    %499 = arith.mulf %497, %498 : vector<8x256xf32>
    %500 = arith.addf %494, %499 : vector<8x256xf32>
    %501 = vector.extract_strided_slice %3 {offsets = [0, 22], sizes = [8, 1], strides = [1, 1]} : vector<8x72xf32> to vector<8x1xf32>
    %502 = vector.extract_strided_slice %488 {offsets = [2, 0], sizes = [1, 256], strides = [1, 1]} : vector<8x256xf32> to vector<1x256xf32>
    %503 = vector.broadcast %501 : vector<8x1xf32> to vector<8x256xf32>
    %504 = vector.broadcast %502 : vector<1x256xf32> to vector<8x256xf32>
    %505 = arith.mulf %503, %504 : vector<8x256xf32>
    %506 = arith.addf %500, %505 : vector<8x256xf32>
    %507 = vector.extract_strided_slice %3 {offsets = [0, 31], sizes = [8, 1], strides = [1, 1]} : vector<8x72xf32> to vector<8x1xf32>
    %508 = vector.extract_strided_slice %488 {offsets = [3, 0], sizes = [1, 256], strides = [1, 1]} : vector<8x256xf32> to vector<1x256xf32>
    %509 = vector.broadcast %507 : vector<8x1xf32> to vector<8x256xf32>
    %510 = vector.broadcast %508 : vector<1x256xf32> to vector<8x256xf32>
    %511 = arith.mulf %509, %510 : vector<8x256xf32>
    %512 = arith.addf %506, %511 : vector<8x256xf32>
    %513 = vector.extract_strided_slice %3 {offsets = [0, 40], sizes = [8, 1], strides = [1, 1]} : vector<8x72xf32> to vector<8x1xf32>
    %514 = vector.extract_strided_slice %488 {offsets = [4, 0], sizes = [1, 256], strides = [1, 1]} : vector<8x256xf32> to vector<1x256xf32>
    %515 = vector.broadcast %513 : vector<8x1xf32> to vector<8x256xf32>
    %516 = vector.broadcast %514 : vector<1x256xf32> to vector<8x256xf32>
    %517 = arith.mulf %515, %516 : vector<8x256xf32>
    %518 = arith.addf %512, %517 : vector<8x256xf32>
    %519 = vector.extract_strided_slice %3 {offsets = [0, 49], sizes = [8, 1], strides = [1, 1]} : vector<8x72xf32> to vector<8x1xf32>
    %520 = vector.extract_strided_slice %488 {offsets = [5, 0], sizes = [1, 256], strides = [1, 1]} : vector<8x256xf32> to vector<1x256xf32>
    %521 = vector.broadcast %519 : vector<8x1xf32> to vector<8x256xf32>
    %522 = vector.broadcast %520 : vector<1x256xf32> to vector<8x256xf32>
    %523 = arith.mulf %521, %522 : vector<8x256xf32>
    %524 = arith.addf %518, %523 : vector<8x256xf32>
    %525 = vector.extract_strided_slice %3 {offsets = [0, 58], sizes = [8, 1], strides = [1, 1]} : vector<8x72xf32> to vector<8x1xf32>
    %526 = vector.extract_strided_slice %488 {offsets = [6, 0], sizes = [1, 256], strides = [1, 1]} : vector<8x256xf32> to vector<1x256xf32>
    %527 = vector.broadcast %525 : vector<8x1xf32> to vector<8x256xf32>
    %528 = vector.broadcast %526 : vector<1x256xf32> to vector<8x256xf32>
    %529 = arith.mulf %527, %528 : vector<8x256xf32>
    %530 = arith.addf %524, %529 : vector<8x256xf32>
    %531 = vector.extract_strided_slice %3 {offsets = [0, 67], sizes = [8, 1], strides = [1, 1]} : vector<8x72xf32> to vector<8x1xf32>
    %532 = vector.extract_strided_slice %488 {offsets = [7, 0], sizes = [1, 256], strides = [1, 1]} : vector<8x256xf32> to vector<1x256xf32>
    %533 = vector.broadcast %531 : vector<8x1xf32> to vector<8x256xf32>
    %534 = vector.broadcast %532 : vector<1x256xf32> to vector<8x256xf32>
    %535 = arith.mulf %533, %534 : vector<8x256xf32>
    %536 = arith.addf %530, %535 : vector<8x256xf32>
    %c0_59 = arith.constant 0 : index
    %c129_60 = arith.constant 129 : index
    %537 = vector.load %arg12[%c0_59, %c129_60] : memref<8x512xf32, #tpu.memory_space<vmem>>, vector<8x256xf32>
    %538 = vector.broadcast %1 : vector<1x256xf32> to vector<8x256xf32>
    %539 = arith.mulf %537, %538 : vector<8x256xf32>
    %540 = vector.extract_strided_slice %3 {offsets = [0, 5], sizes = [8, 1], strides = [1, 1]} : vector<8x72xf32> to vector<8x1xf32>
    %541 = vector.extract_strided_slice %539 {offsets = [0, 0], sizes = [1, 256], strides = [1, 1]} : vector<8x256xf32> to vector<1x256xf32>
    %542 = vector.broadcast %540 : vector<8x1xf32> to vector<8x256xf32>
    %543 = vector.broadcast %541 : vector<1x256xf32> to vector<8x256xf32>
    %544 = arith.mulf %542, %543 : vector<8x256xf32>
    %545 = arith.addf %536, %544 : vector<8x256xf32>
    %546 = vector.extract_strided_slice %3 {offsets = [0, 14], sizes = [8, 1], strides = [1, 1]} : vector<8x72xf32> to vector<8x1xf32>
    %547 = vector.extract_strided_slice %539 {offsets = [1, 0], sizes = [1, 256], strides = [1, 1]} : vector<8x256xf32> to vector<1x256xf32>
    %548 = vector.broadcast %546 : vector<8x1xf32> to vector<8x256xf32>
    %549 = vector.broadcast %547 : vector<1x256xf32> to vector<8x256xf32>
    %550 = arith.mulf %548, %549 : vector<8x256xf32>
    %551 = arith.addf %545, %550 : vector<8x256xf32>
    %552 = vector.extract_strided_slice %3 {offsets = [0, 23], sizes = [8, 1], strides = [1, 1]} : vector<8x72xf32> to vector<8x1xf32>
    %553 = vector.extract_strided_slice %539 {offsets = [2, 0], sizes = [1, 256], strides = [1, 1]} : vector<8x256xf32> to vector<1x256xf32>
    %554 = vector.broadcast %552 : vector<8x1xf32> to vector<8x256xf32>
    %555 = vector.broadcast %553 : vector<1x256xf32> to vector<8x256xf32>
    %556 = arith.mulf %554, %555 : vector<8x256xf32>
    %557 = arith.addf %551, %556 : vector<8x256xf32>
    %558 = vector.extract_strided_slice %3 {offsets = [0, 32], sizes = [8, 1], strides = [1, 1]} : vector<8x72xf32> to vector<8x1xf32>
    %559 = vector.extract_strided_slice %539 {offsets = [3, 0], sizes = [1, 256], strides = [1, 1]} : vector<8x256xf32> to vector<1x256xf32>
    %560 = vector.broadcast %558 : vector<8x1xf32> to vector<8x256xf32>
    %561 = vector.broadcast %559 : vector<1x256xf32> to vector<8x256xf32>
    %562 = arith.mulf %560, %561 : vector<8x256xf32>
    %563 = arith.addf %557, %562 : vector<8x256xf32>
    %564 = vector.extract_strided_slice %3 {offsets = [0, 41], sizes = [8, 1], strides = [1, 1]} : vector<8x72xf32> to vector<8x1xf32>
    %565 = vector.extract_strided_slice %539 {offsets = [4, 0], sizes = [1, 256], strides = [1, 1]} : vector<8x256xf32> to vector<1x256xf32>
    %566 = vector.broadcast %564 : vector<8x1xf32> to vector<8x256xf32>
    %567 = vector.broadcast %565 : vector<1x256xf32> to vector<8x256xf32>
    %568 = arith.mulf %566, %567 : vector<8x256xf32>
    %569 = arith.addf %563, %568 : vector<8x256xf32>
    %570 = vector.extract_strided_slice %3 {offsets = [0, 50], sizes = [8, 1], strides = [1, 1]} : vector<8x72xf32> to vector<8x1xf32>
    %571 = vector.extract_strided_slice %539 {offsets = [5, 0], sizes = [1, 256], strides = [1, 1]} : vector<8x256xf32> to vector<1x256xf32>
    %572 = vector.broadcast %570 : vector<8x1xf32> to vector<8x256xf32>
    %573 = vector.broadcast %571 : vector<1x256xf32> to vector<8x256xf32>
    %574 = arith.mulf %572, %573 : vector<8x256xf32>
    %575 = arith.addf %569, %574 : vector<8x256xf32>
    %576 = vector.extract_strided_slice %3 {offsets = [0, 59], sizes = [8, 1], strides = [1, 1]} : vector<8x72xf32> to vector<8x1xf32>
    %577 = vector.extract_strided_slice %539 {offsets = [6, 0], sizes = [1, 256], strides = [1, 1]} : vector<8x256xf32> to vector<1x256xf32>
    %578 = vector.broadcast %576 : vector<8x1xf32> to vector<8x256xf32>
    %579 = vector.broadcast %577 : vector<1x256xf32> to vector<8x256xf32>
    %580 = arith.mulf %578, %579 : vector<8x256xf32>
    %581 = arith.addf %575, %580 : vector<8x256xf32>
    %582 = vector.extract_strided_slice %3 {offsets = [0, 68], sizes = [8, 1], strides = [1, 1]} : vector<8x72xf32> to vector<8x1xf32>
    %583 = vector.extract_strided_slice %539 {offsets = [7, 0], sizes = [1, 256], strides = [1, 1]} : vector<8x256xf32> to vector<1x256xf32>
    %584 = vector.broadcast %582 : vector<8x1xf32> to vector<8x256xf32>
    %585 = vector.broadcast %583 : vector<1x256xf32> to vector<8x256xf32>
    %586 = arith.mulf %584, %585 : vector<8x256xf32>
    %587 = arith.addf %581, %586 : vector<8x256xf32>
    %c0_61 = arith.constant 0 : index
    %c143_62 = arith.constant 143 : index
    %588 = vector.load %arg12[%c0_61, %c143_62] : memref<8x512xf32, #tpu.memory_space<vmem>>, vector<8x256xf32>
    %589 = vector.broadcast %0 : vector<1x256xf32> to vector<8x256xf32>
    %590 = arith.mulf %588, %589 : vector<8x256xf32>
    %591 = vector.extract_strided_slice %3 {offsets = [0, 6], sizes = [8, 1], strides = [1, 1]} : vector<8x72xf32> to vector<8x1xf32>
    %592 = vector.extract_strided_slice %590 {offsets = [0, 0], sizes = [1, 256], strides = [1, 1]} : vector<8x256xf32> to vector<1x256xf32>
    %593 = vector.broadcast %591 : vector<8x1xf32> to vector<8x256xf32>
    %594 = vector.broadcast %592 : vector<1x256xf32> to vector<8x256xf32>
    %595 = arith.mulf %593, %594 : vector<8x256xf32>
    %596 = arith.addf %587, %595 : vector<8x256xf32>
    %597 = vector.extract_strided_slice %3 {offsets = [0, 15], sizes = [8, 1], strides = [1, 1]} : vector<8x72xf32> to vector<8x1xf32>
    %598 = vector.extract_strided_slice %590 {offsets = [1, 0], sizes = [1, 256], strides = [1, 1]} : vector<8x256xf32> to vector<1x256xf32>
    %599 = vector.broadcast %597 : vector<8x1xf32> to vector<8x256xf32>
    %600 = vector.broadcast %598 : vector<1x256xf32> to vector<8x256xf32>
    %601 = arith.mulf %599, %600 : vector<8x256xf32>
    %602 = arith.addf %596, %601 : vector<8x256xf32>
    %603 = vector.extract_strided_slice %3 {offsets = [0, 24], sizes = [8, 1], strides = [1, 1]} : vector<8x72xf32> to vector<8x1xf32>
    %604 = vector.extract_strided_slice %590 {offsets = [2, 0], sizes = [1, 256], strides = [1, 1]} : vector<8x256xf32> to vector<1x256xf32>
    %605 = vector.broadcast %603 : vector<8x1xf32> to vector<8x256xf32>
    %606 = vector.broadcast %604 : vector<1x256xf32> to vector<8x256xf32>
    %607 = arith.mulf %605, %606 : vector<8x256xf32>
    %608 = arith.addf %602, %607 : vector<8x256xf32>
    %609 = vector.extract_strided_slice %3 {offsets = [0, 33], sizes = [8, 1], strides = [1, 1]} : vector<8x72xf32> to vector<8x1xf32>
    %610 = vector.extract_strided_slice %590 {offsets = [3, 0], sizes = [1, 256], strides = [1, 1]} : vector<8x256xf32> to vector<1x256xf32>
    %611 = vector.broadcast %609 : vector<8x1xf32> to vector<8x256xf32>
    %612 = vector.broadcast %610 : vector<1x256xf32> to vector<8x256xf32>
    %613 = arith.mulf %611, %612 : vector<8x256xf32>
    %614 = arith.addf %608, %613 : vector<8x256xf32>
    %615 = vector.extract_strided_slice %3 {offsets = [0, 42], sizes = [8, 1], strides = [1, 1]} : vector<8x72xf32> to vector<8x1xf32>
    %616 = vector.extract_strided_slice %590 {offsets = [4, 0], sizes = [1, 256], strides = [1, 1]} : vector<8x256xf32> to vector<1x256xf32>
    %617 = vector.broadcast %615 : vector<8x1xf32> to vector<8x256xf32>
    %618 = vector.broadcast %616 : vector<1x256xf32> to vector<8x256xf32>
    %619 = arith.mulf %617, %618 : vector<8x256xf32>
    %620 = arith.addf %614, %619 : vector<8x256xf32>
    %621 = vector.extract_strided_slice %3 {offsets = [0, 51], sizes = [8, 1], strides = [1, 1]} : vector<8x72xf32> to vector<8x1xf32>
    %622 = vector.extract_strided_slice %590 {offsets = [5, 0], sizes = [1, 256], strides = [1, 1]} : vector<8x256xf32> to vector<1x256xf32>
    %623 = vector.broadcast %621 : vector<8x1xf32> to vector<8x256xf32>
    %624 = vector.broadcast %622 : vector<1x256xf32> to vector<8x256xf32>
    %625 = arith.mulf %623, %624 : vector<8x256xf32>
    %626 = arith.addf %620, %625 : vector<8x256xf32>
    %627 = vector.extract_strided_slice %3 {offsets = [0, 60], sizes = [8, 1], strides = [1, 1]} : vector<8x72xf32> to vector<8x1xf32>
    %628 = vector.extract_strided_slice %590 {offsets = [6, 0], sizes = [1, 256], strides = [1, 1]} : vector<8x256xf32> to vector<1x256xf32>
    %629 = vector.broadcast %627 : vector<8x1xf32> to vector<8x256xf32>
    %630 = vector.broadcast %628 : vector<1x256xf32> to vector<8x256xf32>
    %631 = arith.mulf %629, %630 : vector<8x256xf32>
    %632 = arith.addf %626, %631 : vector<8x256xf32>
    %633 = vector.extract_strided_slice %3 {offsets = [0, 69], sizes = [8, 1], strides = [1, 1]} : vector<8x72xf32> to vector<8x1xf32>
    %634 = vector.extract_strided_slice %590 {offsets = [7, 0], sizes = [1, 256], strides = [1, 1]} : vector<8x256xf32> to vector<1x256xf32>
    %635 = vector.broadcast %633 : vector<8x1xf32> to vector<8x256xf32>
    %636 = vector.broadcast %634 : vector<1x256xf32> to vector<8x256xf32>
    %637 = arith.mulf %635, %636 : vector<8x256xf32>
    %638 = arith.addf %632, %637 : vector<8x256xf32>
    %c0_63 = arith.constant 0 : index
    %c144_64 = arith.constant 144 : index
    %639 = vector.load %arg12[%c0_63, %c144_64] : memref<8x512xf32, #tpu.memory_space<vmem>>, vector<8x256xf32>
    %640 = vector.extract_strided_slice %3 {offsets = [0, 7], sizes = [8, 1], strides = [1, 1]} : vector<8x72xf32> to vector<8x1xf32>
    %641 = vector.extract_strided_slice %639 {offsets = [0, 0], sizes = [1, 256], strides = [1, 1]} : vector<8x256xf32> to vector<1x256xf32>
    %642 = vector.broadcast %640 : vector<8x1xf32> to vector<8x256xf32>
    %643 = vector.broadcast %641 : vector<1x256xf32> to vector<8x256xf32>
    %644 = arith.mulf %642, %643 : vector<8x256xf32>
    %645 = arith.addf %638, %644 : vector<8x256xf32>
    %646 = vector.extract_strided_slice %3 {offsets = [0, 16], sizes = [8, 1], strides = [1, 1]} : vector<8x72xf32> to vector<8x1xf32>
    %647 = vector.extract_strided_slice %639 {offsets = [1, 0], sizes = [1, 256], strides = [1, 1]} : vector<8x256xf32> to vector<1x256xf32>
    %648 = vector.broadcast %646 : vector<8x1xf32> to vector<8x256xf32>
    %649 = vector.broadcast %647 : vector<1x256xf32> to vector<8x256xf32>
    %650 = arith.mulf %648, %649 : vector<8x256xf32>
    %651 = arith.addf %645, %650 : vector<8x256xf32>
    %652 = vector.extract_strided_slice %3 {offsets = [0, 25], sizes = [8, 1], strides = [1, 1]} : vector<8x72xf32> to vector<8x1xf32>
    %653 = vector.extract_strided_slice %639 {offsets = [2, 0], sizes = [1, 256], strides = [1, 1]} : vector<8x256xf32> to vector<1x256xf32>
    %654 = vector.broadcast %652 : vector<8x1xf32> to vector<8x256xf32>
    %655 = vector.broadcast %653 : vector<1x256xf32> to vector<8x256xf32>
    %656 = arith.mulf %654, %655 : vector<8x256xf32>
    %657 = arith.addf %651, %656 : vector<8x256xf32>
    %658 = vector.extract_strided_slice %3 {offsets = [0, 34], sizes = [8, 1], strides = [1, 1]} : vector<8x72xf32> to vector<8x1xf32>
    %659 = vector.extract_strided_slice %639 {offsets = [3, 0], sizes = [1, 256], strides = [1, 1]} : vector<8x256xf32> to vector<1x256xf32>
    %660 = vector.broadcast %658 : vector<8x1xf32> to vector<8x256xf32>
    %661 = vector.broadcast %659 : vector<1x256xf32> to vector<8x256xf32>
    %662 = arith.mulf %660, %661 : vector<8x256xf32>
    %663 = arith.addf %657, %662 : vector<8x256xf32>
    %664 = vector.extract_strided_slice %3 {offsets = [0, 43], sizes = [8, 1], strides = [1, 1]} : vector<8x72xf32> to vector<8x1xf32>
    %665 = vector.extract_strided_slice %639 {offsets = [4, 0], sizes = [1, 256], strides = [1, 1]} : vector<8x256xf32> to vector<1x256xf32>
    %666 = vector.broadcast %664 : vector<8x1xf32> to vector<8x256xf32>
    %667 = vector.broadcast %665 : vector<1x256xf32> to vector<8x256xf32>
    %668 = arith.mulf %666, %667 : vector<8x256xf32>
    %669 = arith.addf %663, %668 : vector<8x256xf32>
    %670 = vector.extract_strided_slice %3 {offsets = [0, 52], sizes = [8, 1], strides = [1, 1]} : vector<8x72xf32> to vector<8x1xf32>
    %671 = vector.extract_strided_slice %639 {offsets = [5, 0], sizes = [1, 256], strides = [1, 1]} : vector<8x256xf32> to vector<1x256xf32>
    %672 = vector.broadcast %670 : vector<8x1xf32> to vector<8x256xf32>
    %673 = vector.broadcast %671 : vector<1x256xf32> to vector<8x256xf32>
    %674 = arith.mulf %672, %673 : vector<8x256xf32>
    %675 = arith.addf %669, %674 : vector<8x256xf32>
    %676 = vector.extract_strided_slice %3 {offsets = [0, 61], sizes = [8, 1], strides = [1, 1]} : vector<8x72xf32> to vector<8x1xf32>
    %677 = vector.extract_strided_slice %639 {offsets = [6, 0], sizes = [1, 256], strides = [1, 1]} : vector<8x256xf32> to vector<1x256xf32>
    %678 = vector.broadcast %676 : vector<8x1xf32> to vector<8x256xf32>
    %679 = vector.broadcast %677 : vector<1x256xf32> to vector<8x256xf32>
    %680 = arith.mulf %678, %679 : vector<8x256xf32>
    %681 = arith.addf %675, %680 : vector<8x256xf32>
    %682 = vector.extract_strided_slice %3 {offsets = [0, 70], sizes = [8, 1], strides = [1, 1]} : vector<8x72xf32> to vector<8x1xf32>
    %683 = vector.extract_strided_slice %639 {offsets = [7, 0], sizes = [1, 256], strides = [1, 1]} : vector<8x256xf32> to vector<1x256xf32>
    %684 = vector.broadcast %682 : vector<8x1xf32> to vector<8x256xf32>
    %685 = vector.broadcast %683 : vector<1x256xf32> to vector<8x256xf32>
    %686 = arith.mulf %684, %685 : vector<8x256xf32>
    %687 = arith.addf %681, %686 : vector<8x256xf32>
    %c0_65 = arith.constant 0 : index
    %c145_66 = arith.constant 145 : index
    %688 = vector.load %arg12[%c0_65, %c145_66] : memref<8x512xf32, #tpu.memory_space<vmem>>, vector<8x256xf32>
    %689 = vector.broadcast %1 : vector<1x256xf32> to vector<8x256xf32>
    %690 = arith.mulf %688, %689 : vector<8x256xf32>
    %691 = vector.extract_strided_slice %3 {offsets = [0, 8], sizes = [8, 1], strides = [1, 1]} : vector<8x72xf32> to vector<8x1xf32>
    %692 = vector.extract_strided_slice %690 {offsets = [0, 0], sizes = [1, 256], strides = [1, 1]} : vector<8x256xf32> to vector<1x256xf32>
    %693 = vector.broadcast %691 : vector<8x1xf32> to vector<8x256xf32>
    %694 = vector.broadcast %692 : vector<1x256xf32> to vector<8x256xf32>
    %695 = arith.mulf %693, %694 : vector<8x256xf32>
    %696 = arith.addf %687, %695 : vector<8x256xf32>
    %697 = vector.extract_strided_slice %3 {offsets = [0, 17], sizes = [8, 1], strides = [1, 1]} : vector<8x72xf32> to vector<8x1xf32>
    %698 = vector.extract_strided_slice %690 {offsets = [1, 0], sizes = [1, 256], strides = [1, 1]} : vector<8x256xf32> to vector<1x256xf32>
    %699 = vector.broadcast %697 : vector<8x1xf32> to vector<8x256xf32>
    %700 = vector.broadcast %698 : vector<1x256xf32> to vector<8x256xf32>
    %701 = arith.mulf %699, %700 : vector<8x256xf32>
    %702 = arith.addf %696, %701 : vector<8x256xf32>
    %703 = vector.extract_strided_slice %3 {offsets = [0, 26], sizes = [8, 1], strides = [1, 1]} : vector<8x72xf32> to vector<8x1xf32>
    %704 = vector.extract_strided_slice %690 {offsets = [2, 0], sizes = [1, 256], strides = [1, 1]} : vector<8x256xf32> to vector<1x256xf32>
    %705 = vector.broadcast %703 : vector<8x1xf32> to vector<8x256xf32>
    %706 = vector.broadcast %704 : vector<1x256xf32> to vector<8x256xf32>
    %707 = arith.mulf %705, %706 : vector<8x256xf32>
    %708 = arith.addf %702, %707 : vector<8x256xf32>
    %709 = vector.extract_strided_slice %3 {offsets = [0, 35], sizes = [8, 1], strides = [1, 1]} : vector<8x72xf32> to vector<8x1xf32>
    %710 = vector.extract_strided_slice %690 {offsets = [3, 0], sizes = [1, 256], strides = [1, 1]} : vector<8x256xf32> to vector<1x256xf32>
    %711 = vector.broadcast %709 : vector<8x1xf32> to vector<8x256xf32>
    %712 = vector.broadcast %710 : vector<1x256xf32> to vector<8x256xf32>
    %713 = arith.mulf %711, %712 : vector<8x256xf32>
    %714 = arith.addf %708, %713 : vector<8x256xf32>
    %715 = vector.extract_strided_slice %3 {offsets = [0, 44], sizes = [8, 1], strides = [1, 1]} : vector<8x72xf32> to vector<8x1xf32>
    %716 = vector.extract_strided_slice %690 {offsets = [4, 0], sizes = [1, 256], strides = [1, 1]} : vector<8x256xf32> to vector<1x256xf32>
    %717 = vector.broadcast %715 : vector<8x1xf32> to vector<8x256xf32>
    %718 = vector.broadcast %716 : vector<1x256xf32> to vector<8x256xf32>
    %719 = arith.mulf %717, %718 : vector<8x256xf32>
    %720 = arith.addf %714, %719 : vector<8x256xf32>
    %721 = vector.extract_strided_slice %3 {offsets = [0, 53], sizes = [8, 1], strides = [1, 1]} : vector<8x72xf32> to vector<8x1xf32>
    %722 = vector.extract_strided_slice %690 {offsets = [5, 0], sizes = [1, 256], strides = [1, 1]} : vector<8x256xf32> to vector<1x256xf32>
    %723 = vector.broadcast %721 : vector<8x1xf32> to vector<8x256xf32>
    %724 = vector.broadcast %722 : vector<1x256xf32> to vector<8x256xf32>
    %725 = arith.mulf %723, %724 : vector<8x256xf32>
    %726 = arith.addf %720, %725 : vector<8x256xf32>
    %727 = vector.extract_strided_slice %3 {offsets = [0, 62], sizes = [8, 1], strides = [1, 1]} : vector<8x72xf32> to vector<8x1xf32>
    %728 = vector.extract_strided_slice %690 {offsets = [6, 0], sizes = [1, 256], strides = [1, 1]} : vector<8x256xf32> to vector<1x256xf32>
    %729 = vector.broadcast %727 : vector<8x1xf32> to vector<8x256xf32>
    %730 = vector.broadcast %728 : vector<1x256xf32> to vector<8x256xf32>
    %731 = arith.mulf %729, %730 : vector<8x256xf32>
    %732 = arith.addf %726, %731 : vector<8x256xf32>
    %733 = vector.extract_strided_slice %3 {offsets = [0, 71], sizes = [8, 1], strides = [1, 1]} : vector<8x72xf32> to vector<8x1xf32>
    %734 = vector.extract_strided_slice %690 {offsets = [7, 0], sizes = [1, 256], strides = [1, 1]} : vector<8x256xf32> to vector<1x256xf32>
    %735 = vector.broadcast %733 : vector<8x1xf32> to vector<8x256xf32>
    %736 = vector.broadcast %734 : vector<1x256xf32> to vector<8x256xf32>
    %737 = arith.mulf %735, %736 : vector<8x256xf32>
    %738 = arith.addf %732, %737 : vector<8x256xf32>
    %cst_67 = arith.constant dense<0.000000e+00> : vector<8xf32>
    %739 = vector.multi_reduction <add>, %738, %cst_67 [1] : vector<8x256xf32> to vector<8xf32>
    %740 = vector.shape_cast %739 : vector<8xf32> to vector<8x1xf32>
    %cst_68 = arith.constant dense<0.000000e+00> : vector<1xf32>
    %741 = vector.multi_reduction <add>, %740, %cst_68 [0] : vector<8x1xf32> to vector<1xf32>
    %742 = vector.shape_cast %741 : vector<1xf32> to vector<1x1xf32>
    %cst_69 = arith.constant 4.8828125E-4 : f32
    %743 = vector.broadcast %cst_69 : f32 to vector<1x1xf32>
    %744 = arith.mulf %742, %743 : vector<1x1xf32>
    %745 = vector.broadcast %744 : vector<1x1xf32> to vector<8x256xf32>
    %746 = arith.subf %738, %745 : vector<8x256xf32>
    %747 = arith.mulf %746, %746 : vector<8x256xf32>
    %cst_70 = arith.constant dense<0.000000e+00> : vector<8xf32>
    %748 = vector.multi_reduction <add>, %747, %cst_70 [1] : vector<8x256xf32> to vector<8xf32>
    %749 = vector.shape_cast %748 : vector<8xf32> to vector<8x1xf32>
    %cst_71 = arith.constant dense<0.000000e+00> : vector<1xf32>
    %750 = vector.multi_reduction <add>, %749, %cst_71 [0] : vector<8x1xf32> to vector<1xf32>
    %751 = vector.shape_cast %750 : vector<1xf32> to vector<1x1xf32>
    %cst_72 = arith.constant 4.8828125E-4 : f32
    %752 = vector.broadcast %cst_72 : f32 to vector<1x1xf32>
    %753 = arith.mulf %751, %752 : vector<1x1xf32>
    %cst_73 = arith.constant 9.99999974E-6 : f32
    %754 = vector.broadcast %cst_73 : f32 to vector<1x1xf32>
    %755 = arith.addf %753, %754 : vector<1x1xf32>
    %756 = math.rsqrt %755 : vector<1x1xf32>
    %757 = vector.broadcast %756 : vector<1x1xf32> to vector<8x256xf32>
    %758 = arith.mulf %746, %757 : vector<8x256xf32>
    %759 = vector.broadcast %7 : vector<8x1xf32> to vector<8x256xf32>
    %760 = arith.mulf %758, %759 : vector<8x256xf32>
    %761 = vector.broadcast %8 : vector<8x1xf32> to vector<8x256xf32>
    %762 = arith.addf %760, %761 : vector<8x256xf32>
    %cst_74 = arith.constant 0.000000e+00 : f32
    %763 = vector.broadcast %cst_74 : f32 to vector<8x256xf32>
    %764 = vector.extract_strided_slice %4 {offsets = [0, 0], sizes = [8, 1], strides = [1, 1]} : vector<8x4xf32> to vector<8x1xf32>
    %765 = vector.extract_strided_slice %10 {offsets = [0, 0], sizes = [1, 256], strides = [1, 1]} : vector<4x256xf32> to vector<1x256xf32>
    %766 = vector.broadcast %764 : vector<8x1xf32> to vector<8x256xf32>
    %767 = vector.broadcast %765 : vector<1x256xf32> to vector<8x256xf32>
    %768 = arith.mulf %766, %767 : vector<8x256xf32>
    %769 = arith.addf %763, %768 : vector<8x256xf32>
    %770 = vector.extract_strided_slice %4 {offsets = [0, 1], sizes = [8, 1], strides = [1, 1]} : vector<8x4xf32> to vector<8x1xf32>
    %771 = vector.extract_strided_slice %10 {offsets = [1, 0], sizes = [1, 256], strides = [1, 1]} : vector<4x256xf32> to vector<1x256xf32>
    %772 = vector.broadcast %770 : vector<8x1xf32> to vector<8x256xf32>
    %773 = vector.broadcast %771 : vector<1x256xf32> to vector<8x256xf32>
    %774 = arith.mulf %772, %773 : vector<8x256xf32>
    %775 = arith.addf %769, %774 : vector<8x256xf32>
    %776 = vector.extract_strided_slice %4 {offsets = [0, 2], sizes = [8, 1], strides = [1, 1]} : vector<8x4xf32> to vector<8x1xf32>
    %777 = vector.extract_strided_slice %10 {offsets = [2, 0], sizes = [1, 256], strides = [1, 1]} : vector<4x256xf32> to vector<1x256xf32>
    %778 = vector.broadcast %776 : vector<8x1xf32> to vector<8x256xf32>
    %779 = vector.broadcast %777 : vector<1x256xf32> to vector<8x256xf32>
    %780 = arith.mulf %778, %779 : vector<8x256xf32>
    %781 = arith.addf %775, %780 : vector<8x256xf32>
    %782 = vector.extract_strided_slice %4 {offsets = [0, 3], sizes = [8, 1], strides = [1, 1]} : vector<8x4xf32> to vector<8x1xf32>
    %783 = vector.extract_strided_slice %10 {offsets = [3, 0], sizes = [1, 256], strides = [1, 1]} : vector<4x256xf32> to vector<1x256xf32>
    %784 = vector.broadcast %782 : vector<8x1xf32> to vector<8x256xf32>
    %785 = vector.broadcast %783 : vector<1x256xf32> to vector<8x256xf32>
    %786 = arith.mulf %784, %785 : vector<8x256xf32>
    %787 = arith.addf %781, %786 : vector<8x256xf32>
    %788 = arith.addf %762, %787 : vector<8x256xf32>
    %cst_75 = arith.constant 0.000000e+00 : f32
    %789 = vector.broadcast %cst_75 : f32 to vector<8x256xf32>
    %790 = arith.maximumf %788, %789 : vector<8x256xf32>
    %c0_76 = arith.constant 0 : index
    %c0_77 = arith.constant 0 : index
    %791 = vector.load %arg12[%c0_76, %c0_77] : memref<8x512xf32, #tpu.memory_space<vmem>>, vector<8x256xf32>
    tpu.vector_store %arg12[%c0_76, %c0_77], %790 {strides = array<i32>} : memref<8x512xf32, #tpu.memory_space<vmem>>, vector<8x256xf32>,
    %c0_78 = arith.constant 0 : index
    %c1 = arith.constant 1 : index
    %792 = vector.load %arg12[%c0_78, %c1] : memref<8x512xf32, #tpu.memory_space<vmem>>, vector<8x256xf32>
    %c0_79 = arith.constant 0 : index
    %c16 = arith.constant 16 : index
    %793 = vector.load %arg12[%c0_79, %c16] : memref<8x512xf32, #tpu.memory_space<vmem>>, vector<8x256xf32>
    %c0_80 = arith.constant 0 : index
    %c17 = arith.constant 17 : index
    %794 = vector.load %arg12[%c0_80, %c17] : memref<8x512xf32, #tpu.memory_space<vmem>>, vector<8x256xf32>
    %795 = arith.maximumf %790, %792 : vector<8x256xf32>
    %796 = arith.maximumf %793, %794 : vector<8x256xf32>
    %797 = arith.maximumf %795, %796 : vector<8x256xf32>
    %c0_81 = arith.constant 0 : index
    %c0_82 = arith.constant 0 : index
    %c0_83 = arith.constant 0 : index
    %798 = vector.load %arg11[%c0_81, %c0_82, %c0_83] : memref<1x8x256xf32, #tpu.memory_space<vmem>>, vector<1x8x256xf32>
    %799 = vector.shape_cast %798 : vector<1x8x256xf32> to vector<8x256xf32>
    %800 = vector.shape_cast %797 : vector<8x256xf32> to vector<1x8x256xf32>
    tpu.vector_store %arg11[%c0_81, %c0_82, %c0_83], %800 {strides = array<i32>} : memref<1x8x256xf32, #tpu.memory_space<vmem>>, vector<1x8x256xf32>,
    return
  }
  func.func @transform_0(%arg0: i32) -> (i32, i32, i32) {
    %c0_i32 = arith.constant 0 : i32
    %c0_i32_0 = arith.constant 0 : i32
    %c0_i32_1 = arith.constant 0 : i32
    return %arg0, %c0_i32, %c0_i32_0 : i32, i32, i32
  }
  func.func @transform_1(%arg0: i32) -> (i32, i32) {
    %c0_i32 = arith.constant 0 : i32
    %c0_i32_0 = arith.constant 0 : i32
    %c0_i32_1 = arith.constant 0 : i32
    return %c0_i32, %c0_i32_0 : i32, i32
  }
  func.func @transform_2(%arg0: i32) -> (i32, i32) {
    %c0_i32 = arith.constant 0 : i32
    %c0_i32_0 = arith.constant 0 : i32
    %c0_i32_1 = arith.constant 0 : i32
    return %c0_i32, %c0_i32_0 : i32, i32
  }
  func.func @transform_3(%arg0: i32) -> (i32, i32) {
    %c0_i32 = arith.constant 0 : i32
    %c0_i32_0 = arith.constant 0 : i32
    %c0_i32_1 = arith.constant 0 : i32
    return %c0_i32, %c0_i32_0 : i32, i32
  }
  func.func @transform_4(%arg0: i32) -> (i32, i32) {
    %c0_i32 = arith.constant 0 : i32
    %c0_i32_0 = arith.constant 0 : i32
    %c0_i32_1 = arith.constant 0 : i32
    return %c0_i32, %c0_i32_0 : i32, i32
  }
  func.func @transform_5(%arg0: i32) -> (i32, i32) {
    %c0_i32 = arith.constant 0 : i32
    %c0_i32_0 = arith.constant 0 : i32
    %c0_i32_1 = arith.constant 0 : i32
    return %c0_i32, %c0_i32_0 : i32, i32
  }
  func.func @transform_6(%arg0: i32) -> (i32, i32) {
    %c0_i32 = arith.constant 0 : i32
    %c0_i32_0 = arith.constant 0 : i32
    %c0_i32_1 = arith.constant 0 : i32
    return %c0_i32, %c0_i32_0 : i32, i32
  }
  func.func @transform_7(%arg0: i32) -> (i32, i32) {
    %c0_i32 = arith.constant 0 : i32
    %c0_i32_0 = arith.constant 0 : i32
    %c0_i32_1 = arith.constant 0 : i32
    return %c0_i32, %c0_i32_0 : i32, i32
  }
  func.func @transform_8(%arg0: i32) -> (i32, i32) {
    %c0_i32 = arith.constant 0 : i32
    %c0_i32_0 = arith.constant 0 : i32
    %c0_i32_1 = arith.constant 0 : i32
    return %c0_i32, %c0_i32_0 : i32, i32
  }
  func.func @transform_9(%arg0: i32) -> (i32, i32) {
    %c0_i32 = arith.constant 0 : i32
    %c0_i32_0 = arith.constant 0 : i32
    %c0_i32_1 = arith.constant 0 : i32
    return %c0_i32, %c0_i32_0 : i32, i32
  }
  func.func @transform_10(%arg0: i32) -> (i32, i32, i32) {
    %c0_i32 = arith.constant 0 : i32
    %c0_i32_0 = arith.constant 0 : i32
    %c0_i32_1 = arith.constant 0 : i32
    return %arg0, %c0_i32, %c0_i32_0 : i32, i32, i32
  }
}

</mosaic_0001>

<bundles_post_ra>
// kernel: tpu_custom_call.1
= control target key start
LH: loop header
LB: loop body
LE: loop exit
PB: predicated region body
PF: predicated region fallthrough
CT: control target
= control target key end

     0   :  { %15 = vsyncpa [#allocation4], 0  ;;  %s8509_s0 = inlined_call_operand.vmem [shape: f32[2,4,512], index: 0, kind: input, shape index: {}]   ;;  %s8510_s1 = inlined_call_operand.vmem [shape: f32[8,36], index: 1, kind: input, shape index: {}]   ;;  %s8511_s2 = inlined_call_operand.vmem [shape: f32[8,72], index: 2, kind: input, shape index: {}]   ;;  %s8512_s3 = inlined_call_operand.vmem [shape: f32[8,4], index: 3, kind: input, shape index: {}]   ;;  %s8513_s4 = inlined_call_operand.vmem [shape: f32[8,1], index: 4, kind: input, shape index: {}]   ;;  %s8514_s5 = inlined_call_operand.vmem [shape: f32[8,1], index: 5, kind: input, shape index: {}]   ;;  %s8515_s6 = inlined_call_operand.vmem [shape: f32[8,1], index: 6, kind: input, shape index: {}]   ;;  %s8516_s7 = inlined_call_operand.vmem [shape: f32[8,1], index: 7, kind: input, shape index: {}]   ;;  %s8517_s8 = inlined_call_operand.vmem [shape: f32[1,256], index: 8, kind: input, shape index: {}]   ;;  %s8518_s9 = inlined_call_operand.vmem [shape: f32[1,256], index: 9, kind: input, shape index: {}]   ;;  %s8519_s10 = inlined_call_operand.hbm [shape: f32[2,8,256], index: 10, kind: output, shape index: {}]  }
   0x1   :  { %17 = vsyncpa [#allocation4 + $0x1], 0  ;;  %s5454_s13 = smov 0   ;;  %s5456_s14 = smov 0  }
   0x2   :  { %s5458_s15 = smov 0   ;;  %s5460_s16 = smov 0  }
   0x3 LB: > { %s5475_s17 = sadd.s32 4294967295, %s5311_s16   ;;  %s4991_s18 = sadd.s32 4294967294, %s5311_s16   ;;  %s5311_s16 = sphi %s5460_s16, %s9140_s16   ;;  %s5307_s15 = sphi %s5458_s15, %s9139_s15   ;;  %s5303_s14 = sphi %s5456_s14, %s9138_s14   ;;  %s5299_s13 = sphi %s5454_s13, %s9137_s13  }
   0x4   : > { %s5479_s19 = sadd.s32 1, %s5311_s16   ;;  %s245_s20 = sadd.s32 1, %s5307_s15 }
   0x5   : > { %s242_s21 = ssub.s32 %s5311_s16, %s5479_s19  ;;  %p255_p0 = scmp.ne.s32.totalorder %s5307_s15, %s5303_s14 }
   0x6   : > { %p243_p1 = scmp.eq.s32.totalorder %s242_s21, 0  ;;  %p256_p2 = scmp.eq.s32.totalorder %s5475_s17, 1 }
   0x7   : > { %p261_p3 = scmp.ne.s32.totalorder %s5303_s14, %s5299_s13  ;;  %p262_p4 = scmp.eq.s32.totalorder %s4991_s18, 1 }
   0x8   : > { %s5490_s22 = scalar_select %p243_p1, %s5307_s15, %s245_s20  }
   0x9   : > { %p5492_p5 = por %p256_p2, %p255_p0  ;;  %p5496_p6 = por %p262_p4, %p261_p3 }
   0xa   : > { %p4994_p7 = scmp.ge.s32.totalorder %s5311_s16, 1  ;;  %p315_p8 = scmp.lt.s32.totalorder %s5311_s16, 3 }
   0xc   : > { %p316_p9 = pnand %p4994_p7, %p315_p8 }
   0xe   : > { %319 = sbr.rel (%p316_p9) target bundleno = 2713 (0xa99), region = 60 }
  0x15   : > { %v5505_v0 = vld [vmem:[%s8510_s1] sm:$0xff]  ;;  %v5313_v1 = vmov 19   ;;  %v8556_v2 = vmov 1   ;;  %v371_v3 = vlaneseq  ;;  %v8554_v8 = vmov 28   ;;  %s5317_s29 = smov 113   ;;  %s5323_s12 = smov 127  }
  0x16   : > { %5131 = vset.pattern.permute.xlu1 %v5313_v1  ;;  %5129 = vset.pattern.permute.xlu0 %v8556_v2  ;;  %v359_v5 = vld [vmem:[%s8518_s9] sm:$0x3]  ;;  %v8555_v9 = vmov 10   ;;  %v8559_v13 = vmov 2   ;;  %v8558_v14 = vmov 11   ;;  %v8547_v16 = vmov 29  }
  0x17   : > { %648 = vperm.xlu1 %5131, %v5505_v0   ;;  %543 = vperm.xlu0 %5129, %v5505_v0   ;;  %v5511_v4 = vshrl.u32 %v371_v3, 7  ;;  %v358_v15 = vld [vmem:[%s8517_s8] sm:$0x3]  ;;  %v8548_v19 = vmov 20   ;;  %v8543_v21 = vmov 12   ;;  %v8544_v22 = vmov 3  }
  0x18   : > { %v8551_v23 = vmov 4   ;;  %v8546_v24 = vmov 31   ;;  %v8553_v25 = vmov 21   ;;  %v8533_v26 = vmov 14   ;;  %s5330_s18 = smov 15   ;;  %s5335_s20 = smov 1  }
  0x19   : > { %v5517_v6 = vsub.s32 0, %v5511_v4  ;;  %v5520_v7 = vsub.s32 1, %v5511_v4  ;;  %v8542_v27 = vmov 30   ;;  %v8537_v28 = vmov 13   ;;  %s5347_s21 = smov 111   ;;  %s5350_s25 = smov 17  }
  0x1a   : > { %v8529_v29 = vmov 15   ;;  %v8536_v30 = vmov 22   ;;  %v8526_v31 = vmov 7   ;;  %v8535_v32 = vmov 5   ;;  %p353_p10 = scmp.lt.s32.totalorder %s5475_s17, 1  ;;  %s8549_s28 = smov 110  }
  0x1b   : > { %5132 = vset.pattern.permute.xlu1 %v8554_v8  ;;  %5130 = vset.pattern.permute.xlu0 %v8555_v9  ;;  %v5527_v10 = vrot.slane %v359_v5, %v5517_v6  ;;  %v5530_v11 = vrot.slane %v359_v5, %v5520_v7  ;;  %v5547_v17 = vrot.slane %v358_v15, %v5517_v6  ;;  %v8524_v33 = vmov 25   ;;  %s8562_s30 = smov 96  }
  0x1c   : > { %699 = vperm.xlu1 %5132, %v5505_v0   ;;  %597 = vperm.xlu0 %5130, %v5505_v0   ;;  %v5550_v18 = vrot.slane %v358_v15, %v5520_v7  ;;  %v8523_v34 = vmov 34   ;;  %v8532_v35 = vmov 23   ;;  %v8521_v36 = vmov 8   ;;  %s354_s26 = scalar_select %p353_p10, %s5475_s17, 1 }
  0x1d   : > { %8730 = vst [vmem:[#allocation6_spill] sm:$0xff] %v5527_v10  ;;  %8731 = vst [vmem:[#allocation7_spill] sm:$0xff] %v5530_v11  ;;  %v5534_v12 = vcombine.low %v5527_v10, %v5530_v11  ;;  %v8531_v37 = vmov 32   ;;  %v8534_v38 = vmov 26   ;;  %v8530_v39 = vmov 6  }
  0x1e   : > { %8732 = vst [vmem:[#allocation8_spill] sm:$0xff] %v5547_v17  ;;  %8733 = vst [vmem:[#allocation9_spill] sm:$0xff] %v5550_v18  ;;  %v5557_v20 = vcombine.low %v5547_v17, %v5550_v18  ;;  %v8528_v40 = vmov 24   ;;  %v8527_v41 = vmov 33   ;;  %v8525_v42 = vmov 16   ;;  %s5003_s27 = sshll.u32 %s354_s26, 4 }
  0x1f   : > { %v8540_v43 = vmov 0   ;;  %v8552_v44 = vmov 9   ;;  %v8539_v45 = vmov 18   ;;  %v8538_v46 = vmov 27   ;;  %s5628_s11 = scalar_lea.vmem %s8509_s0, %s5003_s27  ;;  %s5355_s26 = smov 126  }
  0x20   : > { %759 = vrot.lane.b32.xlu1 %v5534_v12, %s5317_s29  ;;  %5133 = vset.pattern.permute.xlu0 %v8559_v13  ;;  %v8520_v47 = vmov 17   ;;  %v5632_v48 = vsub.s32 4, %v5511_v4  ;;  %v5635_v49 = vld [vmem:[%s5628_s11] sm:$0xff]  ;;  %v8522_v50 = vmov 35   ;;  %v541_v53 = vld [vmem:[%s5628_s11 + $0x8] sm:$0xf] }
  0x21   : > { %5134 = vset.pattern.permute.xlu1 %v8558_v14  ;;  %769 = vperm.xlu0 %5133, %v5505_v0   ;;  %v551_v51 = vrot.slane %v5635_v49, %v5517_v6  ;;  %v559_v54 = vrot.slane %v541_v53, %v5517_v6  ;;  %v5646_v55 = vsub.s32 5, %v5511_v4  ;;  %v603_v58 = vrot.slane %v5635_v49, %v5520_v7  ;;  %s8571_s27 = smov 112   ;;  %v369_v17 = vld [vmem:[%s5628_s11 + $0x8] sm:$0xf] }
  0x22   : > { %v555_v52 = vrot.slane %v5635_v49, %v5632_v48  ;;  %v611_v63 = vrot.slane %v541_v53, %v5520_v7  ;;  %v5658_v3 = vsub.s32 2, %v5511_v4  ;;  %vm762_vm0 = vcmask 924672  }
  0x23   : > { %v566_v56 = vrot.slane %v551_v51, %v5517_v6  ;;  %v574_v59 = vrot.slane %v559_v54, %v5517_v6  ;;  %v607_v60 = vrot.slane %v5635_v49, %v5646_v55  ;;  %v618_v5 = vrot.slane %v603_v58, %v5520_v7 }
  0x24   : > { %823 = vperm.xlu1 %5134, %v5505_v0   ;;  %v570_v57 = vrot.slane %v555_v52, %v5517_v6  ;;  %v626_v51 = vrot.slane %v611_v63, %v5520_v7  ;;  %v662_v63 = vrot.slane %v541_v53, %v5658_v3  ;;  %vm587_vm1 = vcmask 1039360  }
  0x25   : > { %5136 = vset.pattern.permute.xlu0 %v8547_v16  ;;  %vm1346_vm2 = vcmask 7168   ;;  %vm1564_vm3 = vcmask 121856   ;;  %vm1989_vm4 = vcmask 138240   ;;  %vm383_vm5 = vcmask 908288  }
  0x26   : > { %925 = vperm.xlu0 %5136, %v5505_v0   ;;  %vm813_vm6 = vcmask 1031168   ;;  %vm1030_vm7 = vcmask 916480   ;;  %vm1397_vm8 = vcmask 900096   ;;  %vm1615_vm9 = vcmask 785408  }
  0x27   : > { %vm1824_vm10 = vcmask 777216   ;;  %vm2040_vm11 = vcmask 769024  }
  0x28   : > { %5135 = vset.pattern.permute.xlu1 %v8548_v19 }
  0x29   : > { %874 = vperm.xlu1 %5135, %v5505_v0  }
  0x2a   : > { %5138 = vset.pattern.permute.xlu0 %v8543_v21 }
  0x2b   : > { %1040 = vperm.xlu0 %5138, %v5505_v0  }
  0x2d   : > { %977 = vrot.lane.b32.xlu1 %v5557_v20, %s5323_s12 }
  0x2e   : > { %5137 = vset.pattern.permute.xlu1 %v8544_v22 }
  0x2f   : > { %5141 = vset.pattern.permute.xlu0 %v8551_v23 }
  0x30   : > { %1193 = vperm.xlu0 %5141, %v5505_v0  }
  0x31   : > { %986 = vperm.xlu1 %5137, %v5505_v0  }
  0x34   : > { %5144 = vset.pattern.permute.xlu0 %v8546_v24 }
  0x35   : > { %5139 = vset.pattern.permute.xlu1 %v8553_v25  ;;  %1305 = vperm.xlu0 %5144, %v5505_v0  }
  0x36   : > { %1091 = vperm.xlu1 %5139, %v5505_v0  }
  0x39   : > { %5146 = vset.pattern.permute.xlu0 %v8533_v26 }
  0x3a   : > { %5140 = vset.pattern.permute.xlu1 %v8542_v27  ;;  %1407 = vperm.xlu0 %5146, %v5505_v0  }
  0x3b   : > { %1142 = vperm.xlu1 %5140, %v5505_v0  }
  0x3e   : > { %1561 = vrot.lane.b32.xlu0 %v5557_v20, %s5330_s18 }
  0x3f   : > { %5142 = vset.pattern.permute.xlu1 %v8537_v28  ;;  %5150 = vset.pattern.permute.xlu0 %v8529_v29 }
  0x40   : > { %1231 = vperm.xlu1 %5142, %v5505_v0  }
  0x42   : > { %1625 = vperm.xlu0 %5150, %v5505_v0  }
  0x44   : > { %5143 = vset.pattern.permute.xlu1 %v8536_v30 }
  0x45   : > { %1268 = vperm.xlu1 %5143, %v5505_v0  }
  0x46   : > { %5153 = vset.pattern.permute.xlu0 %v8526_v31 }
  0x47   : > { %1780 = vperm.xlu0 %5153, %v5505_v0  }
  0x49   : > { %1343 = vrot.lane.b32.xlu1 %v5534_v12, %s5335_s20 }
  0x4a   : > { %5145 = vset.pattern.permute.xlu1 %v8535_v32 }
  0x4b   : > { %5155 = vset.pattern.permute.xlu0 %v8524_v33 }
  0x4c   : > { %1885 = vperm.xlu0 %5155, %v5505_v0  }
  0x4d   : > { %1353 = vperm.xlu1 %5145, %v5505_v0  }
  0x50   : > { %5158 = vset.pattern.permute.xlu0 %v8523_v34 }
  0x51   : > { %5147 = vset.pattern.permute.xlu1 %v8532_v35  ;;  %1936 = vperm.xlu0 %5158, %v5505_v0  }
  0x52   : > { %1458 = vperm.xlu1 %5147, %v5505_v0  }
  0x55   : > { %5160 = vset.pattern.permute.xlu0 %v8521_v36 }
  0x56   : > { %5148 = vset.pattern.permute.xlu1 %v8531_v37  ;;  %1996 = vperm.xlu0 %5160, %v5505_v0  }
  0x57   : > { %1509 = vperm.xlu1 %5148, %v5505_v0  }
  0x5a   : > { %5163 = vset.pattern.permute.xlu0 %v8534_v38 }
  0x5b   : > { %5149 = vset.pattern.permute.xlu1 %v8530_v39  ;;  %2101 = vperm.xlu0 %5163, %v5505_v0  }
  0x5c   : > { %1571 = vperm.xlu1 %5149, %v5505_v0  }
  0x5f   : > { %5168 = vset.pattern.permute.xlu0 %v5313_v1 }
  0x60   : > { %5151 = vset.pattern.permute.xlu1 %v8528_v40 }
  0x61   : > { %1676 = vperm.xlu1 %5151, %v5505_v0  }
  0x65   : > { %5152 = vset.pattern.permute.xlu1 %v8527_v41 }
  0x66   : > { %1727 = vperm.xlu1 %5152, %v5505_v0  }
  0x6a   : > { %5154 = vset.pattern.permute.xlu1 %v8525_v42 }
  0x6b   : > { %1834 = vperm.xlu1 %5154, %v5505_v0  }
  0x6f   : > { %380 = vrot.lane.b32.xlu1 %v5557_v20, %s5347_s21  ;;  %v622_v20 = vrot.slane %v607_v60, %v5520_v7 }
  0x70   : > { %5156 = vset.pattern.permute.xlu1 %v8540_v43 }
  0x73   : > { %391 = vperm.xlu1 %5156, %v5505_v0  }
  0x77   : > { %5157 = vset.pattern.permute.xlu1 %v8552_v44 }
  0x78   : > { %430 = vperm.xlu1 %5157, %v5505_v0  }
  0x7c   : > { %1986 = vrot.lane.b32.xlu1 %v5534_v12, %s5350_s25  ;;  %v5662_v12 = vsub.s32 6, %v5511_v4 }
  0x7d   : > { %5159 = vset.pattern.permute.xlu1 %v8539_v45 }
  0x7e   : > { %v658_v58 = vrot.slane %v5635_v49, %v5662_v12 }
  0x80   : > { %467 = vperm.xlu1 %5159, %v5505_v0   ;;  %v673_v36 = vrot.slane %v658_v58, %v5658_v3 }
  0x84   : > { %5161 = vset.pattern.permute.xlu1 %v8538_v46 }
  0x85   : > { %504 = vperm.xlu1 %5161, %v5505_v0  }
  0x89   : > { %5162 = vset.pattern.permute.xlu1 %v8520_v47  ;;  %v5673_v47 = vsub.s32 3, %v5511_v4 }
  0x8a   : > { %2050 = vperm.xlu1 %5162, %v5505_v0  }
  0x8e   : > { %5164 = vset.pattern.permute.xlu1 %v8522_v50  ;;  %v705_v50 = vrot.slane %v5635_v49, %v5673_v47 }
  0x8f   : > { %2152 = vperm.xlu1 %5164, %v5505_v0  }
  0x90   : > { %v720_v34 = vrot.slane %v705_v50, %v5673_v47 }
  0x93   : > { %5165 = vset.pattern.permute.xlu1 %v8540_v43 }
  0x96   : > { %v649_v61 = vpop.permute.xlu1 %648  ;;  %v544_v62 = vpop.permute.xlu0 %543 }
  0x97   : > { %v575_v0 = vmul.f32 %v566_v56, %v544_v62  ;;  %v576_v1 = vmul.f32 %v570_v57, %v544_v62  ;;  %v577_v15 = vmul.f32 %v574_v59, %v544_v62  ;;  %v654_v56 = vrot.slane %v5635_v49, %v5658_v3 }
  0x98   : > { %v679_v58 = vmul.f32 %v673_v36, %v649_v61 }
  0x99   : > { %581 = vrot.lane.b32.xlu1 %v575_v0, %s5323_s12  ;;  %583 = vrot.lane.b32.xlu0 %v576_v1, %s5323_s12  ;;  %v669_v62 = vrot.slane %v654_v56, %v5658_v3  ;;  %v5680_v1 = vsub.s32 7, %v5511_v4  ;;  %v677_v56 = vrot.slane %v662_v63, %v5658_v3 }
  0x9b   : > { %v700_v52 = vpop.permute.xlu1 %699  ;;  %v598_v54 = vpop.permute.xlu0 %597  ;;  %v709_v4 = vrot.slane %v5635_v49, %v5680_v1 }
  0x9c   : > { %v627_v57 = vmul.f32 %v618_v5, %v598_v54  ;;  %v628_v0 = vmul.f32 %v622_v20, %v598_v54  ;;  %v629_v59 = vmul.f32 %v626_v51, %v598_v54  ;;  %v678_v54 = vmul.f32 %v669_v62, %v649_v61 }
  0x9d   : > { %585 = vrot.lane.b32.xlu1 %v577_v15, %s5323_s12 }
  0x9e   : > { %633 = vrot.lane.b32.xlu0 %v627_v57, %s5323_s12 }
  0x9f   : > { %v760_v60 = vpop.permute.xlu1 %759 }
  0xa0   : > { %v761_v5 = vrot.slane %v760_v60, 4 }
  0xa1   : > { %635 = vrot.lane.b32.xlu1 %v628_v0, %s5323_s12  ;;  %v713_v0 = vrot.slane %v541_v53, %v5673_v47 }
  0xa2   : > { %v763_v15 = vsel %vm762_vm0, %v761_v5, %v760_v60  ;;  %637 = vrot.lane.b32.xlu0 %v629_v59, %s5323_s12  ;;  %v5688_v20 = vmul.f32 %v761_v5, %v541_v53  ;;  %v680_v59 = vmul.f32 %v677_v56, %v649_v61  ;;  %v724_v60 = vrot.slane %v709_v4, %v5673_v47 }
  0xa3   : > { %v824_v51 = vpop.permute.xlu1 %823  ;;  %v5694_v57 = vmul.f32 %v763_v15, %v5635_v49  ;;  %v729_v5 = vmul.f32 %v720_v34, %v700_v52  ;;  %v728_v15 = vrot.slane %v713_v0, %v5673_v47 }
  0xa4   : > { %v785_v62 = vrot.slane %v5688_v20, %v5517_v6  ;;  %v730_v50 = vmul.f32 %v724_v60, %v700_v52 }
  0xa5   : > { %684 = vrot.lane.b32.xlu1 %v678_v54, %s5323_s12  ;;  %v781_v36 = vrot.slane %v5694_v57, %v5632_v48  ;;  %v777_v61 = vrot.slane %v5694_v57, %v5517_v6  ;;  %v731_v56 = vmul.f32 %v728_v15, %v700_v52  ;;  %v829_v34 = vrot.slane %v5694_v57, %v5520_v7 }
  0xa6   : > { %686 = vrot.lane.b32.xlu0 %v679_v58, %s5323_s12  ;;  %v800_v53 = vrot.slane %v785_v62, %v5517_v6  ;;  %v770_v58 = vpop.permute.xlu0 %769  ;;  %v833_v60 = vrot.slane %v5694_v57, %v5646_v55  ;;  %v837_v15 = vrot.slane %v5688_v20, %v5520_v7 }
  0xa7   : > { %v796_v4 = vrot.slane %v781_v36, %v5517_v6  ;;  %v844_v52 = vrot.slane %v829_v34, %v5520_v7  ;;  %v884_v34 = vrot.slane %v5694_v57, %v5662_v12 }
  0xa8   : > { %v875_v63 = vpop.permute.xlu1 %874  ;;  %v803_v0 = vmul.f32 %v800_v53, %v770_v58  ;;  %v880_v53 = vrot.slane %v5694_v57, %v5658_v3 }
  0xa9   : > { %688 = vrot.lane.b32.xlu1 %v680_v59, %s5323_s12  ;;  %v792_v59 = vrot.slane %v777_v61, %v5517_v6 }
  0xaa   : > { %735 = vrot.lane.b32.xlu0 %v729_v5, %s5323_s12  ;;  %v802_v5 = vmul.f32 %v796_v4, %v770_v58  ;;  %v852_v4 = vrot.slane %v837_v15, %v5520_v7  ;;  %v931_v15 = vrot.slane %v5694_v57, %v5673_v47  ;;  %v926_v42 = vpop.permute.xlu0 %925 }
  0xab   : > { %v801_v36 = vmul.f32 %v792_v59, %v770_v58  ;;  %v888_v59 = vrot.slane %v5688_v20, %v5658_v3 }
  0xac   : > { %v978_v54 = vpop.permute.xlu1 %977 }
  0xad   : > { %737 = vrot.lane.b32.xlu1 %v730_v50, %s5323_s12  ;;  %v848_v50 = vrot.slane %v833_v60, %v5520_v7  ;;  %v979_v61 = vrot.slane %v978_v54, 4 }
  0xae   : > { %739 = vrot.lane.b32.xlu0 %v731_v56, %s5323_s12  ;;  %v853_v56 = vmul.f32 %v844_v52, %v824_v51  ;;  %v899_v52 = vrot.slane %v884_v34, %v5658_v3  ;;  %v946_v34 = vrot.slane %v931_v15, %v5673_v47 }
  0xaf   : > { %v854_v58 = vmul.f32 %v848_v50, %v824_v51  ;;  %v980_v60 = vsel %vm587_vm1, %v979_v61, %v978_v54  ;;  %v976_v54 = vld [vmem:[%s5628_s11 + $0x8] sm:$0xf] }
  0xb0   : > { %v5719_v62 = vpop.permute.xlu1 %986  ;;  %v5748_v50 = vmul.f32 %v980_v60, %v5635_v49  ;;  %v5759_v60 = vmul.f32 %v979_v61, %v976_v54 }
  0xb1   : > { %811 = vrot.lane.b32.xlu1 %v803_v0, %s5355_s26  ;;  %v895_v0 = vrot.slane %v880_v53, %v5658_v3 }
  0xb2   : > { %809 = vrot.lane.b32.xlu0 %v802_v5, %s5355_s26  ;;  %v855_v5 = vmul.f32 %v852_v4, %v824_v51  ;;  %v935_v51 = vrot.slane %v5694_v57, %v5680_v1  ;;  %v905_v4 = vmul.f32 %v899_v52, %v875_v63  ;;  %v994_v57 = vrot.slane %v5748_v50, %v5517_v6 }
  0xb3   : > { %v904_v53 = vmul.f32 %v895_v0, %v875_v63  ;;  %v955_v52 = vmul.f32 %v946_v34, %v926_v42 }
  0xb5   : > { %v5732_v33 = vpop.permute.xlu1 %1091  ;;  %807 = vrot.lane.b32.xlu1 %v801_v36, %s5355_s26 }
  0xb6   : > { %859 = vrot.lane.b32.xlu0 %v853_v56, %s5355_s26  ;;  %v903_v56 = vrot.slane %v888_v59, %v5658_v3 }
  0xb8   : > { %v906_v59 = vmul.f32 %v903_v56, %v875_v63  ;;  %v1002_v63 = vrot.slane %v5759_v60, %v5517_v6 }
  0xb9   : > { %861 = vrot.lane.b32.xlu1 %v854_v58, %s5355_s26  ;;  %v939_v58 = vrot.slane %v5688_v20, %v5673_v47  ;;  %v998_v20 = vrot.slane %v5748_v50, %v5632_v48 }
  0xba   : > { %v5744_v36 = vpop.permute.xlu1 %1142  ;;  %863 = vrot.lane.b32.xlu0 %v855_v5, %s5355_s26  ;;  %v950_v5 = vrot.slane %v935_v51, %v5673_v47 }
  0xbb   : > { %v954_v15 = vrot.slane %v939_v58, %v5673_v47  ;;  %v1013_v54 = vrot.slane %v998_v20, %v5517_v6  ;;  %v1017_v58 = vrot.slane %v1002_v63, %v5517_v6 }
  0xbc   : > { %v956_v61 = vmul.f32 %v950_v5, %v926_v42 }
  0xbd   : > { %910 = vrot.lane.b32.xlu1 %v904_v53, %s5355_s26  ;;  %v1009_v53 = vrot.slane %v994_v57, %v5517_v6  ;;  %v957_v51 = vmul.f32 %v954_v15, %v926_v42  ;;  %v1019_v42 = vmul.f32 %v1013_v54, %v5719_v62  ;;  %v1041_v15 = vpop.permute.xlu0 %1040  ;;  %v1020_v20 = vmul.f32 %v1017_v58, %v5719_v62 }
  0xbe   : > { %912 = vrot.lane.b32.xlu0 %v905_v4, %s5355_s26  ;;  %v1046_v4 = vrot.slane %v5748_v50, %v5520_v7  ;;  %v1105_v58 = vrot.slane %v5759_v60, %v5658_v3 }
  0xbf   : > { %v5761_v0 = vpop.permute.xlu1 %1231  ;;  %v1018_v34 = vmul.f32 %v1009_v53, %v5719_v62  ;;  %v1097_v53 = vrot.slane %v5748_v50, %v5658_v3 }
  0xc0   : > { %v1061_v57 = vrot.slane %v1046_v4, %v5520_v7  ;;  %v1101_v4 = vrot.slane %v5748_v50, %v5662_v12 }
  0xc1   : > { %914 = vrot.lane.b32.xlu1 %v906_v59, %s5355_s26  ;;  %v1050_v59 = vrot.slane %v5748_v50, %v5646_v55  ;;  %v1112_v62 = vrot.slane %v1097_v53, %v5658_v3  ;;  %v5817_v53 = vld [vmem:[%s5628_s11 + $0x4] sm:$0xff] }
  0xc2   : > { %961 = vrot.lane.b32.xlu0 %v955_v52, %s5355_s26  ;;  %v1054_v52 = vrot.slane %v5759_v60, %v5520_v7 }
  0xc4   : > { %v5774_v56 = vpop.permute.xlu1 %1268  ;;  %v1069_v54 = vrot.slane %v1054_v52, %v5520_v7  ;;  %v1148_v52 = vrot.slane %v5748_v50, %v5673_v47 }
  0xc5   : > { %963 = vrot.lane.b32.xlu1 %v956_v61, %s5355_s26  ;;  %v1065_v61 = vrot.slane %v1050_v59, %v5520_v7 }
  0xc6   : > { %965 = vrot.lane.b32.xlu0 %v957_v51, %s5355_s26  ;;  %v1070_v51 = vmul.f32 %v1061_v57, %v1041_v15  ;;  %v1072_v59 = vmul.f32 %v1069_v54, %v1041_v15  ;;  %v1200_v54 = vrot.slane %v5817_v53, %v5517_v6 }
  0xc8   : > { %v5785_v5 = vpop.permute.xlu1 %1343 }
  0xc9   : > { %1024 = vrot.lane.b32.xlu1 %v1018_v34, %s8571_s27  ;;  %v1071_v34 = vmul.f32 %v1065_v61, %v1041_v15  ;;  %v1120_v61 = vrot.slane %v1105_v58, %v5658_v3  ;;  %v1194_v15 = vpop.permute.xlu0 %1193  ;;  %v1156_v58 = vrot.slane %v5759_v60, %v5673_v47  ;;  %v1237_v60 = vrot.slane %v5817_v53, %v5520_v7 }
  0xca   : > { %1026 = vrot.lane.b32.xlu0 %v1019_v42, %s8571_s27  ;;  %v1116_v42 = vrot.slane %v1101_v4, %v5658_v3  ;;  %v1152_v4 = vrot.slane %v5748_v50, %v5680_v1 }
  0xcc   : > { %v5797_v63 = vpop.permute.xlu1 %1353  ;;  %v1167_v50 = vrot.slane %v1152_v4, %v5673_v47  ;;  %v1345_v4 = vrot.slane %v5785_v5, 4 }
  0xcd   : > { %1028 = vrot.lane.b32.xlu1 %v1020_v20, %s8571_s27  ;;  %v1121_v20 = vmul.f32 %v1112_v62, %v5732_v33  ;;  %v1163_v62 = vrot.slane %v1148_v52, %v5673_v47  ;;  %v1171_v52 = vrot.slane %v1156_v58, %v5673_v47  ;;  %v5859_v58 = vrot.slane %v1237_v60, %v5520_v7 }
  0xce   : > { %1076 = vrot.lane.b32.xlu0 %v1070_v51, %s8571_s27  ;;  %v1122_v51 = vmul.f32 %v1116_v42, %v5732_v33  ;;  %v1123_v42 = vmul.f32 %v1120_v61, %v5732_v33  ;;  %v1306_v33 = vpop.permute.xlu0 %1305 }
  0xcf   : > { %v1172_v31 = vmul.f32 %v1163_v62, %v5744_v36  ;;  %8736 = vst [vmem:[#allocation12_spill] sm:$0xff] %v5859_v58  ;;  %v1252_v60 = vmul.f32 %v5859_v58, %v5761_v0 }
  0xd1   : > { %v5808_v57 = vpop.permute.xlu1 %1458  ;;  %1078 = vrot.lane.b32.xlu1 %v1071_v34, %s8571_s27  ;;  %v1204_v34 = vrot.slane %v5817_v53, %v5632_v48 }
  0xd2   : > { %1080 = vrot.lane.b32.xlu0 %v1072_v59, %s8571_s27 }
  0xd3   : > { %v5841_v41 = vrot.slane %v1204_v34, %v5517_v6  ;;  %v1174_v34 = vmul.f32 %v1171_v52, %v5744_v36  ;;  %v1347_v52 = vsel %vm1346_vm2, %v1345_v4, %v5785_v5  ;;  %v1311_v5 = vrot.slane %v5817_v53, %v5673_v47 }
  0xd5   : > { %1127 = vrot.lane.b32.xlu1 %v1121_v20, %s8571_s27  ;;  %v5836_v20 = vrot.slane %v1200_v54, %v5517_v6  ;;  %8735 = vst [vmem:[#allocation11_spill] sm:$0xff] %v5841_v41  ;;  %v1241_v54 = vrot.slane %v5817_v53, %v5646_v55 }
  0xd6   : > { %v5827_v59 = vpop.permute.xlu1 %1509  ;;  %1129 = vrot.lane.b32.xlu0 %v1122_v51, %s8571_s27  ;;  %v1173_v51 = vmul.f32 %v1167_v50, %v5744_v36  ;;  %v1278_v36 = vrot.slane %v5817_v53, %v5662_v12 }
  0xd7   : > { %8734 = vst [vmem:[#allocation10_spill] sm:$0xff] %v5836_v20  ;;  %v1215_v62 = vmul.f32 %v5836_v20, %v1194_v15  ;;  %v5864_v50 = vrot.slane %v1241_v54, %v5520_v7 }
  0xd8   : > { %v5889_v29 = vrot.slane %v1278_v36, %v5658_v3 }
  0xd9   : > { %1131 = vrot.lane.b32.xlu1 %v1123_v42, %s8571_s27  ;;  %v1274_v42 = vrot.slane %v5817_v53, %v5658_v3  ;;  %8737 = vst [vmem:[#allocation13_spill] sm:$0xff] %v5864_v50  ;;  %v1253_v40 = vmul.f32 %v5864_v50, %v5761_v0  ;;  %v5903_v0 = vrot.slane %v1311_v5, %v5673_v47 }
  0xda   : > { %1178 = vrot.lane.b32.xlu0 %v1172_v31, %s8571_s27  ;;  %v1216_v31 = vmul.f32 %v5841_v41, %v1194_v15  ;;  %v5872_v15 = vpop.permute.xlu0 %1407  ;;  %8739 = vst [vmem:[#allocation15_spill] sm:$0xff] %v5889_v29  ;;  %v1290_v35 = vmul.f32 %v5889_v29, %v5774_v56 }
  0xdb   : > { %v5847_v61 = vpop.permute.xlu1 %1571  ;;  %v5879_v54 = vrot.slane %v1274_v42, %v5658_v3  ;;  %8740 = vst [vmem:[#allocation16_spill] sm:$0xff] %v5903_v0  ;;  %v1326_v5 = vmul.f32 %v5903_v0, %v1306_v33 }
  0xdd   : > { %1180 = vrot.lane.b32.xlu1 %v1173_v51, %s8571_s27  ;;  %8738 = vst [vmem:[#allocation14_spill] sm:$0xff] %v5879_v54  ;;  %v1289_v42 = vmul.f32 %v5879_v54, %v5774_v56 }
  0xde   : > { %1182 = vrot.lane.b32.xlu0 %v1174_v34, %s8571_s27  ;;  %v5882_v34 = vmul.f32 %v1347_v52, %v5817_v53  ;;  %v5907_v37 = vpop.permute.xlu0 %1561  ;;  %s8847_s27 = smov 110  }
  0xe0   : > { %v5870_v51 = vpop.permute.xlu1 %1676  ;;  %v1361_v36 = vrot.slane %v5882_v34, %v5517_v6  ;;  %v1464_v46 = vrot.slane %v5882_v34, %v5658_v3 }
  0xe1   : > { %1219 = vrot.lane.b32.xlu1 %v1215_v62, %s5347_s21  ;;  %v1342_v62 = vld [vmem:[%s5628_s11 + $0xc] sm:$0xf] }
  0xe2   : > { %1221 = vrot.lane.b32.xlu0 %v1216_v31, %s5347_s21  ;;  %v1315_v31 = vrot.slane %v5817_v53, %v5680_v1  ;;  %v5900_v52 = vmul.f32 %v1345_v4, %v1342_v62  ;;  %v1376_v26 = vrot.slane %v1361_v36, %v5517_v6  ;;  %v5924_v56 = vpop.permute.xlu0 %1625  ;;  %v1417_v36 = vrot.slane %v5882_v34, %v5646_v55 }
  0xe4   : > { %v1369_v62 = vrot.slane %v5900_v52, %v5517_v6  ;;  %v1385_v30 = vmul.f32 %v1376_v26, %v5797_v63 }
  0xe5   : > { %v5894_v39 = vpop.permute.xlu1 %1727  ;;  %1256 = vrot.lane.b32.xlu1 %v1252_v60, %s5347_s21  ;;  %v5912_v60 = vrot.slane %v1315_v31, %v5673_v47 }
  0xe6   : > { %1258 = vrot.lane.b32.xlu0 %v1253_v40, %s5347_s21  ;;  %v1365_v40 = vrot.slane %v5882_v34, %v5632_v48  ;;  %v5938_v28 = vpop.permute.xlu0 %1780 }
  0xe7   : > { %8741 = vst [vmem:[#allocation17_spill] sm:$0xff] %v5912_v60  ;;  %v1327_v31 = vmul.f32 %v5912_v60, %v1306_v33 }
  0xe8   : > { %v1380_v38 = vrot.slane %v1365_v40, %v5517_v6 }
  0xe9   : > { %1293 = vrot.lane.b32.xlu1 %v1289_v42, %s5347_s21  ;;  %v1413_v42 = vrot.slane %v5882_v34, %v5520_v7 }
  0xea   : > { %v5917_v4 = vpop.permute.xlu1 %1834  ;;  %1295 = vrot.lane.b32.xlu0 %v1290_v35, %s5347_s21  ;;  %v1384_v35 = vrot.slane %v1369_v62, %v5517_v6  ;;  %v1386_v33 = vmul.f32 %v1380_v38, %v5797_v63  ;;  %v1432_v62 = vrot.slane %v1417_v36, %v5520_v7  ;;  %v1563_v38 = vrot.slane %v5907_v37, 4 }
  0xeb   : > { %v1428_v40 = vrot.slane %v1413_v42, %v5520_v7  ;;  %v1479_v36 = vrot.slane %v1464_v46, %v5658_v3 }
  0xec   : > { %v1387_v26 = vmul.f32 %v1384_v35, %v5797_v63  ;;  %v1438_v63 = vmul.f32 %v1432_v62, %v5872_v15  ;;  %v1472_v35 = vrot.slane %v5900_v52, %v5658_v3  ;;  %v1515_v62 = vrot.slane %v5882_v34, %v5673_v47 }
  0xed   : > { %1330 = vrot.lane.b32.xlu1 %v1326_v5, %s5347_s21  ;;  %v1421_v5 = vrot.slane %v5900_v52, %v5520_v7  ;;  %v1437_v42 = vmul.f32 %v1428_v40, %v5872_v15  ;;  %v1488_v46 = vmul.f32 %v1479_v36, %v5808_v57 }
  0xee   : > { %v5931_v32 = vpop.permute.xlu1 %380  ;;  %1332 = vrot.lane.b32.xlu0 %v1327_v31, %s5347_s21 }
  0xef   : > { %v1436_v45 = vrot.slane %v1421_v5, %v5520_v7  ;;  %v1565_v5 = vsel %vm1564_vm3, %v1563_v38, %v5907_v37 }
  0xf0   : > { %v5978_v27 = vmul.f32 %v1565_v5, %v5817_v53 }
  0xf1   : > { %1391 = vrot.lane.b32.xlu1 %v1385_v30, %s8549_s28  ;;  %v1468_v30 = vrot.slane %v5882_v34, %v5662_v12  ;;  %v1439_v43 = vmul.f32 %v1436_v45, %v5872_v15  ;;  %v1560_v45 = vld [vmem:[%s5628_s11 + $0xc] sm:$0xf] }
  0xf2   : > { %v5945_v31 = vpop.permute.xlu1 %391  ;;  %1393 = vrot.lane.b32.xlu0 %v1386_v33, %s8549_s28  ;;  %v5958_v33 = vpop.permute.xlu0 %1885  ;;  %v5994_v36 = vmul.f32 %v1563_v38, %v1560_v45  ;;  %v1579_v5 = vrot.slane %v5978_v27, %v5517_v6  ;;  %v1686_v24 = vrot.slane %v5978_v27, %v5662_v12 }
  0xf4   : > { %v1587_v38 = vrot.slane %v5994_v36, %v5517_v6 }
  0xf5   : > { %1395 = vrot.lane.b32.xlu1 %v1387_v26, %s8549_s28  ;;  %v1483_v26 = vrot.slane %v1468_v30, %v5658_v3  ;;  %v1530_v30 = vrot.slane %v1515_v62, %v5673_v47 }
  0xf6   : > { %1443 = vrot.lane.b32.xlu0 %v1437_v42, %s8549_s28  ;;  %v1487_v42 = vrot.slane %v1472_v35, %v5658_v3  ;;  %v5980_v21 = vpop.permute.xlu0 %1936 }
  0xf7   : > { %v5965_v40 = vpop.permute.xlu1 %430  ;;  %v1489_v15 = vmul.f32 %v1483_v26, %v5808_v57  ;;  %v1966_v9 = vmul.f32 %v5980_v21, %v5903_v0 }
  0xf8   : > { %v1490_v35 = vmul.f32 %v1487_v42, %v5808_v57  ;;  %v1594_v42 = vrot.slane %v1579_v5, %v5517_v6  ;;  %v1635_v5 = vrot.slane %v5978_v27, %v5646_v55 }
  0xf9   : > { %1445 = vrot.lane.b32.xlu1 %v1438_v63, %s8549_s28  ;;  %v1523_v63 = vrot.slane %v5900_v52, %v5673_v47 }
  0xfa   : > { %1447 = vrot.lane.b32.xlu0 %v1439_v43, %s8549_s28  ;;  %v1519_v43 = vrot.slane %v5882_v34, %v5680_v1  ;;  %v1539_v34 = vmul.f32 %v1530_v30, %v5827_v59  ;;  %v6004_v62 = vpop.permute.xlu0 %1996 }
  0xfb   : > { %v5982_v37 = vpop.permute.xlu1 %1986  ;;  %v1538_v57 = vrot.slane %v1523_v63, %v5673_v47  ;;  %v1602_v63 = vrot.slane %v1587_v38, %v5517_v6  ;;  %v1682_v38 = vrot.slane %v5978_v27, %v5658_v3 }
  0xfd   : > { %1494 = vrot.lane.b32.xlu1 %v1488_v46, %s8549_s28  ;;  %v1583_v46 = vrot.slane %v5978_v27, %v5632_v48  ;;  %v1541_v30 = vmul.f32 %v1538_v57, %v5827_v59  ;;  %v1639_v57 = vrot.slane %v5994_v36, %v5520_v7 }
  0xfe   : > { %1496 = vrot.lane.b32.xlu0 %v1489_v15, %s8549_s28  ;;  %v1534_v15 = vrot.slane %v1519_v43, %v5673_v47 }
  0xff   : > { %v5998_v26 = vpop.permute.xlu1 %467  ;;  %v1598_v43 = vrot.slane %v1583_v46, %v5517_v6 }
 0x100   : > { %v1540_v52 = vmul.f32 %v1534_v15, %v5827_v59  ;;  %v6025_v15 = vpop.permute.xlu0 %2101 }
 0x101   : > { %1498 = vrot.lane.b32.xlu1 %v1490_v35, %s8549_s28  ;;  %v1631_v35 = vrot.slane %v5978_v27, %v5520_v7  ;;  %v1604_v59 = vmul.f32 %v1598_v43, %v5847_v61 }
 0x102   : > { %1545 = vrot.lane.b32.xlu0 %v1539_v34, %s8549_s28  ;;  %v1603_v34 = vmul.f32 %v1594_v42, %v5847_v61  ;;  %v1650_v42 = vrot.slane %v1635_v5, %v5520_v7 }
 0x103   : > { %v1646_v46 = vrot.slane %v1631_v35, %v5520_v7  ;;  %v1654_v35 = vrot.slane %v1639_v57, %v5520_v7  ;;  %v1701_v57 = vrot.slane %v1686_v24, %v5658_v3 }
 0x104   : > { %v6013_v45 = vpop.permute.xlu1 %504  ;;  %v1656_v5 = vmul.f32 %v1650_v42, %v5924_v56  ;;  %v1737_v42 = vrot.slane %v5978_v27, %v5680_v1 }
 0x105   : > { %1547 = vrot.lane.b32.xlu1 %v1540_v52, %s8549_s28  ;;  %v1605_v52 = vmul.f32 %v1602_v63, %v5847_v61  ;;  %v1655_v43 = vmul.f32 %v1646_v46, %v5924_v56  ;;  %v1690_v61 = vrot.slane %v5994_v36, %v5658_v3  ;;  %v1697_v63 = vrot.slane %v1682_v38, %v5658_v3 }
 0x106   : > { %1549 = vrot.lane.b32.xlu0 %v1541_v30, %s8549_s28  ;;  %v1657_v46 = vmul.f32 %v1654_v35, %v5924_v56  ;;  %v1707_v24 = vmul.f32 %v1701_v57, %v5870_v51  ;;  %s8569_s28 = smov 95  }
 0x107   : > { %v1706_v38 = vmul.f32 %v1697_v63, %v5870_v51  ;;  %v1752_v63 = vrot.slane %v1737_v42, %v5673_v47 }
 0x109   : > { %v6031_v22 = vpop.permute.xlu1 %2050  ;;  %1609 = vrot.lane.b32.xlu1 %v1603_v34, %s8562_s30 }
 0x10a   : > { %1611 = vrot.lane.b32.xlu0 %v1604_v59, %s8562_s30 }
 0x10b   : > { %v6039_v30 = vpop.permute.xlu0 %583 }
 0x10d   : > { %1613 = vrot.lane.b32.xlu1 %v1605_v52, %s8562_s30  ;;  %v1733_v52 = vrot.slane %v5978_v27, %v5673_v47 }
 0x10e   : > { %v6046_v34 = vpop.permute.xlu1 %2152  ;;  %1661 = vrot.lane.b32.xlu0 %v1655_v43, %s8562_s30  ;;  %v1705_v43 = vrot.slane %v1690_v61, %v5658_v3 }
 0x10f   : > { %v1748_v35 = vrot.slane %v1733_v52, %v5673_v47  ;;  %v1778_v52 = vld [vmem:[%s5628_s11 + $0xc] sm:$0xf]  ;;  %s5398_s11 = smov [#allocation3]  }
 0x110   : > { %v6053_v59 = vpop.permute.xlu0 %633  ;;  %v1708_v61 = vmul.f32 %v1705_v43, %v5870_v51 }
 0x111   : > { %1663 = vrot.lane.b32.xlu1 %v1656_v5, %s8562_s30  ;;  %v1741_v5 = vrot.slane %v5994_v36, %v5673_v47  ;;  %v1757_v19 = vmul.f32 %v1748_v35, %v5894_v39 }
 0x112   : > { %v6060_v16 = vpop.permute.xlu1 %581  ;;  %1665 = vrot.lane.b32.xlu0 %v1657_v46, %s8562_s30 }
 0x113   : > { %v1756_v57 = vrot.slane %v1741_v5, %v5673_v47  ;;  %v1812_v5 = vmul.f32 %v5938_v28, %v5836_v20  ;;  %v382_v20 = vrot.slane %v5931_v32, 4 }
 0x114   : > { %v6067_v56 = vpop.permute.xlu0 %637 }
 0x115   : > { %1712 = vrot.lane.b32.xlu1 %v1706_v38, %s8562_s30  ;;  %v1758_v38 = vmul.f32 %v1752_v63, %v5894_v39  ;;  %v1759_v43 = vmul.f32 %v1756_v57, %v5894_v39  ;;  %v388_v10 = vmul.f32 %v382_v20, %v369_v17 }
 0x116   : > { %v6074_v46 = vpop.permute.xlu1 %585  ;;  %1714 = vrot.lane.b32.xlu0 %v1707_v24, %s8562_s30  ;;  %v1796_v24 = vrot.slane %v1778_v52, %v5517_v6 }
 0x118   : > { %v6079_v27 = vpop.permute.xlu0 %686  ;;  %v1811_v35 = vrot.slane %v1796_v24, %v5517_v6  ;;  %v1864_v24 = vmul.f32 %v5917_v4, %v5859_v58 }
 0x119   : > { %1716 = vrot.lane.b32.xlu1 %v1708_v61, %s8562_s30  ;;  %v1813_v61 = vmul.f32 %v5938_v28, %v5841_v41 }
 0x11a   : > { %v6085_v36 = vpop.permute.xlu1 %635  ;;  %1763 = vrot.lane.b32.xlu0 %v1757_v19, %s8562_s30  ;;  %v1848_v19 = vrot.slane %v1778_v52, %v5520_v7  ;;  %v1814_v57 = vmul.f32 %v1811_v35, %v5938_v28  ;;  %v1899_v28 = vrot.slane %v1778_v52, %v5658_v3 }
 0x11c   : > { %v6090_v51 = vpop.permute.xlu0 %735 }
 0x11d   : > { %1765 = vrot.lane.b32.xlu1 %v1758_v38, %s8562_s30  ;;  %v1863_v38 = vrot.slane %v1848_v19, %v5520_v7 }
 0x11e   : > { %v6094_v42 = vpop.permute.xlu1 %684  ;;  %1767 = vrot.lane.b32.xlu0 %v1759_v43, %s8562_s30  ;;  %v1988_v43 = vrot.slane %v5982_v37, 4  ;;  %s5360_s30 = smov 94  }
 0x11f   : > { %v1866_v35 = vmul.f32 %v1863_v38, %v5917_v4 }
 0x120   : > { %v6103_v63 = vpop.permute.xlu0 %739  ;;  %v1990_v19 = vsel %vm1989_vm4, %v1988_v43, %v5982_v37  ;;  %v1950_v37 = vrot.slane %v1778_v52, %v5673_v47 }
 0x121   : > { %1818 = vrot.lane.b32.xlu1 %v1812_v5, %s8569_s28  ;;  %v1865_v5 = vmul.f32 %v5917_v4, %v5864_v50  ;;  %v6136_v8 = vmul.f32 %v1990_v19, %v5817_v53  ;;  %v1916_v4 = vmul.f32 %v5958_v33, %v5889_v29 }
 0x122   : > { %v6106_v39 = vpop.permute.xlu1 %688  ;;  %1820 = vrot.lane.b32.xlu0 %v1813_v61, %s8569_s28  ;;  %v1965_v19 = vrot.slane %v1950_v37, %v5673_v47 }
 0x123   : > { %v2004_v53 = vrot.slane %v6136_v8, %v5517_v6  ;;  %v2008_v2 = vrot.slane %v6136_v8, %v5632_v48 }
 0x124   : > { %v6114_v23 = vpop.permute.xlu0 %809 }
 0x125   : > { %1822 = vrot.lane.b32.xlu1 %v1814_v57, %s8569_s28  ;;  %v1914_v57 = vrot.slane %v1899_v28, %v5658_v3  ;;  %v2023_v37 = vrot.slane %v2008_v2, %v5517_v6  ;;  %v2060_v2 = vrot.slane %v6136_v8, %v5646_v55 }
 0x126   : > { %v6117_v44 = vpop.permute.xlu1 %737  ;;  %1870 = vrot.lane.b32.xlu0 %v1864_v24, %s8569_s28  ;;  %v1915_v24 = vmul.f32 %v5958_v33, %v5879_v54 }
 0x127   : > { %v1917_v28 = vmul.f32 %v1914_v57, %v5958_v33  ;;  %v1967_v33 = vmul.f32 %v5980_v21, %v5912_v60  ;;  %v1968_v57 = vmul.f32 %v1965_v19, %v5980_v21  ;;  %v2075_v54 = vrot.slane %v2060_v2, %v5520_v7 }
 0x128   : > { %v6126_v61 = vpop.permute.xlu0 %859 }
 0x129   : > { %1872 = vrot.lane.b32.xlu1 %v1865_v5, %s8569_s28 }
 0x12a   : > { %v6129_v25 = vpop.permute.xlu1 %811  ;;  %1874 = vrot.lane.b32.xlu0 %v1866_v35, %s8569_s28  ;;  %v6148_v35 = vmul.f32 %v1988_v43, %v1778_v52  ;;  %v2019_v43 = vrot.slane %v2004_v53, %v5517_v6  ;;  %v2029_v53 = vmul.f32 %v2023_v37, %v6004_v62  ;;  %v2111_v37 = vrot.slane %v6136_v8, %v5662_v12 }
 0x12c   : > { %v6141_v38 = vpop.permute.xlu0 %863  ;;  %v2012_v52 = vrot.slane %v6148_v35, %v5517_v6  ;;  %v2028_v60 = vmul.f32 %v2019_v43, %v6004_v62  ;;  %v2064_v19 = vrot.slane %v6148_v35, %v5520_v7  ;;  %v2107_v43 = vrot.slane %v6136_v8, %v5658_v3 }
 0x12d   : > { %1921 = vrot.lane.b32.xlu1 %v1915_v24, %s8569_s28 }
 0x12e   : > { %v6144_v5 = vpop.permute.xlu1 %807  ;;  %1923 = vrot.lane.b32.xlu0 %v1916_v4, %s8569_s28  ;;  %v2027_v13 = vrot.slane %v2012_v52, %v5517_v6 }
 0x130   : > { %v6157_v24 = vpop.permute.xlu0 %912  ;;  %v2030_v52 = vmul.f32 %v2027_v13, %v6004_v62  ;;  %v2115_v13 = vrot.slane %v6148_v35, %v5658_v3  ;;  %v2122_v62 = vrot.slane %v2107_v43, %v5658_v3 }
 0x131   : > { %1925 = vrot.lane.b32.xlu1 %v1917_v28, %s8569_s28  ;;  %v2056_v28 = vrot.slane %v6136_v8, %v5520_v7 }
 0x132   : > { %v6160_v4 = vpop.permute.xlu1 %861  ;;  %1972 = vrot.lane.b32.xlu0 %v1966_v9, %s8569_s28  ;;  %v2131_v43 = vmul.f32 %v2122_v62, %v6025_v15 }
 0x134   : > { %v6170_v14 = vpop.permute.xlu0 %961 }
 0x135   : > { %1974 = vrot.lane.b32.xlu1 %v1967_v33, %s8569_s28  ;;  %v2071_v33 = vrot.slane %v2056_v28, %v5520_v7  ;;  %v2079_v28 = vrot.slane %v2064_v19, %v5520_v7  ;;  %v2158_v19 = vrot.slane %v6136_v8, %v5673_v47 }
 0x136   : > { %v6175_v9 = vpop.permute.xlu1 %910  ;;  %1976 = vrot.lane.b32.xlu0 %v1968_v57, %s8569_s28 }
 0x137   : > { %v2080_v29 = vmul.f32 %v2071_v33, %v6031_v22  ;;  %v2126_v33 = vrot.slane %v2111_v37, %v5658_v3  ;;  %v2082_v0 = vmul.f32 %v2079_v28, %v6031_v22  ;;  %v2166_v28 = vrot.slane %v6148_v35, %v5673_v47 }
 0x138   : > { %v6181_v21 = vpop.permute.xlu0 %965 }
 0x139   : > { %8742 = vst [vmem:[#allocation18_spill] sm:$0xff] %v6181_v21  ;;  %2034 = vrot.lane.b32.xlu1 %v2028_v60, %s5360_s30 }
 0x13a   : > { %v6189_v57 = vpop.permute.xlu1 %914  ;;  %2036 = vrot.lane.b32.xlu0 %v2029_v53, %s5360_s30  ;;  %v2081_v53 = vmul.f32 %v2075_v54, %v6031_v22  ;;  %v2132_v54 = vmul.f32 %v2126_v33, %v6025_v15  ;;  %v2162_v22 = vrot.slane %v6136_v8, %v5680_v1  ;;  %v2181_v8 = vrot.slane %v2166_v28, %v5673_v47 }
 0x13c   : > { %v6198_v60 = vpop.permute.xlu0 %1026  ;;  %v2177_v33 = vrot.slane %v2162_v22, %v5673_v47 }
 0x13d   : > { %2038 = vrot.lane.b32.xlu1 %v2030_v52, %s5360_s30 }
 0x13e   : > { %v6203_v41 = vpop.permute.xlu1 %963  ;;  %2086 = vrot.lane.b32.xlu0 %v2080_v29, %s5360_s30  ;;  %v2130_v29 = vrot.slane %v2115_v13, %v5658_v3  ;;  %v2183_v35 = vmul.f32 %v2177_v33, %v6046_v34 }
 0x140   : > { %v6212_v2 = vpop.permute.xlu0 %1076 }
 0x141   : > { %2088 = vrot.lane.b32.xlu1 %v2081_v53, %s5360_s30  ;;  %v2173_v53 = vrot.slane %v2158_v19, %v5673_v47  ;;  %v2184_v19 = vmul.f32 %v2181_v8, %v6046_v34  ;;  %v8751_v8 = vmov 2  }
 0x142   : > { %v6217_v52 = vpop.permute.xlu1 %1024  ;;  %2090 = vrot.lane.b32.xlu0 %v2082_v0, %s5360_s30  ;;  %v2133_v0 = vmul.f32 %v2130_v29, %v6025_v15  ;;  %v6255_v29 = vld [vmem:[%s8511_s2] sm:$0xff] }
 0x143   : > { %v2182_v13 = vmul.f32 %v2173_v53, %v6046_v34  ;;  %8745 = vst [vmem:[#allocation21_spill] sm:$0xff] %v6255_v29 }
 0x144   : > { %v6223_v37 = vpop.permute.xlu0 %1080 }
 0x145   : > { %8743 = vst [vmem:[#allocation19_spill] sm:$0xff] %v6223_v37  ;;  %2137 = vrot.lane.b32.xlu1 %v2131_v43, %s5360_s30 }
 0x146   : > { %v6231_v50 = vpop.permute.xlu1 %1028  ;;  %2139 = vrot.lane.b32.xlu0 %v2132_v54, %s5360_s30 }
 0x147   : > { %8744 = vst [vmem:[#allocation20_spill] sm:$0xff] %v6231_v50 }
 0x148   : > { %v6236_v62 = vpop.permute.xlu0 %1129 }
 0x149   : > { %2141 = vrot.lane.b32.xlu1 %v2133_v0, %s5360_s30  ;;  %v5361_v0 = vmov 46  }
 0x14a   : > { %v6241_v43 = vpop.permute.xlu1 %1078  ;;  %2188 = vrot.lane.b32.xlu0 %v2182_v13, %s5360_s30 }
 0x14c   : > { %v6246_v54 = vpop.permute.xlu0 %1178 }
 0x14d   : > { %2190 = vrot.lane.b32.xlu1 %v2183_v35, %s5360_s30 }
 0x14e   : > { %v6249_v15 = vpop.permute.xlu1 %1127  ;;  %2192 = vrot.lane.b32.xlu0 %v2184_v19, %s5360_s30 }
 0x150   : > { %v6257_v22 = vpop.permute.xlu0 %1182 }
 0x151   : > { %8746 = vst [vmem:[#allocation22_spill] sm:$0xff] %v6257_v22 }
 0x152   : > { %v6259_v28 = vpop.permute.xlu1 %1131  ;;  %2561 = vperm.xlu0 %5168, %v6255_v29  }
 0x153   : > { %8747 = vst [vmem:[#allocation23_spill] sm:$0xff] %v6259_v28 }
 0x154   : > { %v6262_v34 = vpop.permute.xlu0 %1221 }
 0x155   : > { %8748 = vst [vmem:[#allocation24_spill] sm:$0xff] %v6262_v34 }
 0x156   : > { %v6264_v53 = vpop.permute.xlu1 %1180  ;;  %5171 = vset.pattern.permute.xlu0 %v5361_v0  ;;  %v384_v0 = vsel %vm383_vm5, %v382_v20, %v5931_v32 }
 0x157   : > { %2669 = vperm.xlu0 %5171, %v6255_v29  }
 0x158   : > { %v6267_v13 = vpop.permute.xlu0 %1258 }
 0x159   : > { %8749 = vst [vmem:[#allocation25_spill] sm:$0xff] %v6267_v13  ;;  %v444_v13 = vrot.slane %v388_v10, %v5520_v7 }
 0x15a   : > { %v6269_v33 = vpop.permute.xlu1 %1219 }
 0x15b   : > { %8750 = vst [vmem:[#allocation26_spill] sm:$0xff] %v6269_v33  ;;  %5174 = vset.pattern.permute.xlu0 %v8751_v8  ;;  %v6287_v8 = vmul.f32 %v5635_v49, %v384_v0  ;;  %v459_v49 = vrot.slane %v444_v13, %v5520_v7  ;;  %v481_v0 = vrot.slane %v388_v10, %v5658_v3 }
 0x15c   : > { %v6272_v35 = vpop.permute.xlu0 %1295 }
 0x15d   : > { %8752 = vst [vmem:[#allocation27_spill] sm:$0xff] %v6272_v35  ;;  %v407_v35 = vrot.slane %v388_v10, %v5517_v6  ;;  %v436_v32 = vrot.slane %v6287_v8, %v5520_v7  ;;  %v496_v13 = vrot.slane %v481_v0, %v5658_v3 }
 0x15e   : > { %v6274_v19 = vpop.permute.xlu1 %1256 }
 0x15f   : > { %8753 = vst [vmem:[#allocation28_spill] sm:$0xff] %v6274_v19  ;;  %v422_v20 = vrot.slane %v407_v35, %v5517_v6  ;;  %v451_v22 = vrot.slane %v436_v32, %v5520_v7  ;;  %v462_v35 = vmul.f32 %v459_v49, %v5965_v40 }
 0x160   : > { %v6277_v58 = vpop.permute.xlu0 %1332 }
 0x161   : > { %8754 = vst [vmem:[#allocation29_spill] sm:$0xff] %v6277_v58  ;;  %v399_v58 = vrot.slane %v6287_v8, %v5517_v6  ;;  %v460_v32 = vmul.f32 %v451_v22, %v5965_v40 }
 0x162   : > { %v6280_v11 = vpop.permute.xlu1 %1293 }
 0x163   : > { %8755 = vst [vmem:[#allocation30_spill] sm:$0xff] %v6280_v11  ;;  %v518_v11 = vrot.slane %v388_v10, %v5673_v47  ;;  %v499_v10 = vmul.f32 %v496_v13, %v5998_v26 }
 0x164   : > { %v6284_v18 = vpop.permute.xlu0 %1393 }
 0x165   : > { %8756 = vst [vmem:[#allocation31_spill] sm:$0xff] %v6284_v18 }
 0x166   : > { %v6289_v29 = vpop.permute.xlu1 %1330 }
 0x167   : > { %8757 = vst [vmem:[#allocation32_spill] sm:$0xff] %v6289_v29  ;;  %v473_v29 = vrot.slane %v6287_v8, %v5658_v3 }
 0x168   : > { %v6293_v34 = vpop.permute.xlu0 %1443 }
 0x169   : > { %8758 = vst [vmem:[#allocation33_spill] sm:$0xff] %v6293_v34  ;;  %v414_v34 = vrot.slane %v399_v58, %v5517_v6  ;;  %v488_v33 = vrot.slane %v473_v29, %v5658_v3 }
 0x16a   : > { %v6299_v17 = vpop.permute.xlu1 %1391 }
 0x16b   : > { %8759 = vst [vmem:[#allocation34_spill] sm:$0xff] %v6299_v17  ;;  %v425_v17 = vmul.f32 %v422_v20, %v5945_v31  ;;  %v423_v58 = vmul.f32 %v414_v34, %v5945_v31  ;;  %v497_v0 = vmul.f32 %v488_v33, %v5998_v26 }
 0x16c   : > { %v6304_v18 = vpop.permute.xlu0 %1447 }
 0x16d   : > { %8760 = vst [vmem:[#allocation35_spill] sm:$0xff] %v6304_v18  ;;  %v510_v18 = vrot.slane %v6287_v8, %v5673_v47  ;;  %v465_v49 = vadd.f32 %v462_v35, %v425_v17  ;;  %v463_v29 = vadd.f32 %v460_v32, %v423_v58  ;;  %v440_v17 = vrot.slane %v6287_v8, %v5646_v55 }
 0x16e   : > { %v6311_v19 = vpop.permute.xlu1 %1395  ;;  %v477_v32 = vrot.slane %v6287_v8, %v5662_v12 }
 0x16f   : > { %8761 = vst [vmem:[#allocation36_spill] sm:$0xff] %v6311_v19  ;;  %v533_v19 = vrot.slane %v518_v11, %v5673_v47  ;;  %v525_v37 = vrot.slane %v510_v18, %v5673_v47  ;;  %v502_v21 = vadd.f32 %v499_v10, %v465_v49  ;;  %v403_v11 = vrot.slane %v6287_v8, %v5632_v48 }
 0x170   : > { %v6318_v28 = vpop.permute.xlu0 %1496  ;;  %v500_v35 = vadd.f32 %v497_v0, %v463_v29  ;;  %v588_v18 = vsel %vm587_vm1, %v6060_v16, %v6039_v30  ;;  %v639_v10 = vsel %vm587_vm1, %v6053_v59, %v6085_v36  ;;  %v690_v16 = vsel %vm587_vm1, %v6094_v42, %v6079_v27 }
 0x171   : > { %8762 = vst [vmem:[#allocation37_spill] sm:$0xff] %v6318_v28  ;;  %v536_v50 = vmul.f32 %v533_v19, %v6013_v45  ;;  %v534_v34 = vmul.f32 %v525_v37, %v6013_v45  ;;  %v514_v29 = vrot.slane %v6287_v8, %v5680_v1  ;;  %v492_v59 = vrot.slane %v477_v32, %v5658_v3 }
 0x172   : > { %v6325_v20 = vpop.permute.xlu1 %1445 }
 0x173   : > { %v539_v33 = vadd.f32 %v536_v50, %v502_v21  ;;  %v537_v19 = vadd.f32 %v534_v34, %v500_v35  ;;  %v418_v50 = vrot.slane %v403_v11, %v5517_v6  ;;  %v455_v21 = vrot.slane %v440_v17, %v5520_v7 }
 0x174   : > { %v6330_v28 = vpop.permute.xlu0 %1545  ;;  %v741_v11 = vsel %vm587_vm1, %v6090_v51, %v6117_v44  ;;  %v498_v32 = vmul.f32 %v492_v59, %v5998_v26  ;;  %v916_v26 = vsel %vm813_vm6, %v6175_v9, %v6157_v24  ;;  %v640_v9 = vsel %vm587_vm1, %v6085_v36, %v6067_v56 }
 0x175   : > { %v595_v37 = vadd.f32 %v6074_v46, %v539_v33  ;;  %v593_v49 = vadd.f32 %v588_v18, %v537_v19  ;;  %v424_v17 = vmul.f32 %v418_v50, %v5945_v31  ;;  %v461_v18 = vmul.f32 %v455_v21, %v5965_v40 }
 0x176   : > { %v6333_v22 = vpop.permute.xlu1 %1494  ;;  %v865_v31 = vsel %vm813_vm6, %v6126_v61, %v6160_v4  ;;  %v967_v61 = vsel %vm813_vm6, %v6170_v14, %v6203_v41  ;;  %v691_v14 = vsel %vm587_vm1, %v6079_v27, %v6106_v39 }
 0x177   : > { %v644_v34 = vadd.f32 %v639_v10, %v593_v49  ;;  %v646_v35 = vadd.f32 %v6067_v56, %v595_v37  ;;  %v814_v37 = vsel %vm813_vm6, %v6144_v5, %v6114_v23  ;;  %v529_v10 = vrot.slane %v514_v29, %v5673_v47 }
 0x178   : > { %v6339_v13 = vpop.permute.xlu0 %1549  ;;  %v464_v40 = vadd.f32 %v461_v18, %v424_v17 }
 0x179   : > { %v695_v42 = vadd.f32 %v690_v16, %v644_v34  ;;  %v697_v19 = vadd.f32 %v6106_v39, %v646_v35  ;;  %v535_v50 = vmul.f32 %v529_v10, %v6013_v45  ;;  %v589_v45 = vsel %vm587_vm1, %v6039_v30, %v6074_v46 }
 0x17a   : > { %v6345_v58 = vpop.permute.xlu1 %1498  ;;  %v501_v5 = vadd.f32 %v498_v32, %v464_v40  ;;  %v1082_v32 = vsel %vm1030_vm7, %v6212_v2, %v6241_v43  ;;  %v815_v2 = vsel %vm813_vm6, %v6114_v23, %v6129_v25  ;;  %v917_v23 = vsel %vm813_vm6, %v6157_v24, %v6189_v57  ;;  %v8767_v24 = vld [vmem:[#allocation23_spill] sm:$0xff] }
 0x17b   : > { %v746_v49 = vadd.f32 %v741_v11, %v695_v42  ;;  %v748_v21 = vadd.f32 %v6103_v63, %v697_v19  ;;  %v1031_v42 = vsel %vm1030_vm7, %v6217_v52, %v6198_v60  ;;  %v742_v52 = vsel %vm587_vm1, %v6117_v44, %v6103_v63 }
 0x17c   : > { %v6354_v0 = vpop.permute.xlu0 %1611  ;;  %v538_v11 = vadd.f32 %v535_v50, %v501_v5  ;;  %v1184_v50 = vsel %vm1030_vm7, %v6246_v54, %v6264_v53 }
 0x17d   : > { %v819_v16 = vadd.f32 %v814_v37, %v746_v49  ;;  %v821_v29 = vadd.f32 %v6129_v25, %v748_v21 }
 0x17e   : > { %v6362_v33 = vpop.permute.xlu1 %1547  ;;  %v594_v19 = vadd.f32 %v589_v45, %v538_v11 }
 0x17f   : > { %v870_v35 = vadd.f32 %v865_v31, %v819_v16  ;;  %v872_v37 = vadd.f32 %v6141_v38, %v821_v29  ;;  %v1133_v31 = vsel %vm1030_vm7, %v6249_v15, %v6236_v62  ;;  %v8763_v16 = vld [vmem:[#allocation18_spill] sm:$0xff]  ;;  %v866_v15 = vsel %vm813_vm6, %v6160_v4, %v6141_v38  ;;  %v8764_v29 = vld [vmem:[#allocation20_spill] sm:$0xff] }
 0x180   : > { %v6371_v8 = vpop.permute.xlu0 %1661  ;;  %v645_v10 = vadd.f32 %v640_v9, %v594_v19  ;;  %v968_v11 = vsel %vm813_vm6, %v6203_v41, %v8763_v16  ;;  %v8765_v9 = vld [vmem:[#allocation19_spill] sm:$0xff]  ;;  %v8766_v4 = vld [vmem:[#allocation26_spill] sm:$0xff] }
 0x181   : > { %v921_v17 = vadd.f32 %v916_v26, %v870_v35  ;;  %v923_v56 = vadd.f32 %v6189_v57, %v872_v37  ;;  %v1032_v37 = vsel %vm1030_vm7, %v6198_v60, %v8764_v29  ;;  %v1083_v41 = vsel %vm1030_vm7, %v6241_v43, %v8765_v9 }
 0x182   : > { %v6378_v51 = vpop.permute.xlu1 %1609  ;;  %v696_v40 = vadd.f32 %v691_v14, %v645_v10  ;;  %v8768_v14 = vld [vmem:[#allocation28_spill] sm:$0xff]  ;;  %v1134_v60 = vsel %vm1030_vm7, %v6236_v62, %v8767_v24 }
 0x183   : > { %v972_v30 = vadd.f32 %v967_v61, %v921_v17  ;;  %v974_v26 = vadd.f32 %v8763_v16, %v923_v56 }
 0x184   : > { %v6385_v34 = vpop.permute.xlu0 %1665  ;;  %v747_v21 = vadd.f32 %v742_v52, %v696_v40 }
 0x185   : > { %v1036_v36 = vadd.f32 %v1031_v42, %v972_v30  ;;  %v1038_v35 = vadd.f32 %v8764_v29, %v974_v26  ;;  %v8773_v29 = vld [vmem:[#allocation24_spill] sm:$0xff] }
 0x186   : > { %v6391_v59 = vpop.permute.xlu1 %1613  ;;  %v820_v5 = vadd.f32 %v815_v2, %v747_v21  ;;  %v1223_v62 = vsel %vm383_vm5, %v8766_v4, %v8773_v29 }
 0x187   : > { %v1087_v27 = vadd.f32 %v1082_v32, %v1036_v36  ;;  %v1089_v38 = vadd.f32 %v8765_v9, %v1038_v35  ;;  %v8769_v36 = vld [vmem:[#allocation30_spill] sm:$0xff] }
 0x188   : > { %v6399_v18 = vpop.permute.xlu0 %1714  ;;  %v871_v25 = vadd.f32 %v866_v15, %v820_v5 }
 0x189   : > { %v1138_v44 = vadd.f32 %v1133_v31, %v1087_v27  ;;  %v1140_v57 = vadd.f32 %v8767_v24, %v1089_v38  ;;  %v8770_v27 = vld [vmem:[#allocation22_spill] sm:$0xff] }
 0x18a   : > { %v6408_v46 = vpop.permute.xlu1 %1663  ;;  %v922_v17 = vadd.f32 %v917_v23, %v871_v25  ;;  %v1185_v43 = vsel %vm1030_vm7, %v6264_v53, %v8770_v27  ;;  %v8774_v25 = vld [vmem:[#allocation25_spill] sm:$0xff] }
 0x18b   : > { %v1189_v45 = vadd.f32 %v1184_v50, %v1138_v44  ;;  %v1191_v2 = vadd.f32 %v8770_v27, %v1140_v57  ;;  %v8771_v50 = vld [vmem:[#allocation32_spill] sm:$0xff]  ;;  %v8772_v44 = vld [vmem:[#allocation34_spill] sm:$0xff]  ;;  %v8775_v53 = vld [vmem:[#allocation33_spill] sm:$0xff] }
 0x18c   : > { %v6417_v49 = vpop.permute.xlu0 %1763  ;;  %v973_v30 = vadd.f32 %v968_v11, %v922_v17  ;;  %v1260_v11 = vsel %vm383_vm5, %v8768_v14, %v8774_v25 }
 0x18d   : > { %v1227_v42 = vadd.f32 %v8766_v4, %v1189_v45  ;;  %v1229_v35 = vadd.f32 %v8773_v29, %v1191_v2 }
 0x18e   : > { %v6425_v39 = vpop.permute.xlu1 %1712  ;;  %v1037_v56 = vadd.f32 %v1032_v37, %v973_v30 }
 0x18f   : > { %v1264_v32 = vadd.f32 %v8768_v14, %v1227_v42  ;;  %v8776_v42 = vld [vmem:[#allocation27_spill] sm:$0xff]  ;;  %v1266_v4 = vadd.f32 %v8774_v25, %v1229_v35  ;;  %v8781_v25 = vld [vmem:[#allocation37_spill] sm:$0xff] }
 0x190   : > { %v6434_v63 = vpop.permute.xlu0 %1767  ;;  %v1088_v40 = vadd.f32 %v1083_v41, %v1037_v56  ;;  %v1297_v37 = vsel %vm383_vm5, %v8769_v36, %v8776_v42 }
 0x191   : > { %v1301_v52 = vadd.f32 %v8769_v36, %v1264_v32  ;;  %v8777_v32 = vld [vmem:[#allocation29_spill] sm:$0xff]  ;;  %v1303_v41 = vadd.f32 %v8776_v42, %v1266_v4 }
 0x192   : > { %v6440_v61 = vpop.permute.xlu1 %1716  ;;  %v1139_v26 = vadd.f32 %v1134_v60, %v1088_v40  ;;  %v1334_v14 = vsel %vm383_vm5, %v8771_v50, %v8777_v32  ;;  %v8778_v60 = vld [vmem:[#allocation31_spill] sm:$0xff]  ;;  %v8779_v40 = vld [vmem:[#allocation36_spill] sm:$0xff] }
 0x193   : > { %v1338_v21 = vadd.f32 %v8771_v50, %v1301_v52  ;;  %v1398_v36 = vsel %vm1397_vm8, %v8772_v44, %v8778_v60  ;;  %v1399_v27 = vsel %vm1397_vm8, %v8778_v60, %v8779_v40  ;;  %v1340_v2 = vadd.f32 %v8777_v32, %v1303_v41 }
 0x194   : > { %v6445_v54 = vpop.permute.xlu0 %1820  ;;  %v1190_v45 = vadd.f32 %v1185_v43, %v1139_v26  ;;  %v1449_v50 = vsel %vm1397_vm8, %v8775_v53, %v6325_v20  ;;  %v1617_v32 = vsel %vm1615_vm9, %v6354_v0, %v6391_v59  ;;  %v1719_v59 = vsel %vm1615_vm9, %v6399_v18, %v6440_v61 }
 0x195   : > { %v1403_v15 = vadd.f32 %v8772_v44, %v1338_v21  ;;  %v1405_v44 = vadd.f32 %v1399_v27, %v1340_v2 }
 0x196   : > { %v6452_v19 = vpop.permute.xlu1 %1765  ;;  %v1228_v17 = vadd.f32 %v1223_v62, %v1190_v45 }
 0x197   : > { %v1454_v9 = vadd.f32 %v8775_v53, %v1403_v15  ;;  %v8780_v15 = vld [vmem:[#allocation35_spill] sm:$0xff] }
 0x198   : > { %v6459_v10 = vpop.permute.xlu0 %1870  ;;  %v1265_v30 = vadd.f32 %v1260_v11, %v1228_v17  ;;  %v1450_v29 = vsel %vm1397_vm8, %v6325_v20, %v8780_v15  ;;  %v1500_v11 = vsel %vm1397_vm8, %v6333_v22, %v8781_v25  ;;  %v1501_v17 = vsel %vm1397_vm8, %v8781_v25, %v6345_v58 }
 0x199   : > { %v1505_v24 = vadd.f32 %v6333_v22, %v1454_v9  ;;  %v1456_v42 = vadd.f32 %v1450_v29, %v1405_v44  ;;  %v1551_v20 = vsel %vm1397_vm8, %v6330_v28, %v6362_v33  ;;  %v1616_v58 = vsel %vm1615_vm9, %v6378_v51, %v6354_v0 }
 0x19a   : > { %v6465_v31 = vpop.permute.xlu1 %1818  ;;  %v1302_v56 = vadd.f32 %v1297_v37, %v1265_v30  ;;  %v1552_v37 = vsel %vm1397_vm8, %v6362_v33, %v6339_v13  ;;  %v1667_v13 = vsel %vm1615_vm9, %v6371_v8, %v6408_v46  ;;  %v1668_v33 = vsel %vm1615_vm9, %v6408_v46, %v6385_v34 }
 0x19b   : > { %v1556_v43 = vadd.f32 %v6330_v28, %v1505_v24  ;;  %v1507_v30 = vadd.f32 %v1501_v17, %v1456_v42  ;;  %v1718_v0 = vsel %vm1615_vm9, %v6425_v39, %v6399_v18  ;;  %v1769_v34 = vsel %vm1615_vm9, %v6417_v49, %v6452_v19 }
 0x19c   : > { %v6472_v16 = vpop.permute.xlu0 %1874  ;;  %v1339_v21 = vadd.f32 %v1334_v14, %v1302_v56  ;;  %v1770_v46 = vsel %vm1615_vm9, %v6452_v19, %v6434_v63  ;;  %v1825_v18 = vsel %vm1824_vm10, %v6465_v31, %v6445_v54 }
 0x19d   : > { %v1621_v35 = vadd.f32 %v6378_v51, %v1556_v43  ;;  %v1558_v41 = vadd.f32 %v1552_v37, %v1507_v30 }
 0x19e   : > { %v6478_v5 = vpop.permute.xlu1 %1822  ;;  %v1404_v62 = vadd.f32 %v1398_v36, %v1339_v21 }
 0x19f   : > { %v1672_v22 = vadd.f32 %v6371_v8, %v1621_v35  ;;  %v1623_v36 = vadd.f32 %v1617_v32, %v1558_v41  ;;  %v1826_v61 = vsel %vm1824_vm10, %v6445_v54, %v6478_v5 }
 0x1a0   : > { %v6484_v23 = vpop.permute.xlu0 %1923  ;;  %v1455_v9 = vadd.f32 %v1449_v50, %v1404_v62 }
 0x1a1   : > { %v1723_v28 = vadd.f32 %v6425_v39, %v1672_v22  ;;  %v1674_v27 = vadd.f32 %v1668_v33, %v1623_v36 }
 0x1a2   : > { %v6490_v38 = vpop.permute.xlu1 %1872  ;;  %v1506_v4 = vadd.f32 %v1500_v11, %v1455_v9 }
 0x1a3   : > { %v1774_v2 = vadd.f32 %v6417_v49, %v1723_v28  ;;  %v1725_v39 = vadd.f32 %v1719_v59, %v1674_v27  ;;  %v1876_v49 = vsel %vm1824_vm10, %v6459_v10, %v6490_v38  ;;  %v1877_v63 = vsel %vm1824_vm10, %v6490_v38, %v6472_v16 }
 0x1a4   : > { %v6497_v57 = vpop.permute.xlu0 %1972  ;;  %v1557_v14 = vadd.f32 %v1551_v20, %v1506_v4 }
 0x1a5   : > { %v1830_v43 = vadd.f32 %v6465_v31, %v1774_v2  ;;  %v1776_v29 = vadd.f32 %v1770_v46, %v1725_v39  ;;  %v8782_v2 = vld [vmem:[#allocation21_spill] sm:$0xff]  ;;  %v8784_v46 = vmov 1   ;;  %v8785_v39 = vmov 10  }
 0x1a6   : > { %v6503_v52 = vpop.permute.xlu1 %1921  ;;  %v1622_v60 = vadd.f32 %v1616_v58, %v1557_v14 }
 0x1a7   : > { %v1832_v62 = vadd.f32 %v1826_v61, %v1776_v29  ;;  %v1881_v44 = vadd.f32 %v6459_v10, %v1830_v43  ;;  %v1927_v54 = vsel %vm1824_vm10, %v6503_v52, %v6484_v23  ;;  %v5363_v43 = vmov 65  }
 0x1a8   : > { %v1977_v26 = vpop.permute.xlu0 %1976  ;;  %v1673_v40 = vadd.f32 %v1667_v13, %v1622_v60  ;;  %v8788_v61 = vmov 21   ;;  %v5365_v29 = vmov 48  }
 0x1a9   : > { %v1883_v11 = vadd.f32 %v1877_v63, %v1832_v62  ;;  %v1932_v17 = vadd.f32 %v6503_v52, %v1881_v44  ;;  %v8789_v63 = vmov 9   ;;  %v8790_v62 = vld [vmem:[#allocation6_spill] sm:$0xff]  ;;  %v8791_v44 = vmov 4  }
 0x1aa   : > { %v1926_v45 = vpop.permute.xlu1 %1925  ;;  %v1724_v21 = vadd.f32 %v1718_v0, %v1673_v40 }
 0x1ab   : > { %v1928_v5 = vsel %vm1824_vm10, %v6484_v23, %v1926_v45  ;;  %v1983_v23 = vadd.f32 %v6497_v57, %v1932_v17  ;;  %v5370_v17 = vmov 56  }
 0x1ac   : > { %v2037_v53 = vpop.permute.xlu0 %2036  ;;  %v1775_v15 = vadd.f32 %v1769_v34, %v1724_v21  ;;  %v1934_v9 = vadd.f32 %v1928_v5, %v1883_v11  ;;  %v8783_v34 = vmov 11   ;;  %v5362_v21 = vmov 38  }
 0x1ad   : > { %v8794_v5 = vmov 29   ;;  %v5369_v11 = vmov 47  }
 0x1ae   : > { %v1975_v24 = vpop.permute.xlu1 %1974  ;;  %v1831_v19 = vadd.f32 %v1825_v18, %v1775_v15  ;;  %v8787_v18 = vld [vmem:[#allocation9_spill] sm:$0xff]  ;;  %v5364_v15 = vmov 37  }
 0x1af   : > { %v1978_v16 = vsel %vm1824_vm10, %v6497_v57, %v1975_v24  ;;  %v1979_v38 = vsel %vm1824_vm10, %v1975_v24, %v1977_v26 }
 0x1b0   : > { %v2087_v56 = vpop.permute.xlu0 %2086  ;;  %v1882_v25 = vadd.f32 %v1876_v49, %v1831_v19  ;;  %v1985_v30 = vadd.f32 %v1979_v38, %v1934_v9  ;;  %v5366_v49 = vmov 55   ;;  %v5367_v19 = vmov 64   ;;  %v8797_v38 = vld [vmem:[#allocation8_spill] sm:$0xff] }
 0x1b1   : > { %v8799_v9 = vmov 30  }
 0x1b2   : > { %v2035_v51 = vpop.permute.xlu1 %2034  ;;  %v1933_v10 = vadd.f32 %v1927_v54, %v1882_v25  ;;  %v5368_v54 = vmov 36   ;;  %v8795_v25 = vmov 31  }
 0x1b3   : > { %v2041_v20 = vsel %vm2040_vm11, %v2035_v51, %v2037_v53  ;;  %v2046_v58 = vadd.f32 %v2035_v51, %v1983_v23  ;;  %v8801_v23 = vmov 18  }
 0x1b4   : > { %v2091_v8 = vpop.permute.xlu0 %2090  ;;  %v1984_v4 = vadd.f32 %v1978_v16, %v1933_v10  ;;  %v8796_v16 = vmov 3   ;;  %v8798_v10 = vmov 12  }
 0x1b6   : > { %v2039_v50 = vpop.permute.xlu1 %2038  ;;  %v2047_v32 = vadd.f32 %v2041_v20, %v1984_v4  ;;  %v5372_v20 = vmov 57   ;;  %v5373_v4 = vmov 66  }
 0x1b7   : > { %v2042_v37 = vsel %vm2040_vm11, %v2037_v53, %v2039_v50  ;;  %v2097_v53 = vadd.f32 %v2087_v56, %v2046_v58  ;;  %v8786_v50 = vmov 28  }
 0x1b8   : > { %v2140_v35 = vpop.permute.xlu0 %2139  ;;  %v2048_v14 = vadd.f32 %v2042_v37, %v1985_v30  ;;  %v8800_v37 = vmov 0  }
 0x1ba   : > { %v2089_v31 = vpop.permute.xlu1 %2088 }
 0x1bb   : > { %v2092_v52 = vsel %vm2040_vm11, %v2087_v56, %v2089_v31  ;;  %v2093_v22 = vsel %vm2040_vm11, %v2089_v31, %v2091_v8  ;;  %v364_v8 = vld [vmem:[%s8514_s5] sm:$0xff]  ;;  %v8793_v31 = vld [vmem:[#allocation7_spill] sm:$0xff] }
 0x1bc   : > { %v2189_v45 = vpop.permute.xlu0 %2188  ;;  %v2098_v28 = vadd.f32 %v2092_v52, %v2047_v32  ;;  %v2099_v13 = vadd.f32 %v2093_v22, %v2048_v14  ;;  %v8802_v22 = vmov 27  }
 0x1be   : > { %v2138_v42 = vpop.permute.xlu1 %2137 }
 0x1bf   : > { %v2143_v24 = vsel %vm2040_vm11, %v2138_v42, %v2140_v35  ;;  %v2148_v40 = vadd.f32 %v2138_v42, %v2097_v53  ;;  %v5371_v42 = vmov 39   ;;  %v5375_v53 = vmov 54  }
 0x1c0   : > { %v2149_v33 = vadd.f32 %v2143_v24, %v2098_v28  ;;  %v2193_v60 = vpop.permute.xlu0 %2192  ;;  %v8804_v28 = vmov 22  }
 0x1c1   : > { %v6599_v56 = vadd.f32 %v2189_v45, %v2148_v40  ;;  %v5379_v40 = vmov 58  }
 0x1c2   : > { %v2142_v26 = vpop.permute.xlu1 %2141 }
 0x1c3   : > { %v2144_v41 = vsel %vm2040_vm11, %v2140_v35, %v2142_v26  ;;  %v8792_v35 = vmov 20  }
 0x1c4   : > { %v2150_v36 = vadd.f32 %v2144_v41, %v2099_v13  ;;  %v8803_v41 = vmov 13   ;;  %v5374_v13 = vmov 45  }
 0x1c6   : > { %v2191_v57 = vpop.permute.xlu1 %2190 }
 0x1c7   : > { %v2194_v0 = vsel %vm2040_vm11, %v2189_v45, %v2191_v57  ;;  %v2195_v59 = vsel %vm2040_vm11, %v2191_v57, %v2193_v60  ;;  %v5376_v60 = vmov 40   ;;  %v5377_v57 = vmov 49  }
 0x1c8   : > { %v6591_v51 = vadd.f32 %v2194_v0, %v2149_v33  ;;  %v6593_v27 = vadd.f32 %v2195_v59, %v2150_v36  ;;  %v5378_v59 = vmov 63  }
 0x1ca   : > { %2209 = vrot.lane.b32.xlu1 %v6593_v27, %s5350_s25  ;;  %2207 = vrot.lane.b32.xlu0 %v6591_v51, %s5350_s25 }
 0x1ce   : > { %2205 = vrot.lane.b32.xlu1 %v6599_v56, %s5350_s25  ;;  %2788 = vperm.xlu0 %5174, %v8782_v2  }
 0x1d1   : > { %v6656_v30 = vpop.permute.xlu0 %2561 }
 0x1d2   : > { %2269 = vperm.xlu1 %5165, %v364_v8   ;;  %5175 = vset.pattern.permute.xlu0 %v8783_v34  ;;  %v5380_v34 = vmov 67  }
 0x1d3   : > { %2824 = vperm.xlu0 %5175, %v8782_v2  }
 0x1d6   : > { %5166 = vset.pattern.permute.xlu1 %v8784_v46  ;;  %v6661_v45 = vpop.permute.xlu0 %2669 }
 0x1d7   : > { %2489 = vperm.xlu1 %5166, %v8782_v2   ;;  %5178 = vset.pattern.permute.xlu0 %v5362_v21  ;;  %v8805_v21 = vmov 5  }
 0x1d8   : > { %2932 = vperm.xlu0 %5178, %v8782_v2  }
 0x1db   : > { %5167 = vset.pattern.permute.xlu1 %v8785_v39 }
 0x1dc   : > { %2525 = vperm.xlu1 %5167, %v8782_v2   ;;  %5181 = vset.pattern.permute.xlu0 %v5363_v43  ;;  %v5381_v43 = vmov 0.0  }
 0x1dd   : > { %3040 = vperm.xlu0 %5181, %v8782_v2  }
 0x1e0   : > { %5169 = vset.pattern.permute.xlu1 %v8786_v50  ;;  %v6692_v50 = vrot.slane %v5381_v43, %v5517_v6 }
 0x1e1   : > { %2597 = vperm.xlu1 %5169, %v8782_v2   ;;  %3077 = vrot.lane.b32.xlu0 %v8787_v18, %s5323_s12 }
 0x1e2   : > { %5184 = vset.pattern.permute.xlu0 %v8788_v61  ;;  %v8806_v61 = vmov 26  }
 0x1e5   : > { %5170 = vset.pattern.permute.xlu1 %v5364_v15  ;;  %3159 = vperm.xlu0 %5184, %v8782_v2  }
 0x1e6   : > { %2633 = vperm.xlu1 %5170, %v8782_v2  }
 0x1e9   : > { %5187 = vset.pattern.permute.xlu0 %v5365_v29  ;;  %v6701_v29 = vrot.slane %v5381_v43, %v5520_v7 }
 0x1ea   : > { %5172 = vset.pattern.permute.xlu1 %v5366_v49  ;;  %3267 = vperm.xlu0 %5187, %v8782_v2  }
 0x1eb   : > { %2705 = vperm.xlu1 %5172, %v8782_v2  }
 0x1ee   : > { %5190 = vset.pattern.permute.xlu0 %v8789_v63  ;;  %v8807_v63 = vmov 14  }
 0x1ef   : > { %5173 = vset.pattern.permute.xlu1 %v5367_v19  ;;  %2335 = vperm.xlu0 %5190, %v8782_v2   ;;  %v6710_v19 = vrot.slane %v5381_v43, %v5658_v3 }
 0x1f0   : > { %2741 = vperm.xlu1 %5173, %v8782_v2  }
 0x1f3   : > { %2302 = vrot.lane.b32.xlu0 %v8787_v18, %s5347_s21 }
 0x1f4   : > { %2776 = vrot.lane.b32.xlu1 %v8790_v62, %s5317_s29  ;;  %5193 = vset.pattern.permute.xlu0 %v8791_v44 }
 0x1f5   : > { %5176 = vset.pattern.permute.xlu1 %v8792_v35 }
 0x1f7   : > { %3375 = vperm.xlu0 %5193, %v8782_v2  }
 0x1f8   : > { %2778 = vrot.lane.b32.xlu1 %v8793_v31, %s5317_s29  ;;  %s8822_s29 = smov 112  }
 0x1fb   : > { %5196 = vset.pattern.permute.xlu0 %v5368_v54  ;;  %v2576_v54 = vmul.f32 %v6710_v19, %v6656_v30 }
 0x1fc   : > { %2860 = vperm.xlu1 %5176, %v8782_v2   ;;  %2401 = vperm.xlu0 %5196, %v8782_v2  }
 0x200   : > { %5177 = vset.pattern.permute.xlu1 %v8794_v5  ;;  %5199 = vset.pattern.permute.xlu0 %v8795_v25  ;;  %v6721_v5 = vrot.slane %v5381_v43, %v5673_v47  ;;  %v8808_v25 = vmov 23  }
 0x201   : > { %2896 = vperm.xlu1 %5177, %v8782_v2  }
 0x205   : > { %5179 = vset.pattern.permute.xlu1 %v5369_v11 }
 0x206   : > { %2968 = vperm.xlu1 %5179, %v8782_v2  }
 0x20a   : > { %5180 = vset.pattern.permute.xlu1 %v5370_v17 }
 0x20b   : > { %3004 = vperm.xlu1 %5180, %v8782_v2  }
 0x20f   : > { %5182 = vset.pattern.permute.xlu1 %v8796_v16 }
 0x210   : > { %3087 = vperm.xlu1 %5182, %v8782_v2  }
 0x214   : > { %3075 = vrot.lane.b32.xlu1 %v8797_v38, %s5323_s12 }
 0x215   : > { %5183 = vset.pattern.permute.xlu1 %v8798_v10  ;;  %v6731_v10 = vrot.slane %v5381_v43, %v5632_v48 }
 0x218   : > { %3123 = vperm.xlu1 %5183, %v8782_v2  }
 0x21c   : > { %5185 = vset.pattern.permute.xlu1 %v8799_v9  ;;  %v8810_v9 = vmov 32  }
 0x21d   : > { %3195 = vperm.xlu1 %5185, %v8782_v2  }
 0x221   : > { %5186 = vset.pattern.permute.xlu1 %v5371_v42 }
 0x222   : > { %3231 = vperm.xlu1 %5186, %v8782_v2  }
 0x226   : > { %5188 = vset.pattern.permute.xlu1 %v5372_v20  ;;  %v6739_v20 = vrot.slane %v5381_v43, %v5646_v55 }
 0x227   : > { %3303 = vperm.xlu1 %5188, %v8782_v2  }
 0x22b   : > { %5189 = vset.pattern.permute.xlu1 %v8800_v37 }
 0x22c   : > { %2313 = vperm.xlu1 %5189, %v8782_v2  }
 0x230   : > { %5191 = vset.pattern.permute.xlu1 %v5373_v4 }
 0x231   : > { %3339 = vperm.xlu1 %5191, %v8782_v2  }
 0x235   : > { %2300 = vrot.lane.b32.xlu1 %v8797_v38, %s5347_s21 }
 0x236   : > { %5192 = vset.pattern.permute.xlu1 %v8801_v23 }
 0x239   : > { %2357 = vperm.xlu1 %5192, %v8782_v2  }
 0x23c   : > { %v2210_v52 = vpop.permute.xlu1 %2209  ;;  %v2208_v58 = vpop.permute.xlu0 %2207 }
 0x23d   : > { %5194 = vset.pattern.permute.xlu1 %v8802_v22  ;;  %v2212_v14 = vsel %vm1989_vm4, %v2208_v58, %v2210_v52  ;;  %v5382_v52 = vmov 41   ;;  %v2684_v22 = vmul.f32 %v6739_v20, %v6661_v45 }
 0x23e   : > { %2379 = vperm.xlu1 %5194, %v8782_v2  }
 0x240   : > { %v2206_v32 = vpop.permute.xlu1 %2205 }
 0x241   : > { %v2211_v26 = vsel %vm1989_vm4, %v2206_v32, %v2208_v58  ;;  %v6750_v58 = vrot.slane %v5381_v43, %v5662_v12 }
 0x242   : > { %v2215_v24 = vadd.f32 %v2212_v14, %v2211_v26  ;;  %5195 = vset.pattern.permute.xlu1 %v8803_v41  ;;  %v5383_v14 = vmov 50  }
 0x243   : > { %3394 = vperm.xlu1 %5195, %v8782_v2  }
 0x244   : > { %2216 = vadd.xlane.f32.xlu0 %v2215_v24  ;;  %v6758_v24 = vrot.slane %v5381_v43, %v5680_v1 }
 0x247   : > { %5197 = vset.pattern.permute.xlu1 %v8804_v28 }
 0x248   : > { %3413 = vperm.xlu1 %5197, %v8782_v2  }
 0x24c   : > { %5198 = vset.pattern.permute.xlu1 %v5374_v13 }
 0x24d   : > { %2423 = vperm.xlu1 %5198, %v8782_v2  }
 0x251   : > { %5200 = vset.pattern.permute.xlu1 %v5375_v53  ;;  %v6673_v33 = vpop.permute.xlu1 %2269  ;;  %v5384_v53 = vmov 59  }
 0x252   : > { %2445 = vperm.xlu1 %5200, %v8782_v2  }
 0x256   : > { %5201 = vset.pattern.permute.xlu1 %v5376_v60  ;;  %v6676_v36 = vpop.permute.xlu1 %2489 }
 0x257   : > { %3451 = vperm.xlu1 %5201, %v8782_v2   ;;  %v2504_v15 = vmul.f32 %v6692_v50, %v6676_v36 }
 0x25a   : > { %3432 = vperm.xlu0 %5199, %v8782_v2  }
 0x25b   : > { %5203 = vset.pattern.permute.xlu1 %v5377_v57  ;;  %v6680_v0 = vpop.permute.xlu1 %2525 }
 0x25c   : > { %3470 = vperm.xlu1 %5203, %v8782_v2   ;;  %v2540_v44 = vmul.f32 %v6701_v29, %v6680_v0 }
 0x25e   : > { %5202 = vset.pattern.permute.xlu0 %v5378_v59  ;;  %v6772_v59 = vpop.permute.xlu0 %2788 }
 0x25f   : > { %2467 = vperm.xlu0 %5202, %v8782_v2  }
 0x260   : > { %5204 = vset.pattern.permute.xlu1 %v5379_v40  ;;  %v6684_v8 = vpop.permute.xlu1 %2597  ;;  %v5385_v40 = vmov 68  }
 0x261   : > { %3489 = vperm.xlu1 %5204, %v8782_v2   ;;  %v2612_v17 = vmul.f32 %v6721_v5, %v6684_v8 }
 0x263   : > { %5205 = vset.pattern.permute.xlu0 %v5380_v34 }
 0x264   : > { %3508 = vperm.xlu0 %5205, %v8782_v2  }
 0x265   : > { %5206 = vset.pattern.permute.xlu1 %v8805_v21  ;;  %v6689_v39 = vpop.permute.xlu1 %2633 }
 0x266   : > { %3541 = vperm.xlu1 %5206, %v8782_v2   ;;  %v2648_v4 = vmul.f32 %v6731_v10, %v6689_v39 }
 0x268   : > { %3531 = vrot.lane.b32.xlu0 %v8793_v31, %s5335_s20 }
 0x269   : > { %5232 = vset.pattern.permute.xlu0 %v8806_v61  ;;  %v8811_v61 = vmov 6  }
 0x26a   : > { %3529 = vrot.lane.b32.xlu1 %v8790_v62, %s5335_s20  ;;  %v6705_v49 = vpop.permute.xlu1 %2705  ;;  %s8883_s20 = smov 95  }
 0x26b   : > { %5207 = vset.pattern.permute.xlu1 %v8807_v63  ;;  %v2720_v26 = vmul.f32 %v6750_v58, %v6705_v49 }
 0x26c   : > { %2510 = vrot.lane.b32.xlu0 %v2504_v15, %s5323_s12  ;;  %v6783_v15 = vpop.permute.xlu0 %2824 }
 0x26e   : > { %3577 = vperm.xlu1 %5207, %v8782_v2  }
 0x26f   : > { %v6715_v35 = vpop.permute.xlu1 %2741 }
 0x270   : > { %2546 = vrot.lane.b32.xlu0 %v2540_v44, %s5323_s12  ;;  %v2756_v28 = vmul.f32 %v6758_v24, %v6715_v35 }
 0x272   : > { %5208 = vset.pattern.permute.xlu1 %v8808_v25  ;;  %v8813_v25 = vmov 15  }
 0x273   : > { %3613 = vperm.xlu1 %5208, %v8782_v2   ;;  %v6725_v11 = vpop.permute.xlu1 %2776 }
 0x274   : > { %8809 = vst [vmem:[#allocation18_spill] sm:$0xff] %v6725_v11  ;;  %2582 = vrot.lane.b32.xlu0 %v2576_v54, %s5323_s12  ;;  %v2784_v13 = vmul.f32 0.0, %v6725_v11 }
 0x276   : > { %v2794_v57 = vrot.slane %v2784_v13, %v5517_v6  ;;  %v2830_v21 = vrot.slane %v2784_v13, %v5520_v7 }
 0x277   : > { %5209 = vset.pattern.permute.xlu1 %v8810_v9  ;;  %v6734_v42 = vpop.permute.xlu1 %2778  ;;  %v2902_v9 = vrot.slane %v2784_v13, %v5673_v47 }
 0x278   : > { %3649 = vperm.xlu1 %5209, %v8782_v2   ;;  %2618 = vrot.lane.b32.xlu0 %v2612_v17, %s5323_s12  ;;  %v2803_v34 = vmul.f32 %v2794_v57, %v6772_v59  ;;  %v2839_v63 = vmul.f32 %v2830_v21, %v6783_v15  ;;  %v3046_v21 = vrot.slane %v2784_v13, %v5680_v1 }
 0x27b   : > { %v6743_v23 = vpop.permute.xlu1 %2860 }
 0x27c   : > { %5210 = vset.pattern.permute.xlu1 %v5382_v52  ;;  %2654 = vrot.lane.b32.xlu0 %v2648_v4, %s5323_s12  ;;  %v2938_v4 = vrot.slane %v2784_v13, %v5632_v48 }
 0x27d   : > { %3685 = vperm.xlu1 %5210, %v8782_v2  }
 0x280   : > { %v6752_v32 = vpop.permute.xlu1 %2896  ;;  %2690 = vrot.lane.b32.xlu0 %v2684_v22, %s5323_s12 }
 0x281   : > { %5211 = vset.pattern.permute.xlu1 %v5383_v14  ;;  %v2911_v52 = vmul.f32 %v2902_v9, %v6752_v32  ;;  %v8816_v14 = vmov 24  }
 0x282   : > { %3721 = vperm.xlu1 %5211, %v8782_v2  }
 0x284   : > { %2726 = vrot.lane.b32.xlu0 %v2720_v26, %s5323_s12 }
 0x285   : > { %v6762_v41 = vpop.permute.xlu1 %2968 }
 0x286   : > { %5212 = vset.pattern.permute.xlu1 %v5384_v53 }
 0x287   : > { %3757 = vperm.xlu1 %5212, %v8782_v2  }
 0x288   : > { %2762 = vrot.lane.b32.xlu0 %v2756_v28, %s5323_s12  ;;  %v2974_v28 = vrot.slane %v2784_v13, %v5646_v55 }
 0x28a   : > { %v6769_v60 = vpop.permute.xlu1 %3004  ;;  %v2983_v57 = vmul.f32 %v2974_v28, %v6762_v41 }
 0x28b   : > { %5213 = vset.pattern.permute.xlu1 %v5385_v40  ;;  %v8818_v40 = vmov 33  }
 0x28c   : > { %3793 = vperm.xlu1 %5213, %v8782_v2   ;;  %3830 = vrot.lane.b32.xlu0 %v8787_v18, %s5330_s18  ;;  %v2866_v18 = vrot.slane %v2784_v13, %v5658_v3 }
 0x28e   : > { %v2875_v54 = vmul.f32 %v2866_v18, %v6743_v23 }
 0x28f   : > { %v6779_v43 = vpop.permute.xlu1 %3087 }
 0x290   : > { %5214 = vset.pattern.permute.xlu1 %v8811_v61  ;;  %2809 = vrot.lane.b32.xlu0 %v2803_v34, %s5355_s26  ;;  %v3010_v34 = vrot.slane %v2784_v13, %v5662_v12  ;;  %v5387_v13 = vmov 51  }
 0x291   : > { %3840 = vperm.xlu1 %5214, %v8782_v2  }
 0x292   : > { %v3019_v61 = vmul.f32 %v3010_v34, %v6769_v60 }
 0x293   : > { %v6787_v44 = vpop.permute.xlu1 %3075 }
 0x294   : > { %8812 = vst [vmem:[#allocation20_spill] sm:$0xff] %v6787_v44  ;;  %2845 = vrot.lane.b32.xlu0 %v2839_v63, %s5355_s26  ;;  %v3083_v63 = vmul.f32 0.0, %v6787_v44 }
 0x295   : > { %3828 = vrot.lane.b32.xlu1 %v8797_v38, %s5330_s18  ;;  %v6805_v38 = vpop.permute.xlu0 %2932  ;;  %s8863_s18 = smov 96  }
 0x296   : > { %5215 = vset.pattern.permute.xlu1 %v8813_v25  ;;  %v2947_v26 = vmul.f32 %v2938_v4, %v6805_v38  ;;  %v5386_v25 = vmov 42   ;;  %v3093_v4 = vrot.slane %v3083_v63, %v5517_v6  ;;  %v3165_v34 = vrot.slane %v3083_v63, %v5658_v3 }
 0x297   : > { %v6795_v17 = vpop.permute.xlu1 %3123  ;;  %v3273_v46 = vrot.slane %v3083_v63, %v5646_v55 }
 0x298   : > { %8814 = vst [vmem:[#allocation19_spill] sm:$0xff] %v6795_v17  ;;  %2881 = vrot.lane.b32.xlu0 %v2875_v54, %s5355_s26 }
 0x299   : > { %3876 = vperm.xlu1 %5215, %v8782_v2   ;;  %v6824_v54 = vpop.permute.xlu0 %3040 }
 0x29a   : > { %v3055_v9 = vmul.f32 %v3046_v21, %v6824_v54 }
 0x29c   : > { %v6802_v22 = vpop.permute.xlu1 %3195  ;;  %2917 = vrot.lane.b32.xlu0 %v2911_v52, %s5355_s26 }
 0x29d   : > { %8815 = vst [vmem:[#allocation26_spill] sm:$0xff] %v6802_v22  ;;  %5216 = vset.pattern.permute.xlu1 %v8816_v14  ;;  %v3129_v14 = vrot.slane %v3083_v63, %v5520_v7  ;;  %v6836_v28 = vpop.permute.xlu0 %3077 }
 0x29e   : > { %3912 = vperm.xlu1 %5216, %v8782_v2  }
 0x29f   : > { %v3138_v21 = vmul.f32 %v3129_v14, %v6795_v17 }
 0x2a0   : > { %2953 = vrot.lane.b32.xlu0 %v2947_v26, %s5355_s26  ;;  %v3102_v26 = vmul.f32 %v3093_v4, %v6779_v43  ;;  %v5389_v4 = vmov 69  }
 0x2a1   : > { %v6812_v53 = vpop.permute.xlu1 %3231 }
 0x2a2   : > { %8817 = vst [vmem:[#allocation23_spill] sm:$0xff] %v6812_v53  ;;  %5217 = vset.pattern.permute.xlu1 %v8818_v40  ;;  %v5388_v40 = vmov 60  }
 0x2a3   : > { %3948 = vperm.xlu1 %5217, %v8782_v2  }
 0x2a4   : > { %2989 = vrot.lane.b32.xlu0 %v2983_v57, %s5355_s26 }
 0x2a6   : > { %v6822_v18 = vpop.permute.xlu1 %3303 }
 0x2a7   : > { %8819 = vst [vmem:[#allocation28_spill] sm:$0xff] %v6822_v18  ;;  %5218 = vset.pattern.permute.xlu1 %v5386_v25  ;;  %v6852_v25 = vpop.permute.xlu0 %3159 }
 0x2a8   : > { %3984 = vperm.xlu1 %5218, %v8782_v2   ;;  %3025 = vrot.lane.b32.xlu0 %v3019_v61, %s5355_s26  ;;  %8824 = vst [vmem:[#allocation34_spill] sm:$0xff] %v6852_v25 }
 0x2ab   : > { %v6830_v52 = vpop.permute.xlu1 %2313 }
 0x2ac   : > { %8820 = vst [vmem:[#allocation30_spill] sm:$0xff] %v6830_v52  ;;  %5219 = vset.pattern.permute.xlu1 %v5387_v13  ;;  %3061 = vrot.lane.b32.xlu0 %v3055_v9, %s5355_s26  ;;  %v3174_v9 = vmul.f32 %v3165_v34, %v6852_v25  ;;  %v3201_v13 = vrot.slane %v3083_v63, %v5673_v47  ;;  %v6865_v34 = vpop.permute.xlu0 %3267  ;;  %v8833_v52 = vmov 34  }
 0x2ad   : > { %4020 = vperm.xlu1 %5219, %v8782_v2   ;;  %v6846_v2 = vld [vmem:[%s8511_s2] sm:$0xff]  ;;  %8827 = vst [vmem:[#allocation25_spill] sm:$0xff] %v6865_v34 }
 0x2b0   : > { %v6838_v57 = vpop.permute.xlu1 %3339  ;;  %3108 = vrot.lane.b32.xlu0 %v3102_v26, %s8822_s29  ;;  %v3210_v26 = vmul.f32 %v3201_v13, %v6802_v22  ;;  %v3282_v13 = vmul.f32 %v3273_v46, %v6865_v34 }
 0x2b1   : > { %8821 = vst [vmem:[#allocation22_spill] sm:$0xff] %v6838_v57  ;;  %5220 = vset.pattern.permute.xlu1 %v5388_v40  ;;  %v8826_v40 = vmov 7  }
 0x2b2   : > { %4056 = vperm.xlu1 %5220, %v6846_v2  }
 0x2b4   : > { %v6849_v61 = vpop.permute.xlu1 %2300  ;;  %3144 = vrot.lane.b32.xlu0 %v3138_v21, %s8822_s29  ;;  %v3237_v21 = vrot.slane %v3083_v63, %v5632_v48 }
 0x2b5   : > { %8823 = vst [vmem:[#allocation32_spill] sm:$0xff] %v6849_v61 }
 0x2b6   : > { %5221 = vset.pattern.permute.xlu1 %v5389_v4  ;;  %v3246_v61 = vmul.f32 %v3237_v21, %v6812_v53 }
 0x2b7   : > { %4092 = vperm.xlu1 %5221, %v6846_v2  }
 0x2b8   : > { %v6857_v14 = vpop.permute.xlu1 %2357  ;;  %3180 = vrot.lane.b32.xlu0 %v3174_v9, %s8822_s29  ;;  %v6873_v9 = vpop.permute.xlu0 %2335 }
 0x2b9   : > { %8825 = vst [vmem:[#allocation24_spill] sm:$0xff] %v6857_v14  ;;  %v8829_v14 = vmov 16   ;;  %8830 = vst [vmem:[#allocation27_spill] sm:$0xff] %v6873_v9  ;;  %v3345_v9 = vrot.slane %v3083_v63, %v5680_v1 }
 0x2bb   : > { %5222 = vset.pattern.permute.xlu1 %v8826_v40  ;;  %v3354_v46 = vmul.f32 %v3345_v9, %v6838_v57 }
 0x2bc   : > { %4128 = vperm.xlu1 %5222, %v6846_v2   ;;  %3216 = vrot.lane.b32.xlu0 %v3210_v26, %s8822_s29  ;;  %v3309_v26 = vrot.slane %v3083_v63, %v5662_v12 }
 0x2bd   : > { %v6867_v4 = vpop.permute.xlu1 %2379 }
 0x2be   : > { %8828 = vst [vmem:[#allocation33_spill] sm:$0xff] %v6867_v4  ;;  %v8831_v4 = vmov 25   ;;  %v3318_v21 = vmul.f32 %v3309_v26, %v6822_v18 }
 0x2c0   : > { %5223 = vset.pattern.permute.xlu1 %v8829_v14  ;;  %3252 = vrot.lane.b32.xlu0 %v3246_v61, %s8822_s29  ;;  %v6884_v14 = vpop.permute.xlu0 %2302 }
 0x2c1   : > { %4164 = vperm.xlu1 %5223, %v6846_v2   ;;  %8832 = vst [vmem:[#allocation29_spill] sm:$0xff] %v6884_v14  ;;  %v8839_v14 = vmov 8  }
 0x2c2   : > { %v6877_v40 = vpop.permute.xlu1 %3394 }
 0x2c4   : > { %3288 = vrot.lane.b32.xlu0 %v3282_v13, %s8822_s29  ;;  %v6892_v44 = vpop.permute.xlu0 %3375  ;;  %v5390_v13 = vmov 43  }
 0x2c5   : > { %5224 = vset.pattern.permute.xlu1 %v8831_v4 }
 0x2c6   : > { %4200 = vperm.xlu1 %5224, %v6846_v2  }
 0x2c7   : > { %v6886_v61 = vpop.permute.xlu1 %3413 }
 0x2c8   : > { %3324 = vrot.lane.b32.xlu0 %v3318_v21, %s8822_s29  ;;  %v6901_v63 = vpop.permute.xlu0 %2401 }
 0x2c9   : > { %8835 = vst [vmem:[#allocation36_spill] sm:$0xff] %v6901_v63 }
 0x2ca   : > { %5225 = vset.pattern.permute.xlu1 %v8833_v52  ;;  %v5391_v52 = vmov 52  }
 0x2cb   : > { %4236 = vperm.xlu1 %5225, %v6846_v2  }
 0x2cc   : > { %v6895_v4 = vpop.permute.xlu1 %2423  ;;  %3360 = vrot.lane.b32.xlu0 %v3354_v46, %s8822_s29  ;;  %v8837_v46 = vmov 35  }
 0x2cd   : > { %8834 = vst [vmem:[#allocation31_spill] sm:$0xff] %v6895_v4  ;;  %v5394_v4 = vmov 70  }
 0x2cf   : > { %5226 = vset.pattern.permute.xlu1 %v5390_v13  ;;  %v5392_v13 = vmov 61  }
 0x2d0   : > { %4272 = vperm.xlu1 %5226, %v6846_v2   ;;  %4417 = vrot.lane.b32.xlu0 %v8793_v31, %s5350_s25 }
 0x2d1   : > { %v6903_v9 = vpop.permute.xlu1 %2445  ;;  %v6906_v26 = vpop.xlane.xlu0 %2216 }
 0x2d2   : > { %8836 = vst [vmem:[#allocation35_spill] sm:$0xff] %v6903_v9 }
 0x2d4   : > { %5227 = vset.pattern.permute.xlu1 %v5391_v52  ;;  %4499 = vperm.xlu0 %5232, %v6846_v2   ;;  %v5393_v52 = vmov 44  }
 0x2d5   : > { %4308 = vperm.xlu1 %5227, %v6846_v2  }
 0x2d6   : > { %v6909_v21 = vpop.permute.xlu1 %3451 }
 0x2d8   : > { %5233 = vset.pattern.permute.xlu0 %v8837_v46 }
 0x2d9   : > { %5228 = vset.pattern.permute.xlu1 %v5392_v13  ;;  %4535 = vperm.xlu0 %5233, %v6846_v2   ;;  %v6913_v31 = vpop.permute.xlu0 %3432  ;;  %v5395_v13 = vmov 53  }
 0x2da   : > { %4344 = vperm.xlu1 %5228, %v6846_v2  }
 0x2db   : > { %v6916_v9 = vpop.permute.xlu1 %3470 }
 0x2dd   : > { %5234 = vset.pattern.permute.xlu0 %v5393_v52 }
 0x2de   : > { %5229 = vset.pattern.permute.xlu1 %v5394_v4  ;;  %4571 = vperm.xlu0 %5234, %v6846_v2   ;;  %v6919_v63 = vpop.permute.xlu0 %2467  ;;  %v5396_v4 = vmov 62  }
 0x2df   : > { %8838 = vst [vmem:[#allocation37_spill] sm:$0xff] %v6919_v63  ;;  %4380 = vperm.xlu1 %5229, %v6846_v2  }
 0x2e0   : > { %v6922_v46 = vpop.permute.xlu1 %3489 }
 0x2e2   : > { %5235 = vset.pattern.permute.xlu0 %v5395_v13  ;;  %v8843_v13 = vmov 17  }
 0x2e3   : > { %5230 = vset.pattern.permute.xlu1 %v8839_v14  ;;  %4607 = vperm.xlu0 %5235, %v6846_v2   ;;  %v6926_v57 = vpop.permute.xlu0 %3508 }
 0x2e4   : > { %4427 = vperm.xlu1 %5230, %v6846_v2  }
 0x2e5   : > { %v6929_v52 = vpop.permute.xlu1 %3541 }
 0x2e6   : > { %8840 = vst [vmem:[#allocation21_spill] sm:$0xff] %v6929_v52 }
 0x2e7   : > { %5236 = vset.pattern.permute.xlu0 %v5396_v4  ;;  %v6931_v18 = vpop.permute.xlu0 %3531  ;;  %v5397_v4 = vmov 71  }
 0x2e8   : > { %8841 = vst [vmem:[#allocation9_spill] sm:$0xff] %v6931_v18  ;;  %v3539_v63 = vmul.f32 0.0, %v6931_v18  ;;  %4415 = vrot.lane.b32.xlu1 %v8790_v62, %s5350_s25  ;;  %4643 = vperm.xlu0 %5236, %v6846_v2  }
 0x2e9   : > { %v6937_v14 = vpop.permute.xlu1 %3529  ;;  %5231 = vset.pattern.permute.xlu1 %v8843_v13  ;;  %v363_v13 = vld [vmem:[%s8513_s4] sm:$0xff] }
 0x2ea   : > { %8842 = vst [vmem:[#allocation6_spill] sm:$0xff] %v6937_v14  ;;  %v3591_v34 = vrot.slane %v3539_v63, %v5520_v7 }
 0x2eb   : > { %v6941_v53 = vpop.permute.xlu0 %2510 }
 0x2ec   : > { %8844 = vst [vmem:[#allocation7_spill] sm:$0xff] %v6941_v53  ;;  %4463 = vperm.xlu1 %5231, %v6846_v2   ;;  %5237 = vset.pattern.permute.xlu0 %v5397_v4  ;;  %v3555_v53 = vrot.slane %v3539_v63, %v5517_v6 }
 0x2ed   : > { %v6944_v22 = vpop.permute.xlu1 %3577  ;;  %4679 = vperm.xlu0 %5237, %v6846_v2  }
 0x2ee   : > { %8845 = vst [vmem:[#allocation8_spill] sm:$0xff] %v6944_v22  ;;  %v3594_v62 = vmul.f32 %v3591_v34, %v6944_v22  ;;  %v3627_v34 = vrot.slane %v3539_v63, %v5658_v3  ;;  %v3663_v22 = vrot.slane %v3539_v63, %v5673_v47 }
 0x2ef   : > { %v6948_v18 = vpop.permute.xlu0 %2546 }
 0x2f0   : > { %8846 = vst [vmem:[#allocation38_spill] sm:$0xff] %v6948_v18  ;;  %3602 = vrot.lane.b32.xlu1 %v3594_v62, %s8847_s27  ;;  %v3558_v18 = vmul.f32 %v3555_v53, %v6929_v52  ;;  %v3735_v52 = vrot.slane %v3539_v63, %v5646_v55 }
 0x2f1   : > { %5238 = vset.pattern.permute.xlu0 %v8800_v37  ;;  %5241 = vset.pattern.permute.xlu1 %v8796_v16 }
 0x2f2   : > { %v6957_v4 = vpop.permute.xlu1 %3613  ;;  %2261 = vperm.xlu0 %5238, %v363_v13   ;;  %v3699_v13 = vrot.slane %v3539_v63, %v5632_v48 }
 0x2f3   : > { %8848 = vst [vmem:[#allocation39_spill] sm:$0xff] %v6957_v4  ;;  %v6959_v2 = vpop.permute.xlu0 %2582  ;;  %v3630_v37 = vmul.f32 %v3627_v34, %v6957_v4 }
 0x2f4   : > { %8849 = vst [vmem:[#allocation40_spill] sm:$0xff] %v6959_v2 }
 0x2f6   : > { %3566 = vrot.lane.b32.xlu0 %v3558_v18, %s8847_s27 }
 0x2f7   : > { %v6965_v62 = vpop.permute.xlu1 %3649  ;;  %v6967_v14 = vpop.permute.xlu0 %2618 }
 0x2f8   : > { %8850 = vst [vmem:[#allocation41_spill] sm:$0xff] %v6965_v62  ;;  %8851 = vst [vmem:[#allocation42_spill] sm:$0xff] %v6967_v14  ;;  %v3666_v16 = vmul.f32 %v3663_v22, %v6965_v62 }
 0x2fa   : > { %3674 = vrot.lane.b32.xlu1 %v3666_v16, %s8847_s27  ;;  %3638 = vrot.lane.b32.xlu0 %v3630_v37, %s8847_s27  ;;  %v3771_v16 = vrot.slane %v3539_v63, %v5662_v12 }
 0x2fb   : > { %v6974_v2 = vpop.permute.xlu0 %2654 }
 0x2fc   : > { %8852 = vst [vmem:[#allocation43_spill] sm:$0xff] %v6974_v2  ;;  %v6976_v53 = vpop.permute.xlu1 %3685 }
 0x2fd   : > { %8853 = vst [vmem:[#allocation44_spill] sm:$0xff] %v6976_v53  ;;  %v3702_v18 = vmul.f32 %v3699_v13, %v6976_v53 }
 0x2ff   : > { %3710 = vrot.lane.b32.xlu0 %v3702_v18, %s8847_s27  ;;  %v6981_v14 = vpop.permute.xlu0 %2690  ;;  %v3807_v18 = vrot.slane %v3539_v63, %v5680_v1  ;;  %v2218_v63 = vrot.slane %v6906_v26, 4 }
 0x300   : > { %8854 = vst [vmem:[#allocation45_spill] sm:$0xff] %v6981_v14 }
 0x301   : > { %v6983_v34 = vpop.permute.xlu1 %3721 }
 0x302   : > { %8855 = vst [vmem:[#allocation46_spill] sm:$0xff] %v6983_v34  ;;  %v3738_v22 = vmul.f32 %v3735_v52, %v6983_v34 }
 0x303   : > { %v6986_v62 = vpop.permute.xlu0 %2726 }
 0x304   : > { %8856 = vst [vmem:[#allocation47_spill] sm:$0xff] %v6986_v62  ;;  %3746 = vrot.lane.b32.xlu1 %v3738_v22, %s8847_s27 }
 0x306   : > { %v6990_v37 = vpop.permute.xlu1 %3757 }
 0x307   : > { %8857 = vst [vmem:[#allocation48_spill] sm:$0xff] %v6990_v37  ;;  %v3774_v13 = vmul.f32 %v3771_v16, %v6990_v37  ;;  %v6993_v2 = vpop.permute.xlu0 %2762 }
 0x308   : > { %8858 = vst [vmem:[#allocation49_spill] sm:$0xff] %v6993_v2 }
 0x309   : > { %3782 = vrot.lane.b32.xlu0 %v3774_v13, %s8847_s27 }
 0x30b   : > { %v6997_v14 = vpop.permute.xlu1 %3793  ;;  %v6999_v53 = vpop.permute.xlu0 %3830 }
 0x30c   : > { %8859 = vst [vmem:[#allocation50_spill] sm:$0xff] %v6997_v14  ;;  %8860 = vst [vmem:[#allocation51_spill] sm:$0xff] %v6999_v53  ;;  %v3810_v52 = vmul.f32 %v3807_v18, %v6997_v14  ;;  %v7003_v22 = vmul.f32 0.0, %v6999_v53  ;;  %v2219_v14 = vadd.f32 %v2218_v63, %v6906_v26 }
 0x30e   : > { %3818 = vrot.lane.b32.xlu1 %v3810_v52, %s8847_s27  ;;  %v3854_v16 = vrot.slane %v7003_v22, %v5517_v6  ;;  %v3890_v52 = vrot.slane %v7003_v22, %v5520_v7  ;;  %v2220_v34 = vrot.slane %v2219_v14, 2 }
 0x30f   : > { %v7008_v62 = vpop.permute.xlu0 %2809 }
 0x310   : > { %8861 = vst [vmem:[#allocation52_spill] sm:$0xff] %v7008_v62  ;;  %v7010_v2 = vpop.permute.xlu1 %3840 }
 0x311   : > { %8862 = vst [vmem:[#allocation53_spill] sm:$0xff] %v7010_v2  ;;  %v3857_v13 = vmul.f32 %v3854_v16, %v7010_v2  ;;  %v3926_v16 = vrot.slane %v7003_v22, %v5658_v3 }
 0x313   : > { %3865 = vrot.lane.b32.xlu0 %v3857_v13, %s8863_s18  ;;  %v7015_v37 = vpop.permute.xlu0 %2845 }
 0x314   : > { %8864 = vst [vmem:[#allocation54_spill] sm:$0xff] %v7015_v37  ;;  %v7017_v18 = vpop.permute.xlu1 %3828  ;;  %v2221_v37 = vadd.f32 %v2220_v34, %v2219_v14  ;;  %v3998_v14 = vrot.slane %v7003_v22, %v5632_v48 }
 0x315   : > { %8865 = vst [vmem:[#allocation55_spill] sm:$0xff] %v7017_v18 }
 0x317   : > { %v7022_v53 = vpop.permute.xlu0 %2881 }
 0x318   : > { %8866 = vst [vmem:[#allocation56_spill] sm:$0xff] %v7022_v53  ;;  %v7024_v62 = vpop.permute.xlu1 %3876  ;;  %v3962_v53 = vrot.slane %v7003_v22, %v5673_v47 }
 0x319   : > { %8867 = vst [vmem:[#allocation57_spill] sm:$0xff] %v7024_v62  ;;  %v3893_v4 = vmul.f32 %v3890_v52, %v7024_v62  ;;  %v2222_v52 = vrot.slane %v2221_v37, 1 }
 0x31b   : > { %3901 = vrot.lane.b32.xlu1 %v3893_v4, %s8863_s18  ;;  %v7030_v13 = vpop.permute.xlu0 %2917 }
 0x31c   : > { %8868 = vst [vmem:[#allocation58_spill] sm:$0xff] %v7030_v13  ;;  %v2223_v13 = vadd.f32 %v2222_v52, %v2221_v37 }
 0x31d   : > { %v7032_v2 = vpop.permute.xlu1 %3912 }
 0x31e   : > { %8869 = vst [vmem:[#allocation59_spill] sm:$0xff] %v7032_v2  ;;  %v3929_v26 = vmul.f32 %v3926_v16, %v7032_v2 }
 0x31f   : > { %v7035_v63 = vpop.permute.xlu0 %2953 }
 0x320   : > { %8870 = vst [vmem:[#allocation60_spill] sm:$0xff] %v7035_v63  ;;  %3937 = vrot.lane.b32.xlu0 %v3929_v26, %s8863_s18  ;;  %v2224_v26 = vmul.f32 0.00048828125, %v2223_v13  ;;  %v4070_v13 = vrot.slane %v7003_v22, %v5662_v12 }
 0x322   : > { %v7040_v62 = vpop.permute.xlu1 %3948  ;;  %v7062_v52 = vsub.f32 %v6599_v56, %v2224_v26 }
 0x323   : > { %8871 = vst [vmem:[#allocation61_spill] sm:$0xff] %v7040_v62  ;;  %v3965_v18 = vmul.f32 %v3962_v53, %v7040_v62  ;;  %v7043_v4 = vpop.permute.xlu0 %2989  ;;  %v4034_v53 = vrot.slane %v7003_v22, %v5646_v55 }
 0x324   : > { %8872 = vst [vmem:[#allocation62_spill] sm:$0xff] %v7043_v4 }
 0x325   : > { %3973 = vrot.lane.b32.xlu1 %v3965_v18, %s8863_s18 }
 0x327   : > { %v7048_v34 = vpop.permute.xlu1 %3984  ;;  %v7050_v16 = vpop.permute.xlu0 %3025 }
 0x328   : > { %8873 = vst [vmem:[#allocation63_spill] sm:$0xff] %v7048_v34  ;;  %8874 = vst [vmem:[#allocation64_spill] sm:$0xff] %v7050_v16  ;;  %v4001_v63 = vmul.f32 %v3998_v14, %v7048_v34  ;;  %v2228_v14 = vmul.f32 %v7062_v52, %v7062_v52 }
 0x32a   : > { %4009 = vrot.lane.b32.xlu0 %v4001_v63, %s8863_s18 }
 0x32b   : > { %v7054_v2 = vpop.permute.xlu0 %3061 }
 0x32c   : > { %8875 = vst [vmem:[#allocation65_spill] sm:$0xff] %v7054_v2  ;;  %v7058_v37 = vpop.permute.xlu1 %4020  ;;  %v7074_v2 = vsub.f32 %v6591_v51, %v2224_v26 }
 0x32d   : > { %8876 = vst [vmem:[#allocation66_spill] sm:$0xff] %v7058_v37  ;;  %v4037_v18 = vmul.f32 %v4034_v53, %v7058_v37 }
 0x32f   : > { %4045 = vrot.lane.b32.xlu1 %v4037_v18, %s8863_s18  ;;  %v7065_v16 = vpop.permute.xlu0 %3108  ;;  %v2229_v18 = vmul.f32 %v7074_v2, %v7074_v2 }
 0x330   : > { %8877 = vst [vmem:[#allocation67_spill] sm:$0xff] %v7065_v16  ;;  %v7084_v16 = vsub.f32 %v6593_v27, %v2224_v26 }
 0x331   : > { %v7069_v63 = vpop.permute.xlu1 %4056 }
 0x332   : > { %8878 = vst [vmem:[#allocation68_spill] sm:$0xff] %v7069_v63  ;;  %v4073_v53 = vmul.f32 %v4070_v13, %v7069_v63  ;;  %v2230_v13 = vmul.f32 %v7084_v16, %v7084_v16 }
 0x333   : > { %2234 = vrot.lane.b32.xlu1 %v2228_v14, %s5350_s25  ;;  %v7078_v56 = vpop.permute.xlu0 %3144  ;;  %v4106_v14 = vrot.slane %v7003_v22, %v5680_v1 }
 0x334   : > { %8879 = vst [vmem:[#allocation69_spill] sm:$0xff] %v7078_v56  ;;  %4081 = vrot.lane.b32.xlu0 %v4073_v53, %s8863_s18 }
 0x336   : > { %v7086_v4 = vpop.permute.xlu1 %4092 }
 0x337   : > { %8880 = vst [vmem:[#allocation70_spill] sm:$0xff] %v7086_v4  ;;  %2236 = vrot.lane.b32.xlu1 %v2229_v18, %s5350_s25  ;;  %v7089_v51 = vpop.permute.xlu0 %3180  ;;  %v4109_v26 = vmul.f32 %v4106_v14, %v7086_v4 }
 0x338   : > { %8881 = vst [vmem:[#allocation71_spill] sm:$0xff] %v7089_v51 }
 0x33b   : > { %2238 = vrot.lane.b32.xlu1 %v2230_v13, %s5350_s25  ;;  %v7096_v53 = vpop.permute.xlu0 %3216  ;;  %v7098_v56 = vpop.permute.xlu1 %4128 }
 0x33c   : > { %8882 = vst [vmem:[#allocation72_spill] sm:$0xff] %v7096_v53  ;;  %v4145_v27 = vmul.f32 %v7098_v56, %v6692_v50 }
 0x33e   : > { %4153 = vrot.lane.b32.xlu0 %v4145_v27, %s8883_s20 }
 0x33f   : > { %4117 = vrot.lane.b32.xlu1 %v4109_v26, %s8863_s18  ;;  %v7105_v18 = vpop.permute.xlu0 %3252 }
 0x340   : > { %8884 = vst [vmem:[#allocation73_spill] sm:$0xff] %v7105_v18  ;;  %v7107_v51 = vpop.permute.xlu1 %4164 }
 0x341   : > { %v4181_v22 = vmul.f32 %v7107_v51, %v6701_v29 }
 0x343   : > { %v7111_v13 = vpop.permute.xlu0 %3288  ;;  %4189 = vrot.lane.b32.xlu1 %v4181_v22, %s8883_s20 }
 0x344   : > { %8885 = vst [vmem:[#allocation74_spill] sm:$0xff] %v7111_v13 }
 0x345   : > { %v7114_v53 = vpop.permute.xlu1 %4200 }
 0x346   : > { %v4217_v50 = vmul.f32 %v7114_v53, %v6710_v19 }
 0x347   : > { %v7118_v14 = vpop.permute.xlu0 %3324 }
 0x348   : > { %8886 = vst [vmem:[#allocation75_spill] sm:$0xff] %v7118_v14  ;;  %4225 = vrot.lane.b32.xlu0 %v4217_v50, %s8883_s20 }
 0x34a   : > { %v7121_v27 = vpop.permute.xlu1 %4236 }
 0x34b   : > { %v7123_v26 = vpop.permute.xlu0 %3360  ;;  %v4253_v29 = vmul.f32 %v7121_v27, %v6721_v5 }
 0x34c   : > { %8887 = vst [vmem:[#allocation76_spill] sm:$0xff] %v7123_v26 }
 0x34d   : > { %4261 = vrot.lane.b32.xlu1 %v4253_v29, %s8883_s20 }
 0x34f   : > { %v7128_v13 = vpop.permute.xlu1 %4272  ;;  %v7130_v22 = vpop.permute.xlu0 %4417 }
 0x350   : > { %8888 = vst [vmem:[#allocation77_spill] sm:$0xff] %v7130_v22  ;;  %v4289_v19 = vmul.f32 %v7128_v13, %v6731_v10  ;;  %v7149_v10 = vmul.f32 0.0, %v7130_v22 }
 0x352   : > { %4297 = vrot.lane.b32.xlu0 %v4289_v19, %s8883_s20  ;;  %8891 = vst [vmem:[#allocation80_spill] sm:$0xff] %v7149_v10  ;;  %v4585_v37 = vrot.slane %v7149_v10, %v5632_v48  ;;  %v4549_v62 = vrot.slane %v7149_v10, %v5673_v47 }
 0x353   : > { %v7139_v26 = vpop.permute.xlu0 %4499 }
 0x354   : > { %v7135_v14 = vpop.permute.xlu1 %4308  ;;  %8889 = vst [vmem:[#allocation78_spill] sm:$0xff] %v7139_v26 }
 0x355   : > { %v4325_v50 = vmul.f32 %v7135_v14, %v6739_v20 }
 0x357   : > { %4333 = vrot.lane.b32.xlu1 %v4325_v50, %s8883_s20  ;;  %v4441_v50 = vrot.slane %v7149_v10, %v5517_v6 }
 0x358   : > { %v7146_v18 = vpop.permute.xlu0 %4535 }
 0x359   : > { %v7142_v5 = vpop.permute.xlu1 %4344  ;;  %8890 = vst [vmem:[#allocation79_spill] sm:$0xff] %v7146_v18 }
 0x35a   : > { %v4361_v29 = vmul.f32 %v7142_v5, %v6750_v58  ;;  %v4513_v58 = vrot.slane %v7149_v10, %v5658_v3 }
 0x35c   : > { %4369 = vrot.lane.b32.xlu0 %v4361_v29, %s8883_s20  ;;  %v4516_v29 = vmul.f32 %v4513_v58, %v7139_v26 }
 0x35d   : > { %v7158_v4 = vpop.permute.xlu0 %4571 }
 0x35e   : > { %v7152_v19 = vpop.permute.xlu1 %4380  ;;  %8892 = vst [vmem:[#allocation81_spill] sm:$0xff] %v7158_v4  ;;  %v4588_v25 = vmul.f32 %v4585_v37, %v7158_v4  ;;  %v4621_v37 = vrot.slane %v7149_v10, %v5646_v55 }
 0x35f   : > { %v4397_v20 = vmul.f32 %v7152_v19, %v6758_v24 }
 0x361   : > { %4405 = vrot.lane.b32.xlu1 %v4397_v20, %s8883_s20  ;;  %v4477_v20 = vrot.slane %v7149_v10, %v5520_v7 }
 0x362   : > { %v7170_v24 = vpop.permute.xlu0 %4607 }
 0x363   : > { %v7163_v63 = vpop.permute.xlu1 %4427  ;;  %8894 = vst [vmem:[#allocation83_spill] sm:$0xff] %v7170_v24 }
 0x364   : > { %8893 = vst [vmem:[#allocation82_spill] sm:$0xff] %v7163_v63  ;;  %v4444_v22 = vmul.f32 %v4441_v50, %v7163_v63  ;;  %v4657_v50 = vrot.slane %v7149_v10, %v5662_v12  ;;  %v4552_v63 = vmul.f32 %v4549_v62, %v7146_v18 }
 0x366   : > { %4452 = vrot.lane.b32.xlu0 %v4444_v22, %s5360_s30 }
 0x367   : > { %v7172_v34 = vpop.permute.xlu1 %4415  ;;  %v7185_v26 = vpop.permute.xlu0 %4643 }
 0x368   : > { %8895 = vst [vmem:[#allocation84_spill] sm:$0xff] %v7172_v34  ;;  %8897 = vst [vmem:[#allocation86_spill] sm:$0xff] %v7185_v26  ;;  %v4660_v34 = vmul.f32 %v4657_v50, %v7185_v26 }
 0x36a   : > { %4524 = vrot.lane.b32.xlu0 %v4516_v29, %s5360_s30  ;;  %v4624_v29 = vmul.f32 %v4621_v37, %v7170_v24 }
 0x36b   : > { %v7182_v58 = vpop.permute.xlu1 %4463 }
 0x36c   : > { %8896 = vst [vmem:[#allocation85_spill] sm:$0xff] %v7182_v58  ;;  %v4480_v22 = vmul.f32 %v4477_v20, %v7182_v58 }
 0x36e   : > { %4488 = vrot.lane.b32.xlu1 %v4480_v22, %s5360_s30  ;;  %4596 = vrot.lane.b32.xlu0 %v4588_v25, %s5360_s30 }
 0x36f   : > { %v7197_v20 = vpop.permute.xlu1 %3602 }
 0x370   : > { %8898 = vst [vmem:[#allocation87_spill] sm:$0xff] %v7197_v20 }
 0x372   : > { %4560 = vrot.lane.b32.xlu1 %v4552_v63, %s5360_s30  ;;  %4668 = vrot.lane.b32.xlu0 %v4660_v34, %s5360_s30 }
 0x373   : > { %v7199_v62 = vpop.permute.xlu1 %3674 }
 0x374   : > { %8899 = vst [vmem:[#allocation88_spill] sm:$0xff] %v7199_v62 }
 0x376   : > { %4632 = vrot.lane.b32.xlu1 %v4624_v29, %s5360_s30 }
 0x377   : > { %v7201_v50 = vpop.permute.xlu1 %3746 }
 0x378   : > { %8900 = vst [vmem:[#allocation89_spill] sm:$0xff] %v7201_v50 }
 0x380   : > { %v7203_v22 = vpop.permute.xlu1 %3818 }
 0x381   : > { %8901 = vst [vmem:[#allocation90_spill] sm:$0xff] %v7203_v22 }
 0x38d   : > { %v7205_v25 = vpop.permute.xlu1 %3901 }
 0x38e   : > { %8902 = vst [vmem:[#allocation91_spill] sm:$0xff] %v7205_v25 }
 0x397   : > { %v7207_v26 = vpop.permute.xlu1 %3973 }
 0x398   : > { %8903 = vst [vmem:[#allocation92_spill] sm:$0xff] %v7207_v26 }
 0x3a1   : > { %v7209_v10 = vpop.permute.xlu1 %4045 }
 0x3a2   : > { %8904 = vst [vmem:[#allocation93_spill] sm:$0xff] %v7209_v10 }
 0x3a5   : > { %v2235_v63 = vpop.permute.xlu1 %2234 }
 0x3a9   : > { %v2237_v34 = vpop.permute.xlu1 %2236 }
 0x3aa   : > { %v2240_v37 = vsel %vm1989_vm4, %v2235_v63, %v2237_v34 }
 0x3ad   : > { %v2239_v4 = vpop.permute.xlu1 %2238 }
 0x3ae   : > { %v2241_v29 = vsel %vm1989_vm4, %v2237_v34, %v2239_v4 }
 0x3af   : > { %v2244_v20 = vadd.f32 %v2241_v29, %v2240_v37 }
 0x3b1   : > { %2245 = vadd.xlane.f32.xlu1 %v2244_v20  ;;  %v7213_v62 = vpop.permute.xlu1 %4117 }
 0x3b2   : > { %8905 = vst [vmem:[#allocation94_spill] sm:$0xff] %v7213_v62 }
 0x3b5   : > { %v7215_v50 = vpop.permute.xlu1 %4189 }
 0x3b6   : > { %8906 = vst [vmem:[#allocation95_spill] sm:$0xff] %v7215_v50 }
 0x3bf   : > { %v7217_v22 = vpop.permute.xlu1 %4261 }
 0x3c0   : > { %8907 = vst [vmem:[#allocation96_spill] sm:$0xff] %v7217_v22  ;;  %v7229_v22 = vpop.permute.xlu0 %4679 }
 0x3c9   : > { %v7219_v25 = vpop.permute.xlu1 %4333 }
 0x3ca   : > { %8908 = vst [vmem:[#allocation97_spill] sm:$0xff] %v7219_v25 }
 0x3d3   : > { %v7221_v26 = vpop.permute.xlu1 %4405 }
 0x3d4   : > { %8909 = vst [vmem:[#allocation98_spill] sm:$0xff] %v7221_v26 }
 0x3e0   : > { %v7223_v10 = vpop.permute.xlu1 %4488 }
 0x3e1   : > { %8910 = vst [vmem:[#allocation99_spill] sm:$0xff] %v7223_v10 }
 0x3e4   : > { %v7225_v24 = vpop.permute.xlu1 %4560 }
 0x3e5   : > { %8911 = vst [vmem:[#allocation100_spill] sm:$0xff] %v7225_v24 }
 0x3e8   : > { %v7227_v18 = vpop.permute.xlu1 %4632 }
 0x3e9   : > { %8912 = vst [vmem:[#allocation101_spill] sm:$0xff] %v7227_v18  ;;  %v2262_v18 = vpop.permute.xlu0 %2261 }
 0x43e   : > { %v2246_v63 = vpop.xlane.xlu1 %2245 }
 0x43f   : > { %v2247_v4 = vrot.slane %v2246_v63, 4 }
 0x441   : > { %v2248_v34 = vadd.f32 %v2247_v4, %v2246_v63 }
 0x443   : > { %v2249_v20 = vrot.slane %v2248_v34, 2 }
 0x445   : > { %v2250_v37 = vadd.f32 %v2249_v20, %v2248_v34 }
 0x447   : > { %v2251_v29 = vrot.slane %v2250_v37, 1 }
 0x449   : > { %v2252_v62 = vadd.f32 %v2251_v29, %v2250_v37 }
 0x44b   : > { %v2253_v50 = vmul.f32 0.00048828125, %v2252_v62 }
 0x44d   : > { %v2254_v58 = vadd.f32 1e-05, %v2253_v50 }
 0x44f   : > { %5244 = vrsqrt.f32 %v2254_v58 }
 0x459   : > { %v5245_v25 = vpop.eup %5244 }
 0x45a   : > { %v2257_v26 = vmul.f32 %v5245_v25, %v7074_v2  ;;  %v2256_v10 = vmul.f32 %v5245_v25, %v7062_v52  ;;  %v2258_v24 = vmul.f32 %v5245_v25, %v7084_v16  ;;  %v7240_v16 = vpop.permute.xlu0 %3566 }
 0x45b   : > { %8913 = vst [vmem:[#allocation102_spill] sm:$0xff] %v7240_v16 }
 0x45c   : > { %v2265_v17 = vmul.f32 %v2262_v18, %v2257_v26  ;;  %v2264_v11 = vmul.f32 %v2262_v18, %v2256_v10  ;;  %v2266_v63 = vmul.f32 %v2262_v18, %v2258_v24 }
 0x45e   : > { %v2273_v4 = vadd.f32 %v6673_v33, %v2265_v17  ;;  %v2272_v34 = vadd.f32 %v6673_v33, %v2264_v11  ;;  %v2274_v58 = vadd.f32 %v6673_v33, %v2266_v63  ;;  %v7242_v52 = vpop.permute.xlu0 %3638 }
 0x45f   : > { %8914 = vst [vmem:[#allocation103_spill] sm:$0xff] %v7242_v52 }
 0x460   : > { %v2276_v62 = vmax.f32 %v2273_v4, 0.0  ;;  %v2275_v50 = vmax.f32 %v2272_v34, 0.0  ;;  %v2277_v2 = vmax.f32 %v2274_v58, 0.0 }
 0x462   : > { %2287 = vrot.lane.b32.xlu0 %v2276_v62, %s5350_s25  ;;  %2285 = vrot.lane.b32.xlu1 %v2275_v50, %s5350_s25  ;;  %v7244_v18 = vpop.permute.xlu0 %3710 }
 0x463   : > { %8915 = vst [vmem:[#allocation104_spill] sm:$0xff] %v7244_v18 }
 0x466   : > { %2289 = vrot.lane.b32.xlu1 %v2277_v2, %s5350_s25  ;;  %v7246_v17 = vpop.permute.xlu0 %3782 }
 0x467   : > { %8916 = vst [vmem:[#allocation105_spill] sm:$0xff] %v7246_v17 }
 0x46a   : > { %v7248_v11 = vpop.permute.xlu0 %3865 }
 0x46b   : > { %8917 = vst [vmem:[#allocation106_spill] sm:$0xff] %v7248_v11 }
 0x46e   : > { %v7250_v26 = vpop.permute.xlu0 %3937 }
 0x46f   : > { %8918 = vst [vmem:[#allocation107_spill] sm:$0xff] %v7250_v26 }
 0x472   : > { %v7252_v33 = vpop.permute.xlu0 %4009 }
 0x473   : > { %8919 = vst [vmem:[#allocation108_spill] sm:$0xff] %v7252_v33 }
 0x476   : > { %v7254_v10 = vpop.permute.xlu0 %4081 }
 0x477   : > { %8920 = vst [vmem:[#allocation109_spill] sm:$0xff] %v7254_v10 }
 0x47a   : > { %v7256_v24 = vpop.permute.xlu0 %4153 }
 0x47b   : > { %8921 = vst [vmem:[#allocation110_spill] sm:$0xff] %v7256_v24 }
 0x47e   : > { %v7258_v25 = vpop.permute.xlu0 %4225 }
 0x47f   : > { %8922 = vst [vmem:[#allocation111_spill] sm:$0xff] %v7258_v25 }
 0x482   : > { %v7260_v20 = vpop.permute.xlu0 %4297 }
 0x483   : > { %8923 = vst [vmem:[#allocation112_spill] sm:$0xff] %v7260_v20 }
 0x486   : > { %v7262_v37 = vpop.permute.xlu0 %4369 }
 0x487   : > { %8924 = vst [vmem:[#allocation113_spill] sm:$0xff] %v7262_v37 }
 0x48a   : > { %v7264_v29 = vpop.permute.xlu0 %4452 }
 0x48b   : > { %8925 = vst [vmem:[#allocation114_spill] sm:$0xff] %v7264_v29 }
 0x48e   : > { %v7266_v63 = vpop.permute.xlu0 %4524 }
 0x48f   : > { %8926 = vst [vmem:[#allocation115_spill] sm:$0xff] %v7266_v63 }
 0x492   : > { %v7268_v4 = vpop.permute.xlu0 %4596 }
 0x493   : > { %8927 = vst [vmem:[#allocation116_spill] sm:$0xff] %v7268_v4 }
 0x496   : > { %v7270_v34 = vpop.permute.xlu0 %4668 }
 0x497   : > { %8928 = vst [vmem:[#allocation117_spill] sm:$0xff] %v7270_v34 }
 0x4d4   : > { %v2286_v62 = vpop.permute.xlu1 %2285  ;;  %v2288_v50 = vpop.permute.xlu0 %2287 }
 0x4d5   : > { %v7273_v58 = vsel %vm1989_vm4, %v2286_v62, %v2288_v50 }
 0x4d6   : > { %v2499_v2 = vrot.slane %v7273_v58, %v5517_v6  ;;  %v7280_v29 = vrot.slane %v7273_v58, %v5520_v7  ;;  %v2571_v24 = vrot.slane %v7273_v58, %v5658_v3  ;;  %v2643_v10 = vrot.slane %v7273_v58, %v5632_v48 }
 0x4d7   : > { %v7330_v33 = vrot.slane %v7273_v58, %v5646_v55  ;;  %v2715_v26 = vrot.slane %v7273_v58, %v5662_v12  ;;  %v7352_v11 = vrot.slane %v7273_v58, %v5680_v1 }
 0x4d8   : > { %v2290_v25 = vpop.permute.xlu1 %2289  ;;  %v2505_v20 = vmul.f32 %v2499_v2, %v6676_v36  ;;  %v2541_v4 = vmul.f32 %v7280_v29, %v6680_v0 }
 0x4d9   : > { %v7283_v63 = vsel %vm1989_vm4, %v2288_v50, %v2290_v25  ;;  %v7308_v50 = vrot.slane %v7273_v58, %v5673_v47 }
 0x4da   : > { %8929 = vst [vmem:[#allocation118_spill] sm:$0xff] %v7283_v63  ;;  %2512 = vrot.lane.b32.xlu1 %v2505_v20, %s5323_s12  ;;  %v7288_v34 = vrot.slane %v7283_v63, %v5517_v6  ;;  %v2539_v37 = vrot.slane %v7283_v63, %v5520_v7  ;;  %v2577_v20 = vmul.f32 %v2571_v24, %v6656_v30 }
 0x4dc   : > { %v2506_v62 = vmul.f32 %v7288_v34, %v6676_v36  ;;  %v2542_v25 = vmul.f32 %v2539_v37, %v6680_v0  ;;  %v7304_v36 = vrot.slane %v7283_v63, %v5658_v3  ;;  %v2613_v0 = vmul.f32 %v7308_v50, %v6684_v8 }
 0x4de   : > { %2514 = vrot.lane.b32.xlu0 %v2506_v62, %s5323_s12  ;;  %2548 = vrot.lane.b32.xlu1 %v2541_v4, %s5323_s12  ;;  %v2578_v62 = vmul.f32 %v7304_v36, %v6656_v30  ;;  %v2611_v4 = vrot.slane %v7283_v63, %v5673_v47  ;;  %v7326_v30 = vrot.slane %v7283_v63, %v5632_v48 }
 0x4e2   : > { %2550 = vrot.lane.b32.xlu0 %v2542_v25, %s5323_s12  ;;  %2584 = vrot.lane.b32.xlu1 %v2577_v20, %s5323_s12  ;;  %v2614_v25 = vmul.f32 %v2611_v4, %v6684_v8  ;;  %v2649_v20 = vmul.f32 %v2643_v10, %v6689_v39  ;;  %v2685_v8 = vmul.f32 %v7330_v33, %v6661_v45 }
 0x4e6   : > { %2586 = vrot.lane.b32.xlu0 %v2578_v62, %s5323_s12  ;;  %2620 = vrot.lane.b32.xlu1 %v2613_v0, %s5323_s12  ;;  %v2650_v62 = vmul.f32 %v7326_v30, %v6689_v39  ;;  %v2683_v0 = vrot.slane %v7283_v63, %v5646_v55  ;;  %v7348_v39 = vrot.slane %v7283_v63, %v5662_v12 }
 0x4ea   : > { %2622 = vrot.lane.b32.xlu0 %v2614_v25, %s5323_s12  ;;  %2656 = vrot.lane.b32.xlu1 %v2649_v20, %s5323_s12  ;;  %v2686_v25 = vmul.f32 %v2683_v0, %v6661_v45  ;;  %v2721_v20 = vmul.f32 %v2715_v26, %v6705_v49  ;;  %v2757_v45 = vmul.f32 %v7352_v11, %v6715_v35 }
 0x4ee   : > { %2658 = vrot.lane.b32.xlu0 %v2650_v62, %s5323_s12  ;;  %2692 = vrot.lane.b32.xlu1 %v2685_v8, %s5323_s12  ;;  %v2722_v62 = vmul.f32 %v7348_v39, %v6705_v49  ;;  %v2755_v8 = vrot.slane %v7283_v63, %v5680_v1  ;;  %v3378_v49 = vmul.f32 %v6892_v44, %v2499_v2 }
 0x4f0   : > { %v2758_v17 = vmul.f32 %v2755_v8, %v6715_v35  ;;  %v3398_v35 = vmul.f32 %v6877_v40, %v2539_v37 }
 0x4f2   : > { %2694 = vrot.lane.b32.xlu0 %v2686_v25, %s5323_s12  ;;  %2728 = vrot.lane.b32.xlu1 %v2721_v20, %s5323_s12  ;;  %v3379_v25 = vmul.f32 %v6892_v44, %v7288_v34  ;;  %v3397_v20 = vmul.f32 %v6877_v40, %v7280_v29  ;;  %v3416_v44 = vmul.f32 %v6886_v61, %v2571_v24 }
 0x4f3   : > { %v4215_v40 = vmul.f32 %v7114_v53, %v2571_v24  ;;  %v4324_v24 = vmul.f32 %v7135_v14, %v2683_v0 }
 0x4f6   : > { %2730 = vrot.lane.b32.xlu0 %v2722_v62, %s5323_s12  ;;  %2764 = vrot.lane.b32.xlu1 %v2757_v45, %s5323_s12  ;;  %v3511_v62 = vmul.f32 %v6926_v57, %v7352_v11  ;;  %v4180_v45 = vmul.f32 %v7107_v51, %v2539_v37  ;;  %v3436_v37 = vmul.f32 %v6913_v31, %v2611_v4 }
 0x4fa   : > { %2766 = vrot.lane.b32.xlu0 %v2758_v17, %s5323_s12  ;;  %3384 = vrot.lane.b32.xlu1 %v3379_v25, %s5347_s21  ;;  %v4143_v17 = vmul.f32 %v7098_v56, %v2499_v2  ;;  %v3417_v25 = vmul.f32 %v6886_v61, %v7304_v36  ;;  %v3435_v2 = vmul.f32 %v6913_v31, %v7308_v50 }
 0x4fb   : > { %v4287_v61 = vmul.f32 %v7128_v13, %v2643_v10  ;;  %v4359_v31 = vmul.f32 %v7142_v5, %v2715_v26 }
 0x4fe   : > { %3382 = vrot.lane.b32.xlu0 %v3378_v49, %s5347_s21  ;;  %3401 = vrot.lane.b32.xlu1 %v3397_v20, %s5347_s21  ;;  %v4252_v49 = vmul.f32 %v7121_v27, %v2611_v4  ;;  %v3454_v20 = vmul.f32 %v6909_v21, %v2643_v10  ;;  %v3473_v4 = vmul.f32 %v6916_v9, %v7330_v33 }
 0x4ff   : > { %v2786_v10 = vmul.f32 %v6734_v42, %v7283_v63 }
 0x502   : > { %3515 = vrot.lane.b32.xlu0 %v3511_v62, %s5347_s21  ;;  %3403 = vrot.lane.b32.xlu1 %v3398_v35, %s5347_s21  ;;  %v3455_v62 = vmul.f32 %v6909_v21, %v7326_v30  ;;  %v4396_v35 = vmul.f32 %v7152_v19, %v2755_v8  ;;  %v3474_v21 = vmul.f32 %v6916_v9, %v2683_v0 }
 0x503   : > { %v3493_v9 = vmul.f32 %v6922_v46, %v7348_v39  ;;  %v2874_v0 = vrot.slane %v2786_v10, %v5658_v3 }
 0x506   : > { %4149 = vrot.lane.b32.xlu0 %v4143_v17, %s8883_s20  ;;  %3420 = vrot.lane.b32.xlu1 %v3416_v44, %s5347_s21  ;;  %v2802_v17 = vrot.slane %v2786_v10, %v5517_v6 }
 0x508   : > { %v2805_v44 = vmul.f32 %v2802_v17, %v6772_v59  ;;  %v4360_v17 = vmul.f32 %v7142_v5, %v7348_v39 }
 0x50a   : > { %4187 = vrot.lane.b32.xlu0 %v4180_v45, %s8883_s20  ;;  %3422 = vrot.lane.b32.xlu1 %v3417_v25, %s5347_s21  ;;  %v3492_v45 = vmul.f32 %v6922_v46, %v2715_v26  ;;  %v2838_v25 = vrot.slane %v2786_v10, %v5520_v7  ;;  %v3512_v26 = vmul.f32 %v6926_v57, %v2755_v8 }
 0x50b   : > { %v4144_v46 = vmul.f32 %v7098_v56, %v7288_v34  ;;  %v4179_v57 = vmul.f32 %v7107_v51, %v7280_v29  ;;  %v2982_v8 = vrot.slane %v2786_v10, %v5646_v55  ;;  %v4216_v56 = vmul.f32 %v7114_v53, %v7304_v36 }
 0x50c   : > { %v3018_v34 = vrot.slane %v2786_v10, %v5662_v12  ;;  %v4251_v51 = vmul.f32 %v7121_v27, %v7308_v50  ;;  %v3054_v29 = vrot.slane %v2786_v10, %v5680_v1  ;;  %v4288_v36 = vmul.f32 %v7128_v13, %v7326_v30  ;;  %v8931_v30 = vld [vmem:[#allocation19_spill] sm:$0xff] }
 0x50d   : > { %v4323_v50 = vmul.f32 %v7135_v14, %v7330_v33  ;;  %v8932_v33 = vld [vmem:[#allocation34_spill] sm:$0xff] }
 0x50e   : > { %4221 = vrot.lane.b32.xlu0 %v4215_v40, %s8883_s20  ;;  %3439 = vrot.lane.b32.xlu1 %v3435_v2, %s5347_s21  ;;  %v2841_v40 = vmul.f32 %v2838_v25, %v6783_v15  ;;  %v2877_v2 = vmul.f32 %v2874_v0, %v6743_v23  ;;  %v3057_v53 = vmul.f32 %v3054_v29, %v6824_v54  ;;  %v8933_v0 = vld [vmem:[#allocation26_spill] sm:$0xff] }
 0x512   : > { %4259 = vrot.lane.b32.xlu0 %v4252_v49, %s8883_s20  ;;  %3441 = vrot.lane.b32.xlu1 %v3436_v37, %s5347_s21  ;;  %v2910_v49 = vrot.slane %v2786_v10, %v5673_v47 }
 0x514   : > { %v2913_v37 = vmul.f32 %v2910_v49, %v6752_v32 }
 0x516   : > { %4293 = vrot.lane.b32.xlu0 %v4287_v61, %s8883_s20  ;;  %3458 = vrot.lane.b32.xlu1 %v3454_v20, %s5347_s21  ;;  %v2946_v61 = vrot.slane %v2786_v10, %v5632_v48 }
 0x518   : > { %v2949_v20 = vmul.f32 %v2946_v61, %v6805_v38 }
 0x51a   : > { %4331 = vrot.lane.b32.xlu0 %v4324_v24, %s8883_s20  ;;  %3460 = vrot.lane.b32.xlu1 %v3455_v62, %s5347_s21  ;;  %v2985_v24 = vmul.f32 %v2982_v8, %v6762_v41  ;;  %v3021_v62 = vmul.f32 %v3018_v34, %v6769_v60 }
 0x51e   : > { %4365 = vrot.lane.b32.xlu0 %v4359_v31, %s8883_s20  ;;  %3477 = vrot.lane.b32.xlu1 %v3473_v4, %s5347_s21  ;;  %v3085_v31 = vmul.f32 %v6836_v28, %v7283_v63 }
 0x520   : > { %v3101_v4 = vrot.slane %v3085_v31, %v5517_v6  ;;  %v3137_v10 = vrot.slane %v3085_v31, %v5520_v7  ;;  %v3245_v49 = vrot.slane %v3085_v31, %v5632_v48  ;;  %v3353_v29 = vrot.slane %v3085_v31, %v5680_v1 }
 0x522   : > { %4403 = vrot.lane.b32.xlu0 %v4396_v35, %s8883_s20  ;;  %3479 = vrot.lane.b32.xlu1 %v3474_v21, %s5347_s21  ;;  %v3104_v27 = vmul.f32 %v3101_v4, %v6779_v43  ;;  %v8930_v35 = vld [vmem:[#allocation18_spill] sm:$0xff]  ;;  %v3140_v21 = vmul.f32 %v3137_v10, %v8931_v30  ;;  %v8938_v4 = vld [vmem:[#allocation28_spill] sm:$0xff] }
 0x523   : > { %v2780_v13 = vsel %vm762_vm0, %v8930_v35, %v6734_v42  ;;  %v4395_v42 = vmul.f32 %v7152_v19, %v7352_v11  ;;  %v8939_v10 = vld [vmem:[#allocation6_spill] sm:$0xff] }
 0x524   : > { %v7538_v35 = vmul.f32 %v8939_v10, %v7273_v58 }
 0x526   : > { %2813 = vrot.lane.b32.xlu0 %v2805_v44, %s5355_s26  ;;  %3496 = vrot.lane.b32.xlu1 %v3492_v45, %s5347_s21  ;;  %v3173_v44 = vrot.slane %v3085_v31, %v5658_v3  ;;  %v7480_v45 = vmul.f32 %v2780_v13, %v7273_v58 }
 0x528   : > { %v3176_v25 = vmul.f32 %v3173_v44, %v8932_v33  ;;  %v2798_v5 = vrot.slane %v7480_v45, %v5517_v6  ;;  %v2834_v19 = vrot.slane %v7480_v45, %v5520_v7 }
 0x52a   : > { %2849 = vrot.lane.b32.xlu0 %v2841_v40, %s5355_s26  ;;  %3498 = vrot.lane.b32.xlu1 %v3493_v9, %s5347_s21  ;;  %v3209_v40 = vrot.slane %v3085_v31, %v5673_v47 }
 0x52e   : > { %2885 = vrot.lane.b32.xlu0 %v2877_v2, %s5355_s26  ;;  %3517 = vrot.lane.b32.xlu1 %v3512_v26, %s5347_s21  ;;  %v3212_v2 = vmul.f32 %v3209_v40, %v8933_v0  ;;  %v2804_v26 = vmul.f32 %v2798_v5, %v6772_v59  ;;  %v2870_v59 = vrot.slane %v7480_v45, %v5658_v3 }
 0x52f   : > { %v2978_v40 = vrot.slane %v7480_v45, %v5646_v55 }
 0x532   : > { %2921 = vrot.lane.b32.xlu0 %v2913_v37, %s5355_s26  ;;  %4151 = vrot.lane.b32.xlu1 %v4144_v46, %s8883_s20  ;;  %v8934_v46 = vld [vmem:[#allocation23_spill] sm:$0xff] }
 0x533   : > { %v3248_v61 = vmul.f32 %v3245_v49, %v8934_v46  ;;  %v8944_v49 = vld [vmem:[#allocation21_spill] sm:$0xff] }
 0x536   : > { %2957 = vrot.lane.b32.xlu0 %v2949_v20, %s5355_s26  ;;  %4185 = vrot.lane.b32.xlu1 %v4179_v57, %s8883_s20  ;;  %v2840_v20 = vmul.f32 %v2834_v19, %v6783_v15  ;;  %v3281_v57 = vrot.slane %v3085_v31, %v5646_v55  ;;  %v2906_v15 = vrot.slane %v7480_v45, %v5673_v47 }
 0x53a   : > { %2993 = vrot.lane.b32.xlu0 %v2985_v24, %s5355_s26  ;;  %4223 = vrot.lane.b32.xlu1 %v4216_v56, %s8883_s20  ;;  %v8936_v56 = vld [vmem:[#allocation25_spill] sm:$0xff] }
 0x53b   : > { %v3284_v34 = vmul.f32 %v3281_v57, %v8936_v56  ;;  %v8945_v57 = vld [vmem:[#allocation20_spill] sm:$0xff] }
 0x53e   : > { %3029 = vrot.lane.b32.xlu0 %v3021_v62, %s5355_s26  ;;  %4257 = vrot.lane.b32.xlu1 %v4251_v51, %s8883_s20  ;;  %v2876_v62 = vmul.f32 %v2870_v59, %v6743_v23  ;;  %v3317_v51 = vrot.slane %v3085_v31, %v5662_v12  ;;  %v2942_v23 = vrot.slane %v7480_v45, %v5632_v48  ;;  %v8940_v31 = vld [vmem:[#allocation9_spill] sm:$0xff] }
 0x53f   : > { %v3533_v13 = vsel %vm1346_vm2, %v8939_v10, %v8940_v31  ;;  %v3079_v59 = vsel %vm587_vm1, %v8945_v57, %v6836_v28  ;;  %v8955_v57 = vld [vmem:[#allocation44_spill] sm:$0xff] }
 0x540   : > { %v7556_v5 = vmul.f32 %v3533_v13, %v7283_v63 }
 0x542   : > { %3065 = vrot.lane.b32.xlu0 %v3057_v53, %s5355_s26  ;;  %4295 = vrot.lane.b32.xlu1 %v4288_v36, %s8883_s20 }
 0x546   : > { %3112 = vrot.lane.b32.xlu0 %v3104_v27, %s8822_s29  ;;  %4329 = vrot.lane.b32.xlu1 %v4323_v50, %s8883_s20  ;;  %v3320_v27 = vmul.f32 %v3317_v51, %v8938_v4  ;;  %v2912_v50 = vmul.f32 %v2906_v15, %v6752_v32  ;;  %v8947_v51 = vld [vmem:[#allocation8_spill] sm:$0xff] }
 0x54a   : > { %3148 = vrot.lane.b32.xlu0 %v3140_v21, %s8822_s29  ;;  %4367 = vrot.lane.b32.xlu1 %v4360_v17, %s8883_s20  ;;  %v8941_v21 = vld [vmem:[#allocation22_spill] sm:$0xff] }
 0x54b   : > { %v3356_v17 = vmul.f32 %v3353_v29, %v8941_v21 }
 0x54c   : > { %v7484_v14 = vpop.permute.xlu1 %2512 }
 0x54e   : > { %3184 = vrot.lane.b32.xlu0 %v3176_v25, %s8822_s29  ;;  %4401 = vrot.lane.b32.xlu1 %v4395_v42, %s8883_s20  ;;  %v2948_v25 = vmul.f32 %v2942_v23, %v6805_v38  ;;  %v3547_v42 = vrot.slane %v7538_v35, %v5517_v6  ;;  %v2984_v38 = vmul.f32 %v2978_v40, %v6762_v41  ;;  %v8949_v23 = vld [vmem:[#allocation39_spill] sm:$0xff] }
 0x550   : > { %v7494_v39 = vpop.permute.xlu0 %2514  ;;  %v7496_v9 = vpop.permute.xlu1 %2548  ;;  %v3556_v19 = vmul.f32 %v3547_v42, %v8944_v49  ;;  %v8952_v42 = vld [vmem:[#allocation41_spill] sm:$0xff] }
 0x552   : > { %3220 = vrot.lane.b32.xlu0 %v3212_v2, %s8822_s29  ;;  %2811 = vrot.lane.b32.xlu1 %v2804_v26, %s5355_s26 }
 0x554   : > { %v7505_v11 = vpop.permute.xlu0 %2550  ;;  %v7507_v37 = vpop.permute.xlu1 %2584 }
 0x556   : > { %3256 = vrot.lane.b32.xlu0 %v3248_v61, %s8822_s29  ;;  %2847 = vrot.lane.b32.xlu1 %v2840_v20, %s5355_s26  ;;  %v3587_v61 = vrot.slane %v7556_v5, %v5520_v7  ;;  %v3014_v20 = vrot.slane %v7480_v45, %v5662_v12 }
 0x558   : > { %v7516_v8 = vpop.permute.xlu0 %2586  ;;  %v7518_v24 = vpop.permute.xlu1 %2620  ;;  %v3593_v15 = vmul.f32 %v3587_v61, %v8947_v51  ;;  %v3020_v29 = vmul.f32 %v3014_v20, %v6769_v60  ;;  %v3659_v60 = vrot.slane %v7556_v5, %v5673_v47 }
 0x559   : > { %8935 = vst [vmem:[#allocation18_spill] sm:$0xff] %v7518_v24 }
 0x55a   : > { %3292 = vrot.lane.b32.xlu0 %v3284_v34, %s8822_s29  ;;  %2883 = vrot.lane.b32.xlu1 %v2876_v62, %s5355_s26  ;;  %v3050_v34 = vrot.slane %v7480_v45, %v5680_v1  ;;  %v3665_v40 = vmul.f32 %v3659_v60, %v8952_v42 }
 0x55c   : > { %v7528_v53 = vpop.permute.xlu0 %2622  ;;  %v7530_v36 = vpop.permute.xlu1 %2656  ;;  %v3056_v31 = vmul.f32 %v3050_v34, %v6824_v54  ;;  %v3691_v54 = vrot.slane %v7538_v35, %v5632_v48 }
 0x55d   : > { %8937 = vst [vmem:[#allocation19_spill] sm:$0xff] %v7530_v36 }
 0x55e   : > { %3328 = vrot.lane.b32.xlu0 %v3320_v27, %s8822_s29  ;;  %2919 = vrot.lane.b32.xlu1 %v2912_v50, %s5355_s26  ;;  %v3619_v27 = vrot.slane %v7538_v35, %v5658_v3  ;;  %v7586_v50 = vmul.f32 %v3079_v59, %v7273_v58  ;;  %v3700_v59 = vmul.f32 %v3691_v54, %v8955_v57 }
 0x560   : > { %v7546_v44 = vpop.permute.xlu0 %2658  ;;  %v7548_v32 = vpop.permute.xlu1 %2692  ;;  %v3628_v10 = vmul.f32 %v3619_v27, %v8949_v23  ;;  %v3097_v13 = vrot.slane %v7586_v50, %v5517_v6 }
 0x561   : > { %8942 = vst [vmem:[#allocation34_spill] sm:$0xff] %v7548_v32  ;;  %v9008_v32 = vld [vmem:[#allocation79_spill] sm:$0xff] }
 0x562   : > { %3364 = vrot.lane.b32.xlu0 %v3356_v17, %s8822_s29  ;;  %2955 = vrot.lane.b32.xlu1 %v2948_v25, %s5355_s26 }
 0x564   : > { %v7560_v2 = vpop.permute.xlu0 %2694  ;;  %v7562_v26 = vpop.permute.xlu1 %2728 }
 0x565   : > { %8943 = vst [vmem:[#allocation26_spill] sm:$0xff] %v7562_v26 }
 0x566   : > { %3562 = vrot.lane.b32.xlu0 %v3556_v19, %s8847_s27  ;;  %2991 = vrot.lane.b32.xlu1 %v2984_v38, %s5355_s26  ;;  %v3103_v19 = vmul.f32 %v3097_v13, %v6779_v43  ;;  %v3133_v38 = vrot.slane %v7586_v50, %v5520_v7  ;;  %v3731_v43 = vrot.slane %v7556_v5, %v5646_v55 }
 0x567   : > { %v3205_v13 = vrot.slane %v7586_v50, %v5673_v47 }
 0x568   : > { %v7577_v62 = vpop.permute.xlu0 %2730  ;;  %v7579_v41 = vpop.permute.xlu1 %2764  ;;  %v3139_v34 = vmul.f32 %v3133_v38, %v8931_v30 }
 0x569   : > { %8946 = vst [vmem:[#allocation23_spill] sm:$0xff] %v7579_v41 }
 0x56a   : > { %3600 = vrot.lane.b32.xlu0 %v3593_v15, %s8847_s27  ;;  %3027 = vrot.lane.b32.xlu1 %v3020_v29, %s5355_s26  ;;  %v3169_v15 = vrot.slane %v7586_v50, %v5658_v3  ;;  %v3763_v29 = vrot.slane %v7538_v35, %v5662_v12 }
 0x56c   : > { %v7590_v28 = vpop.permute.xlu0 %2766  ;;  %v7592_v45 = vpop.permute.xlu1 %3384  ;;  %v3175_v30 = vmul.f32 %v3169_v15, %v8932_v33  ;;  %v3241_v33 = vrot.slane %v7586_v50, %v5632_v48 }
 0x56d   : > { %8948 = vst [vmem:[#allocation25_spill] sm:$0xff] %v7592_v45  ;;  %v8996_v45 = vld [vmem:[#allocation27_spill] sm:$0xff] }
 0x56e   : > { %3634 = vrot.lane.b32.xlu0 %v3628_v10, %s8847_s27  ;;  %3063 = vrot.lane.b32.xlu1 %v3056_v31, %s5355_s26  ;;  %v8958_v31 = vld [vmem:[#allocation46_spill] sm:$0xff]  ;;  %v3247_v18 = vmul.f32 %v3241_v33, %v8934_v46  ;;  %v3313_v33 = vrot.slane %v7586_v50, %v5662_v12 }
 0x56f   : > { %v3737_v60 = vmul.f32 %v3731_v43, %v8958_v31  ;;  %v8962_v43 = vld [vmem:[#allocation55_spill] sm:$0xff] }
 0x570   : > { %v7602_v17 = vpop.permute.xlu0 %3382  ;;  %v7604_v25 = vpop.permute.xlu1 %3401  ;;  %v7650_v15 = vmul.f32 %v8962_v43, %v7273_v58 }
 0x571   : > { %8950 = vst [vmem:[#allocation28_spill] sm:$0xff] %v7602_v17  ;;  %8951 = vst [vmem:[#allocation6_spill] sm:$0xff] %v7604_v25 }
 0x572   : > { %3672 = vrot.lane.b32.xlu0 %v3665_v40, %s8847_s27  ;;  %3110 = vrot.lane.b32.xlu1 %v3103_v19, %s8822_s29  ;;  %v8959_v40 = vld [vmem:[#allocation48_spill] sm:$0xff] }
 0x573   : > { %v3772_v19 = vmul.f32 %v3763_v29, %v8959_v40  ;;  %v8963_v29 = vld [vmem:[#allocation51_spill] sm:$0xff] }
 0x574   : > { %v7614_v61 = vpop.permute.xlu0 %3515  ;;  %v7616_v20 = vpop.permute.xlu1 %3403 }
 0x575   : > { %8953 = vst [vmem:[#allocation9_spill] sm:$0xff] %v7614_v61  ;;  %8954 = vst [vmem:[#allocation22_spill] sm:$0xff] %v7616_v20 }
 0x576   : > { %3706 = vrot.lane.b32.xlu0 %v3700_v59, %s8847_s27  ;;  %3146 = vrot.lane.b32.xlu1 %v3139_v34, %s8822_s29  ;;  %v3211_v59 = vmul.f32 %v3205_v13, %v8933_v0  ;;  %v3803_v34 = vrot.slane %v7556_v5, %v5680_v1  ;;  %v3277_v0 = vrot.slane %v7586_v50, %v5646_v55 }
 0x578   : > { %v7628_v27 = vpop.permute.xlu0 %4149  ;;  %v7630_v10 = vpop.permute.xlu1 %3420 }
 0x579   : > { %8956 = vst [vmem:[#allocation21_spill] sm:$0xff] %v7628_v27  ;;  %8957 = vst [vmem:[#allocation20_spill] sm:$0xff] %v7630_v10  ;;  %v8966_v27 = vld [vmem:[#allocation50_spill] sm:$0xff] }
 0x57a   : > { %3744 = vrot.lane.b32.xlu0 %v3737_v60, %s8847_s27  ;;  %3182 = vrot.lane.b32.xlu1 %v3175_v30, %s8822_s29  ;;  %v3832_v60 = vsel %vm1564_vm3, %v8962_v43, %v8963_v29 }
 0x57c   : > { %v7639_v54 = vpop.permute.xlu0 %4187  ;;  %v7641_v38 = vpop.permute.xlu1 %3422 }
 0x57d   : > { %8960 = vst [vmem:[#allocation8_spill] sm:$0xff] %v7639_v54  ;;  %8961 = vst [vmem:[#allocation39_spill] sm:$0xff] %v7641_v38  ;;  %v3809_v54 = vmul.f32 %v3803_v34, %v8966_v27  ;;  %v3283_v34 = vmul.f32 %v3277_v0, %v8936_v56  ;;  %v3918_v56 = vrot.slane %v7650_v15, %v5658_v3  ;;  %v8995_v38 = vld [vmem:[#allocation30_spill] sm:$0xff] }
 0x57e   : > { %3778 = vrot.lane.b32.xlu0 %v3772_v19, %s8847_s27  ;;  %3218 = vrot.lane.b32.xlu1 %v3211_v59, %s8822_s29  ;;  %v3846_v19 = vrot.slane %v7650_v15, %v5517_v6  ;;  %v7668_v59 = vmul.f32 %v3832_v60, %v7283_v63  ;;  %v8972_v60 = vld [vmem:[#allocation57_spill] sm:$0xff]  ;;  %v3349_v0 = vrot.slane %v7586_v50, %v5680_v1 }
 0x580   : > { %v7659_v30 = vpop.permute.xlu0 %4221  ;;  %v7661_v13 = vpop.permute.xlu1 %3439  ;;  %v3886_v46 = vrot.slane %v7668_v59, %v5520_v7 }
 0x581   : > { %8964 = vst [vmem:[#allocation41_spill] sm:$0xff] %v7659_v30  ;;  %8965 = vst [vmem:[#allocation44_spill] sm:$0xff] %v7661_v13  ;;  %v8969_v30 = vld [vmem:[#allocation53_spill] sm:$0xff] }
 0x582   : > { %3816 = vrot.lane.b32.xlu0 %v3809_v54, %s8847_s27  ;;  %3254 = vrot.lane.b32.xlu1 %v3247_v18, %s8822_s29  ;;  %v3855_v52 = vmul.f32 %v3846_v19, %v8969_v30  ;;  %v3319_v19 = vmul.f32 %v3313_v33, %v8938_v4  ;;  %v3958_v4 = vrot.slane %v7668_v59, %v5673_v47 }
 0x583   : > { %v3551_v33 = vrot.slane %v7556_v5, %v5517_v6 }
 0x584   : > { %v7672_v43 = vpop.permute.xlu0 %4259  ;;  %v7674_v29 = vpop.permute.xlu1 %3441 }
 0x585   : > { %8967 = vst [vmem:[#allocation46_spill] sm:$0xff] %v7672_v43  ;;  %8968 = vst [vmem:[#allocation48_spill] sm:$0xff] %v7674_v29  ;;  %v3892_v43 = vmul.f32 %v3886_v46, %v8972_v60  ;;  %v3355_v46 = vmul.f32 %v3349_v0, %v8941_v21  ;;  %v3990_v21 = vrot.slane %v7650_v15, %v5632_v48 }
 0x586   : > { %3861 = vrot.lane.b32.xlu0 %v3855_v52, %s8863_s18  ;;  %3290 = vrot.lane.b32.xlu1 %v3283_v34, %s8822_s29  ;;  %v3583_v0 = vrot.slane %v7538_v35, %v5520_v7 }
 0x588   : > { %v7684_v54 = vpop.permute.xlu0 %4293  ;;  %v7686_v18 = vpop.permute.xlu1 %3458 }
 0x589   : > { %8970 = vst [vmem:[#allocation55_spill] sm:$0xff] %v7684_v54  ;;  %8971 = vst [vmem:[#allocation51_spill] sm:$0xff] %v7686_v18  ;;  %v8975_v54 = vld [vmem:[#allocation59_spill] sm:$0xff] }
 0x58a   : > { %3899 = vrot.lane.b32.xlu0 %v3892_v43, %s8863_s18  ;;  %3326 = vrot.lane.b32.xlu1 %v3319_v19, %s8822_s29  ;;  %v3927_v16 = vmul.f32 %v3918_v56, %v8975_v54  ;;  %v8978_v19 = vld [vmem:[#allocation61_spill] sm:$0xff]  ;;  %v3557_v56 = vmul.f32 %v3551_v33, %v8944_v49  ;;  %v4030_v49 = vrot.slane %v7668_v59, %v5646_v55 }
 0x58b   : > { %v3623_v33 = vrot.slane %v7556_v5, %v5658_v3 }
 0x58c   : > { %v7696_v52 = vpop.permute.xlu0 %4331  ;;  %v7698_v34 = vpop.permute.xlu1 %3460 }
 0x58d   : > { %8973 = vst [vmem:[#allocation50_spill] sm:$0xff] %v7696_v52  ;;  %8974 = vst [vmem:[#allocation53_spill] sm:$0xff] %v7698_v34  ;;  %v3964_v52 = vmul.f32 %v3958_v4, %v8978_v19  ;;  %v3592_v4 = vmul.f32 %v3583_v0, %v8947_v51  ;;  %v4062_v51 = vrot.slane %v7650_v15, %v5662_v12  ;;  %v8991_v34 = vld [vmem:[#allocation70_spill] sm:$0xff] }
 0x58e   : > { %3933 = vrot.lane.b32.xlu0 %v3927_v16, %s8863_s18  ;;  %3362 = vrot.lane.b32.xlu1 %v3355_v46, %s8822_s29  ;;  %v3655_v0 = vrot.slane %v7538_v35, %v5673_v47 }
 0x590   : > { %v7708_v50 = vpop.permute.xlu0 %4365  ;;  %v7710_v43 = vpop.permute.xlu1 %3477 }
 0x591   : > { %8976 = vst [vmem:[#allocation57_spill] sm:$0xff] %v7708_v50  ;;  %8977 = vst [vmem:[#allocation59_spill] sm:$0xff] %v7710_v43  ;;  %v8981_v50 = vld [vmem:[#allocation63_spill] sm:$0xff] }
 0x592   : > { %3971 = vrot.lane.b32.xlu0 %v3964_v52, %s8863_s18  ;;  %3564 = vrot.lane.b32.xlu1 %v3557_v56, %s8847_s27  ;;  %v3999_v61 = vmul.f32 %v3990_v21, %v8981_v50  ;;  %v3629_v21 = vmul.f32 %v3623_v33, %v8949_v23  ;;  %v3664_v23 = vmul.f32 %v3655_v0, %v8952_v42 }
 0x593   : > { %v3695_v33 = vrot.slane %v7556_v5, %v5632_v48  ;;  %v3727_v42 = vrot.slane %v7538_v35, %v5646_v55 }
 0x594   : > { %v7720_v16 = vpop.permute.xlu0 %4403  ;;  %v7722_v46 = vpop.permute.xlu1 %3479 }
 0x595   : > { %8979 = vst [vmem:[#allocation61_spill] sm:$0xff] %v7720_v16  ;;  %8980 = vst [vmem:[#allocation119_spill] sm:$0xff] %v7722_v46  ;;  %v8983_v16 = vld [vmem:[#allocation66_spill] sm:$0xff]  ;;  %v8986_v46 = vld [vmem:[#allocation84_spill] sm:$0xff]  ;;  %v3701_v17 = vmul.f32 %v3695_v33, %v8955_v57  ;;  %v3736_v29 = vmul.f32 %v3727_v42, %v8958_v31 }
 0x596   : > { %4005 = vrot.lane.b32.xlu0 %v3999_v61, %s8863_s18  ;;  %3598 = vrot.lane.b32.xlu1 %v3592_v4, %s8847_s27  ;;  %v4036_v43 = vmul.f32 %v4030_v49, %v8983_v16  ;;  %v4102_v61 = vrot.slane %v7668_v59, %v5680_v1  ;;  %v8985_v49 = vld [vmem:[#allocation68_spill] sm:$0xff]  ;;  %v7756_v13 = vmul.f32 %v8986_v46, %v7273_v58  ;;  %v8994_v57 = vld [vmem:[#allocation82_spill] sm:$0xff]  ;;  %v8999_v42 = vld [vmem:[#allocation85_spill] sm:$0xff] }
 0x597   : > { %v4071_v18 = vmul.f32 %v4062_v51, %v8985_v49 }
 0x598   : > { %v7732_v52 = vpop.permute.xlu0 %2813  ;;  %v7734_v56 = vpop.permute.xlu1 %3496  ;;  %v4108_v25 = vmul.f32 %v4102_v61, %v8991_v34 }
 0x599   : > { %8982 = vst [vmem:[#allocation63_spill] sm:$0xff] %v7734_v56 }
 0x59a   : > { %4043 = vrot.lane.b32.xlu0 %v4036_v43, %s8863_s18  ;;  %3636 = vrot.lane.b32.xlu1 %v3629_v21, %s8847_s27  ;;  %v8987_v43 = vld [vmem:[#allocation29_spill] sm:$0xff] }
 0x59b   : > { %v7760_v21 = vmul.f32 %v8987_v43, %v7283_v63 }
 0x59c   : > { %v7746_v4 = vpop.permute.xlu0 %2849  ;;  %v7748_v56 = vpop.permute.xlu1 %3498 }
 0x59d   : > { %8984 = vst [vmem:[#allocation66_spill] sm:$0xff] %v7748_v56  ;;  %v8988_v56 = vld [vmem:[#allocation77_spill] sm:$0xff] }
 0x59e   : > { %4077 = vrot.lane.b32.xlu0 %v4071_v18, %s8863_s18  ;;  %3670 = vrot.lane.b32.xlu1 %v3664_v23, %s8847_s27  ;;  %v4419_v51 = vsel %vm1989_vm4, %v8986_v46, %v8988_v56  ;;  %v4433_v18 = vrot.slane %v7756_v13, %v5517_v6  ;;  %v2327_v46 = vrot.slane %v7760_v21, %v5517_v6 }
 0x59f   : > { %v7778_v23 = vmul.f32 %v4419_v51, %v7283_v63  ;;  %v2349_v56 = vrot.slane %v7760_v21, %v5520_v7  ;;  %v3767_v63 = vrot.slane %v7556_v5, %v5662_v12  ;;  %v4505_v5 = vrot.slane %v7756_v13, %v5658_v3 }
 0x5a0   : > { %v7769_v0 = vpop.permute.xlu0 %2885  ;;  %v7771_v10 = vpop.permute.xlu1 %3517  ;;  %v4442_v33 = vmul.f32 %v4433_v18, %v8994_v57  ;;  %v2330_v20 = vmul.f32 %v2327_v46, %v8995_v38  ;;  %v3799_v46 = vrot.slane %v7538_v35, %v5680_v1 }
 0x5a1   : > { %8989 = vst [vmem:[#allocation68_spill] sm:$0xff] %v7769_v0  ;;  %8990 = vst [vmem:[#allocation84_spill] sm:$0xff] %v7771_v10  ;;  %v4473_v51 = vrot.slane %v7778_v23, %v5520_v7  ;;  %v3773_v41 = vmul.f32 %v3767_v63, %v8959_v40  ;;  %v9003_v63 = vld [vmem:[#allocation78_spill] sm:$0xff]  ;;  %v4545_v35 = vrot.slane %v7778_v23, %v5673_v47 }
 0x5a2   : > { %4115 = vrot.lane.b32.xlu0 %v4108_v25, %s8863_s18  ;;  %3708 = vrot.lane.b32.xlu1 %v3701_v17, %s8847_s27  ;;  %v2352_v25 = vmul.f32 %v2349_v56, %v8996_v45  ;;  %v2371_v17 = vrot.slane %v7760_v21, %v5658_v3  ;;  %v4514_v40 = vmul.f32 %v4505_v5, %v9003_v63  ;;  %v9005_v5 = vld [vmem:[#allocation33_spill] sm:$0xff] }
 0x5a4   : > { %v7786_v10 = vpop.permute.xlu0 %2921  ;;  %v7788_v61 = vpop.permute.xlu1 %4151  ;;  %v2355_v56 = vadd.f32 %v2352_v25, %v2330_v20  ;;  %v3850_v20 = vrot.slane %v7668_v59, %v5517_v6 }
 0x5a5   : > { %8992 = vst [vmem:[#allocation29_spill] sm:$0xff] %v7786_v10  ;;  %8993 = vst [vmem:[#allocation77_spill] sm:$0xff] %v7788_v61  ;;  %v4479_v61 = vmul.f32 %v4473_v51, %v8999_v42  ;;  %v4551_v10 = vmul.f32 %v4545_v35, %v9008_v32 }
 0x5a6   : > { %4448 = vrot.lane.b32.xlu0 %v4442_v33, %s5360_s30  ;;  %3742 = vrot.lane.b32.xlu1 %v3736_v29, %s8847_s27  ;;  %v9000_v29 = vld [vmem:[#allocation24_spill] sm:$0xff] }
 0x5a7   : > { %v2374_v33 = vmul.f32 %v2371_v17, %v9000_v29 }
 0x5a8   : > { %v7802_v18 = vpop.permute.xlu0 %2957  ;;  %v7804_v31 = vpop.permute.xlu1 %4185 }
 0x5a9   : > { %8997 = vst [vmem:[#allocation70_spill] sm:$0xff] %v7802_v18  ;;  %8998 = vst [vmem:[#allocation82_spill] sm:$0xff] %v7804_v31  ;;  %v2393_v31 = vrot.slane %v7760_v21, %v5673_v47  ;;  %v3808_v18 = vmul.f32 %v3799_v46, %v8966_v27  ;;  %v2377_v17 = vadd.f32 %v2374_v33, %v2355_v56 }
 0x5aa   : > { %4486 = vrot.lane.b32.xlu0 %v4479_v61, %s5360_s30  ;;  %3780 = vrot.lane.b32.xlu1 %v3773_v41, %s8847_s27  ;;  %v9004_v41 = vld [vmem:[#allocation32_spill] sm:$0xff]  ;;  %v2415_v46 = vrot.slane %v7760_v21, %v5632_v48  ;;  %v3882_v56 = vrot.slane %v7650_v15, %v5520_v7 }
 0x5ab   : > { %v2304_v61 = vsel %vm383_vm5, %v9004_v41, %v8987_v43  ;;  %v2396_v27 = vmul.f32 %v2393_v31, %v9005_v5  ;;  %v3856_v43 = vmul.f32 %v3850_v20, %v8969_v30  ;;  %v9009_v30 = vld [vmem:[#allocation36_spill] sm:$0xff]  ;;  %v2437_v20 = vrot.slane %v7760_v21, %v5646_v55 }
 0x5ac   : > { %v7817_v26 = vpop.permute.xlu0 %2993  ;;  %v7819_v51 = vpop.permute.xlu1 %4223  ;;  %v7831_v25 = vmul.f32 %v2304_v61, %v7273_v58  ;;  %v4577_v58 = vrot.slane %v7756_v13, %v5632_v48  ;;  %v2418_v35 = vmul.f32 %v2415_v46, %v9009_v30  ;;  %v3891_v32 = vmul.f32 %v3882_v56, %v8972_v60 }
 0x5ad   : > { %9001 = vst [vmem:[#allocation30_spill] sm:$0xff] %v7817_v26  ;;  %9002 = vst [vmem:[#allocation27_spill] sm:$0xff] %v7819_v51 }
 0x5ae   : > { %4520 = vrot.lane.b32.xlu0 %v4514_v40, %s5360_s30  ;;  %3814 = vrot.lane.b32.xlu1 %v3808_v18, %s8847_s27  ;;  %v7849_v18 = vmul.f32 0.0, %v9004_v41  ;;  %v2323_v31 = vrot.slane %v7831_v25, %v5517_v6  ;;  %v2345_v33 = vrot.slane %v7831_v25, %v5520_v7  ;;  %v2399_v40 = vadd.f32 %v2396_v27, %v2377_v17 }
 0x5af   : > { %v4617_v17 = vrot.slane %v7778_v23, %v5646_v55  ;;  %v2367_v60 = vrot.slane %v7831_v25, %v5658_v3 }
 0x5b0   : > { %v7838_v51 = vpop.permute.xlu0 %3029  ;;  %v7840_v26 = vpop.permute.xlu1 %4257  ;;  %v2319_v27 = vrot.slane %v7849_v18, %v5517_v6  ;;  %v2341_v46 = vrot.slane %v7849_v18, %v5520_v7 }
 0x5b1   : > { %9006 = vst [vmem:[#allocation85_spill] sm:$0xff] %v7838_v51  ;;  %9007 = vst [vmem:[#allocation24_spill] sm:$0xff] %v7840_v26  ;;  %v9012_v26 = vld [vmem:[#allocation81_spill] sm:$0xff] }
 0x5b2   : > { %4558 = vrot.lane.b32.xlu0 %v4551_v10, %s5360_s30  ;;  %3863 = vrot.lane.b32.xlu1 %v3856_v43, %s8863_s18  ;;  %v4586_v51 = vmul.f32 %v4577_v58, %v9012_v26  ;;  %v3922_v10 = vrot.slane %v7668_v59, %v5658_v3  ;;  %v2329_v43 = vmul.f32 %v2323_v31, %v8995_v38  ;;  %v9013_v58 = vld [vmem:[#allocation31_spill] sm:$0xff] }
 0x5b3   : > { %v2440_v56 = vmul.f32 %v2437_v20, %v9013_v58  ;;  %v2459_v26 = vrot.slane %v7760_v21, %v5662_v12  ;;  %v9016_v31 = vld [vmem:[#allocation83_spill] sm:$0xff] }
 0x5b4   : > { %v7860_v61 = vpop.permute.xlu0 %3065  ;;  %v7862_v41 = vpop.permute.xlu1 %4295  ;;  %v4623_v0 = vmul.f32 %v4617_v17, %v9016_v31  ;;  %v2373_v17 = vmul.f32 %v2367_v60, %v9000_v29 }
 0x5b5   : > { %9010 = vst [vmem:[#allocation32_spill] sm:$0xff] %v7860_v61  ;;  %9011 = vst [vmem:[#allocation33_spill] sm:$0xff] %v7862_v41  ;;  %v2351_v41 = vmul.f32 %v2345_v33, %v8996_v45  ;;  %v2421_v61 = vadd.f32 %v2418_v35, %v2399_v40  ;;  %v3928_v33 = vmul.f32 %v3922_v10, %v8975_v54  ;;  %v9017_v10 = vld [vmem:[#allocation35_spill] sm:$0xff] }
 0x5b6   : > { %4592 = vrot.lane.b32.xlu0 %v4586_v51, %s5360_s30  ;;  %3897 = vrot.lane.b32.xlu1 %v3891_v32, %s8863_s18  ;;  %v4649_v51 = vrot.slane %v7756_v13, %v5662_v12  ;;  %v3954_v32 = vrot.slane %v7650_v15, %v5673_v47  ;;  %v2328_v40 = vmul.f32 %v2319_v27, %v8995_v38 }
 0x5b7   : > { %v2350_v35 = vmul.f32 %v2341_v46, %v8996_v45  ;;  %v2354_v20 = vadd.f32 %v2351_v41, %v2329_v43  ;;  %v2443_v24 = vadd.f32 %v2440_v56, %v2421_v61  ;;  %v2389_v54 = vrot.slane %v7831_v25, %v5673_v47  ;;  %v9019_v45 = vld [vmem:[#allocation86_spill] sm:$0xff]  ;;  %v9020_v56 = vld [vmem:[#allocation37_spill] sm:$0xff] }
 0x5b8   : > { %v7883_v36 = vpop.permute.xlu0 %3112  ;;  %v7885_v63 = vpop.permute.xlu1 %4329  ;;  %v4658_v61 = vmul.f32 %v4649_v51, %v9019_v45  ;;  %v4689_v41 = vrot.slane %v7778_v23, %v5680_v1  ;;  %v3994_v27 = vrot.slane %v7668_v59, %v5632_v48 }
 0x5b9   : > { %9014 = vst [vmem:[#allocation36_spill] sm:$0xff] %v7883_v36  ;;  %9015 = vst [vmem:[#allocation31_spill] sm:$0xff] %v7885_v63  ;;  %v2462_v63 = vmul.f32 %v2459_v26, %v9017_v10  ;;  %v2481_v36 = vrot.slane %v7760_v21, %v5680_v1  ;;  %v2363_v26 = vrot.slane %v7849_v18, %v5658_v3 }
 0x5ba   : > { %4630 = vrot.lane.b32.xlu0 %v4623_v0, %s5360_s30  ;;  %3935 = vrot.lane.b32.xlu1 %v3928_v33, %s8863_s18  ;;  %v3963_v0 = vmul.f32 %v3954_v32, %v8978_v19  ;;  %v2376_v46 = vadd.f32 %v2373_v17, %v2354_v20  ;;  %v2353_v21 = vadd.f32 %v2350_v35, %v2328_v40 }
 0x5bb   : > { %v2465_v43 = vadd.f32 %v2462_v63, %v2443_v24  ;;  %v2395_v60 = vmul.f32 %v2389_v54, %v9005_v5  ;;  %v2411_v19 = vrot.slane %v7831_v25, %v5632_v48  ;;  %v2484_v33 = vmul.f32 %v2481_v36, %v9020_v56 }
 0x5bc   : > { %v7903_v31 = vpop.permute.xlu0 %3148  ;;  %v7905_v38 = vpop.permute.xlu1 %4367  ;;  %v4000_v24 = vmul.f32 %v3994_v27, %v8981_v50  ;;  %v4026_v63 = vrot.slane %v7650_v15, %v5646_v55  ;;  %v2372_v40 = vmul.f32 %v2363_v26, %v9000_v29  ;;  %v2385_v35 = vrot.slane %v7849_v18, %v5673_v47 }
 0x5bd   : > { %9018 = vst [vmem:[#allocation35_spill] sm:$0xff] %v7905_v38  ;;  %v4695_v38 = vmul.f32 %v4689_v41, %v7229_v22  ;;  %v2398_v20 = vadd.f32 %v2395_v60, %v2376_v46  ;;  %v2487_v17 = vadd.f32 %v2484_v33, %v2465_v43  ;;  %v2433_v50 = vrot.slane %v7831_v25, %v5646_v55 }
 0x5be   : > { %4664 = vrot.lane.b32.xlu0 %v4658_v61, %s5360_s30  ;;  %3969 = vrot.lane.b32.xlu1 %v3963_v0, %s8863_s18  ;;  %v2375_v36 = vadd.f32 %v2372_v40, %v2353_v21  ;;  %v2394_v54 = vmul.f32 %v2385_v35, %v9005_v5  ;;  %v2417_v61 = vmul.f32 %v2411_v19, %v9009_v30 }
 0x5bf   : > { %v2523_v0 = vadd.f32 %v7494_v39, %v2487_v17  ;;  %v4035_v27 = vmul.f32 %v4026_v63, %v8983_v16  ;;  %v2407_v26 = vrot.slane %v7849_v18, %v5632_v48  ;;  %v2429_v21 = vrot.slane %v7849_v18, %v5646_v55 }
 0x5c0   : > { %v7921_v51 = vpop.permute.xlu0 %3184  ;;  %v7923_v32 = vpop.permute.xlu1 %4401  ;;  %v2420_v5 = vadd.f32 %v2417_v61, %v2398_v20  ;;  %v2397_v43 = vadd.f32 %v2394_v54, %v2375_v36  ;;  %v2455_v60 = vrot.slane %v7831_v25, %v5662_v12  ;;  %v2439_v16 = vmul.f32 %v2433_v50, %v9013_v58 }
 0x5c1   : > { %v2559_v46 = vadd.f32 %v7505_v11, %v2523_v0  ;;  %v4098_v63 = vrot.slane %v7650_v15, %v5680_v1  ;;  %v2416_v40 = vmul.f32 %v2407_v26, %v9009_v30  ;;  %v2438_v35 = vmul.f32 %v2429_v21, %v9013_v58 }
 0x5c2   : > { %4702 = vrot.lane.b32.xlu0 %v4695_v38, %s5360_s30  ;;  %4007 = vrot.lane.b32.xlu1 %v4000_v24, %s8863_s18  ;;  %v4066_v38 = vrot.slane %v7668_v59, %v5662_v12  ;;  %v2451_v20 = vrot.slane %v7849_v18, %v5662_v12  ;;  %v2442_v17 = vadd.f32 %v2439_v16, %v2420_v5  ;;  %v9021_v16 = vld [vmem:[#allocation7_spill] sm:$0xff] }
 0x5c3   : > { %v2595_v19 = vadd.f32 %v7516_v8, %v2559_v46  ;;  %v2419_v54 = vadd.f32 %v2416_v40, %v2397_v43  ;;  %v2477_v15 = vrot.slane %v7831_v25, %v5680_v1  ;;  %v2461_v30 = vmul.f32 %v2455_v60, %v9017_v10 }
 0x5c4   : > { %v7939_v29 = vpop.permute.xlu0 %3220  ;;  %v7941_v41 = vpop.permute.xlu1 %2811  ;;  %v4072_v24 = vmul.f32 %v4066_v38, %v8985_v49  ;;  %v2460_v61 = vmul.f32 %v2451_v20, %v9017_v10  ;;  %v2473_v49 = vrot.slane %v7849_v18, %v5680_v1  ;;  %v4437_v38 = vrot.slane %v7778_v23, %v5517_v6 }
 0x5c5   : > { %v2631_v36 = vadd.f32 %v7528_v53, %v2595_v19  ;;  %v2441_v26 = vadd.f32 %v2438_v35, %v2419_v54  ;;  %v2464_v18 = vadd.f32 %v2461_v30, %v2442_v17  ;;  %v2483_v10 = vmul.f32 %v2477_v15, %v9020_v56  ;;  %v9022_v35 = vld [vmem:[#allocation38_spill] sm:$0xff] }
 0x5c6   : > { %4041 = vrot.lane.b32.xlu1 %v4035_v27, %s8863_s18  ;;  %v4107_v27 = vmul.f32 %v4098_v63, %v8991_v34  ;;  %v2482_v5 = vmul.f32 %v2473_v49, %v9020_v56  ;;  %v4443_v34 = vmul.f32 %v4437_v38, %v8994_v57  ;;  %v4469_v6 = vrot.slane %v7756_v13, %v5520_v7  ;;  %v9023_v49 = vld [vmem:[#allocation40_spill] sm:$0xff] }
 0x5c7   : > { %v2667_v58 = vadd.f32 %v7546_v44, %v2631_v36  ;;  %v2463_v25 = vadd.f32 %v2460_v61, %v2441_v26  ;;  %v2516_v19 = vsel %vm587_vm1, %v9021_v16, %v7484_v14  ;;  %v2486_v63 = vadd.f32 %v2483_v10, %v2464_v18  ;;  %v9027_v10 = vld [vmem:[#allocation78_spill] sm:$0xff] }
 0x5c8   : > { %v7956_v59 = vpop.permute.xlu0 %3256  ;;  %v7958_v33 = vpop.permute.xlu1 %2847  ;;  %v2552_v57 = vsel %vm587_vm1, %v9022_v35, %v7496_v9  ;;  %v2553_v7 = vsel %vm587_vm1, %v7496_v9, %v7505_v11  ;;  %v4509_v20 = vrot.slane %v7778_v23, %v5658_v3  ;;  %v4478_v61 = vmul.f32 %v4469_v6, %v8999_v42  ;;  %v9029_v6 = vld [vmem:[#allocation43_spill] sm:$0xff] }
 0x5c9   : > { %v2703_v46 = vadd.f32 %v7560_v2, %v2667_v58  ;;  %v2485_v56 = vadd.f32 %v2482_v5, %v2463_v25  ;;  %v2588_v15 = vsel %vm587_vm1, %v9023_v49, %v7507_v37  ;;  %v2589_v9 = vsel %vm587_vm1, %v7507_v37, %v7516_v8  ;;  %v9024_v58 = vld [vmem:[#allocation18_spill] sm:$0xff]  ;;  %v9026_v37 = vld [vmem:[#allocation68_spill] sm:$0xff]  ;;  %v9034_v49 = vld [vmem:[#allocation79_spill] sm:$0xff] }
 0x5ca   : > { %4079 = vrot.lane.b32.xlu1 %v4072_v24, %s8863_s18  ;;  %v2517_v24 = vsel %vm587_vm1, %v7484_v14, %v7494_v39  ;;  %v2625_v42 = vsel %vm587_vm1, %v9024_v58, %v7528_v53  ;;  %v4541_v26 = vrot.slane %v7756_v13, %v5673_v47 }
 0x5cb   : > { %v2739_v43 = vadd.f32 %v7577_v62, %v2703_v46  ;;  %v2521_v17 = vadd.f32 %v2516_v19, %v2485_v56  ;;  %v2522_v36 = vadd.f32 %v2517_v24, %v2486_v63  ;;  %v9030_v24 = vld [vmem:[#allocation29_spill] sm:$0xff]  ;;  %v9031_v63 = vld [vmem:[#allocation34_spill] sm:$0xff] }
 0x5cc   : > { %v7976_v50 = vpop.permute.xlu0 %3292  ;;  %v7978_v0 = vpop.permute.xlu1 %2883 }
 0x5cd   : > { %v2775_v40 = vadd.f32 %v7590_v28, %v2739_v43  ;;  %v2557_v11 = vadd.f32 %v2552_v57, %v2521_v17  ;;  %v2558_v3 = vadd.f32 %v2553_v7, %v2522_v36  ;;  %v4515_v43 = vmul.f32 %v4509_v20, %v9027_v10 }
 0x5ce   : > { %4113 = vrot.lane.b32.xlu1 %v4107_v27, %s8863_s18  ;;  %v9025_v27 = vld [vmem:[#allocation42_spill] sm:$0xff]  ;;  %v2697_v57 = vsel %vm587_vm1, %v9031_v63, %v7560_v2  ;;  %v4581_v7 = vrot.slane %v7778_v23, %v5632_v48  ;;  %s5253_s18 = sshll.u32 %s5398_s11, 4  ;;  %s5254_s18 = int_to_ptr.vmem [resolvable:$false] %s5253_s18 }
 0x5cf   : > { %v2822_v14 = vadd.f32 %v7732_v52, %v2775_v40  ;;  %v2624_v38 = vsel %vm587_vm1, %v9025_v27, %v9024_v58  ;;  %v2593_v5 = vadd.f32 %v2588_v15, %v2557_v11  ;;  %v2594_v18 = vadd.f32 %v2589_v9, %v2558_v3  ;;  %v9032_v40 = vld [vmem:[#allocation45_spill] sm:$0xff]  ;;  %v9035_v9 = vld [vmem:[#allocation26_spill] sm:$0xff]  ;;  %v9036_v11 = vld [vmem:[#allocation47_spill] sm:$0xff] }
 0x5d0   : > { %v7988_v21 = vpop.permute.xlu0 %3328  ;;  %v7990_v60 = vpop.permute.xlu1 %2919  ;;  %v2696_v35 = vsel %vm587_vm1, %v9032_v40, %v9031_v63  ;;  %v4550_v15 = vmul.f32 %v4541_v26, %v9034_v49  ;;  %v2732_v3 = vsel %vm587_vm1, %v9036_v11, %v9035_v9  ;;  %v2733_v2 = vsel %vm587_vm1, %v9035_v9, %v7577_v62  ;;  %v9037_v48 = vld [vmem:[#allocation30_spill] sm:$0xff]  ;;  %v9040_v62 = vld [vmem:[#allocation85_spill] sm:$0xff]  ;;  %v9043_v63 = vld [vmem:[#allocation32_spill] sm:$0xff] }
 0x5d1   : > { %v2858_v30 = vadd.f32 %v7746_v4, %v2822_v14  ;;  %v2629_v19 = vadd.f32 %v2624_v38, %v2593_v5  ;;  %v2630_v47 = vadd.f32 %v2625_v42, %v2594_v18  ;;  %v9038_v38 = vld [vmem:[#allocation23_spill] sm:$0xff]  ;;  %v9039_v42 = vld [vmem:[#allocation49_spill] sm:$0xff]  ;;  %v4613_v18 = vrot.slane %v7756_v13, %v5646_v55  ;;  %v9047_v11 = vld [vmem:[#allocation56_spill] sm:$0xff] }
 0x5d2   : > { %4450 = vrot.lane.b32.xlu1 %v4443_v34, %s5360_s30  ;;  %v9028_v34 = vld [vmem:[#allocation19_spill] sm:$0xff]  ;;  %v2768_v5 = vsel %vm587_vm1, %v9039_v42, %v9038_v38  ;;  %v2769_v26 = vsel %vm587_vm1, %v9038_v38, %v7590_v28  ;;  %v4653_v9 = vrot.slane %v7778_v23, %v5662_v12  ;;  %v2924_v12 = vsel %vm813_vm6, %v7990_v60, %v9030_v24 }
 0x5d3   : > { %v2894_v8 = vadd.f32 %v9026_v37, %v2858_v30  ;;  %v2660_v16 = vsel %vm587_vm1, %v9029_v6, %v9028_v34  ;;  %v2661_v53 = vsel %vm587_vm1, %v9028_v34, %v7546_v44  ;;  %v9033_v44 = vld [vmem:[#allocation70_spill] sm:$0xff]  ;;  %v9041_v6 = vld [vmem:[#allocation81_spill] sm:$0xff]  ;;  %v4685_v23 = vrot.slane %v7756_v13, %v5680_v1 }
 0x5d4   : > { %v8012_v39 = vpop.permute.xlu0 %3364  ;;  %v8014_v54 = vpop.permute.xlu1 %2955  ;;  %v2665_v20 = vadd.f32 %v2660_v16, %v2629_v19  ;;  %v2666_v17 = vadd.f32 %v2661_v53, %v2630_v47  ;;  %v4587_v16 = vmul.f32 %v4581_v7, %v9041_v6  ;;  %v9042_v53 = vld [vmem:[#allocation52_spill] sm:$0xff]  ;;  %v2816_v47 = vsel %vm813_vm6, %v7941_v41, %v7732_v52 }
 0x5d5   : > { %v2930_v56 = vadd.f32 %v9030_v24, %v2894_v8  ;;  %v2815_v19 = vsel %vm813_vm6, %v9042_v53, %v7941_v41  ;;  %v2852_v7 = vsel %vm813_vm6, %v7958_v33, %v7746_v4 }
 0x5d6   : > { %4484 = vrot.lane.b32.xlu1 %v4478_v61, %s5360_s30  ;;  %v2701_v30 = vadd.f32 %v2696_v35, %v2665_v20  ;;  %v2702_v58 = vadd.f32 %v2697_v57, %v2666_v17  ;;  %v9044_v35 = vld [vmem:[#allocation54_spill] sm:$0xff]  ;;  %v9045_v20 = vld [vmem:[#allocation83_spill] sm:$0xff] }
 0x5d7   : > { %v2966_v36 = vadd.f32 %v9033_v44, %v2930_v56  ;;  %v2851_v57 = vsel %vm813_vm6, %v9044_v35, %v7958_v33  ;;  %v4622_v17 = vmul.f32 %v4613_v18, %v9045_v20  ;;  %v9049_v18 = vld [vmem:[#allocation60_spill] sm:$0xff] }
 0x5d8   : > { %v8034_v46 = vpop.permute.xlu0 %3562  ;;  %v8036_v25 = vpop.permute.xlu1 %2991  ;;  %v2737_v8 = vadd.f32 %v2732_v3, %v2701_v30  ;;  %v2738_v10 = vadd.f32 %v2733_v2, %v2702_v58  ;;  %v2887_v3 = vsel %vm813_vm6, %v9047_v11, %v7978_v0  ;;  %v2888_v2 = vsel %vm813_vm6, %v7978_v0, %v9026_v37  ;;  %v9048_v58 = vld [vmem:[#allocation58_spill] sm:$0xff] }
 0x5d9   : > { %v3002_v27 = vadd.f32 %v9037_v48, %v2966_v36  ;;  %v9046_v36 = vld [vmem:[#allocation36_spill] sm:$0xff]  ;;  %v2996_v53 = vsel %vm813_vm6, %v8036_v25, %v9037_v48 }
 0x5da   : > { %4522 = vrot.lane.b32.xlu1 %v4515_v43, %s5360_s30  ;;  %v2773_v56 = vadd.f32 %v2768_v5, %v2737_v8  ;;  %v2774_v28 = vadd.f32 %v2769_v26, %v2738_v10  ;;  %v4659_v26 = vmul.f32 %v4653_v9, %v9019_v45  ;;  %v2959_v8 = vsel %vm813_vm6, %v9049_v18, %v8014_v54  ;;  %v9054_v9 = vld [vmem:[#allocation67_spill] sm:$0xff]  ;;  %v9058_v18 = vld [vmem:[#allocation72_spill] sm:$0xff] }
 0x5db   : > { %v3038_v43 = vadd.f32 %v9040_v62, %v3002_v27  ;;  %v2923_v27 = vsel %vm813_vm6, %v9048_v58, %v7990_v60  ;;  %v2960_v60 = vsel %vm813_vm6, %v8014_v54, %v9033_v44 }
 0x5dc   : > { %v8056_v14 = vpop.permute.xlu0 %3600  ;;  %v3028_v61 = vpop.permute.xlu1 %3027  ;;  %v2820_v41 = vadd.f32 %v2815_v19, %v2773_v56  ;;  %v2821_v49 = vadd.f32 %v2816_v47, %v2774_v28  ;;  %v4694_v56 = vmul.f32 %v4685_v23, %v7229_v22  ;;  %v9052_v28 = vld [vmem:[#allocation64_spill] sm:$0xff]  ;;  %v9056_v23 = vld [vmem:[#allocation71_spill] sm:$0xff] }
 0x5dd   : > { %v3074_v40 = vadd.f32 %v9043_v63, %v3038_v43  ;;  %v9050_v43 = vld [vmem:[#allocation80_spill] sm:$0xff] }
 0x5de   : > { %4556 = vrot.lane.b32.xlu1 %v4550_v15, %s5360_s30  ;;  %v2856_v33 = vadd.f32 %v2851_v57, %v2820_v41  ;;  %v2857_v30 = vadd.f32 %v2852_v7, %v2821_v49  ;;  %v4693_v6 = vrot.slane %v9050_v43, %v5680_v1  ;;  %v3032_v1 = vsel %vm813_vm6, %v3028_v61, %v9040_v62 }
 0x5df   : > { %v3121_v52 = vadd.f32 %v9046_v36, %v3074_v40  ;;  %v3031_v40 = vsel %vm813_vm6, %v9052_v28, %v3028_v61  ;;  %v9062_v28 = vld [vmem:[#allocation75_spill] sm:$0xff] }
 0x5e0   : > { %v3064_v34 = vpop.permute.xlu1 %3063  ;;  %v8084_v55 = vpop.permute.xlu0 %3634  ;;  %v2892_v0 = vadd.f32 %v2887_v3, %v2856_v33  ;;  %v2893_v37 = vadd.f32 %v2888_v2, %v2857_v30 }
 0x5e1   : > { %v3157_v4 = vadd.f32 %v7903_v31, %v3121_v52  ;;  %v4696_v52 = vmul.f32 %v4693_v6, %v7229_v22 }
 0x5e2   : > { %4594 = vrot.lane.b32.xlu1 %v4587_v16, %s5360_s30  ;;  %v2928_v13 = vadd.f32 %v2923_v27, %v2892_v0  ;;  %v2929_v10 = vadd.f32 %v2924_v12, %v2893_v37  ;;  %v9051_v16 = vld [vmem:[#allocation62_spill] sm:$0xff] }
 0x5e3   : > { %v3193_v38 = vadd.f32 %v7921_v51, %v3157_v4  ;;  %v2995_v45 = vsel %vm813_vm6, %v9051_v16, %v8036_v25  ;;  %v9053_v25 = vld [vmem:[#allocation65_spill] sm:$0xff] }
 0x5e4   : > { %v3111_v15 = vpop.permute.xlu1 %3110  ;;  %v8114_v42 = vpop.permute.xlu0 %3672  ;;  %v2964_v54 = vadd.f32 %v2959_v8, %v2928_v13  ;;  %v2965_v44 = vadd.f32 %v2960_v60, %v2929_v10  ;;  %v3067_v48 = vsel %vm813_vm6, %v9053_v25, %v3064_v34  ;;  %v9059_v13 = vld [vmem:[#allocation73_spill] sm:$0xff] }
 0x5e5   : > { %v3229_v24 = vadd.f32 %v7939_v29, %v3193_v38  ;;  %v3114_v11 = vsel %vm1030_vm7, %v9054_v9, %v3111_v15  ;;  %v3115_v3 = vsel %vm1030_vm7, %v3111_v15, %v9046_v36  ;;  %v9057_v38 = vld [vmem:[#allocation25_spill] sm:$0xff] }
 0x5e6   : > { %4628 = vrot.lane.b32.xlu1 %v4622_v17, %s5360_s30  ;;  %v3000_v57 = vadd.f32 %v2995_v45, %v2964_v54  ;;  %v3001_v7 = vadd.f32 %v2996_v53, %v2965_v44  ;;  %v3068_v17 = vsel %vm813_vm6, %v3064_v34, %v9043_v63  ;;  %v9055_v34 = vld [vmem:[#allocation69_spill] sm:$0xff] }
 0x5e7   : > { %v3265_v19 = vadd.f32 %v7956_v59, %v3229_v24 }
 0x5e8   : > { %v3147_v5 = vpop.permute.xlu1 %3146  ;;  %v8140_v20 = vpop.permute.xlu0 %3706  ;;  %v3036_v49 = vadd.f32 %v3031_v40, %v3000_v57  ;;  %v3037_v61 = vadd.f32 %v3032_v1, %v3001_v7  ;;  %v9063_v1 = vld [vmem:[#allocation39_spill] sm:$0xff] }
 0x5e9   : > { %v3301_v35 = vadd.f32 %v7976_v50, %v3265_v19  ;;  %v3150_v22 = vsel %vm1030_vm7, %v9055_v34, %v3147_v5  ;;  %v3151_v63 = vsel %vm1030_vm7, %v3147_v5, %v7903_v31  ;;  %v9061_v19 = vld [vmem:[#allocation74_spill] sm:$0xff] }
 0x5ea   : > { %4666 = vrot.lane.b32.xlu1 %v4659_v26, %s5360_s30  ;;  %v3072_v4 = vadd.f32 %v3067_v48, %v3036_v49  ;;  %v3073_v33 = vadd.f32 %v3068_v17, %v3037_v61  ;;  %v9065_v61 = vld [vmem:[#allocation48_spill] sm:$0xff]  ;;  %v9067_v34 = vld [vmem:[#allocation6_spill] sm:$0xff] }
 0x5eb   : > { %v3337_v41 = vadd.f32 %v7988_v21, %v3301_v35 }
 0x5ec   : > { %v3183_v47 = vpop.permute.xlu1 %3182  ;;  %v3119_v30 = vadd.f32 %v3114_v11, %v3072_v4  ;;  %v3120_v58 = vadd.f32 %v3115_v3, %v3073_v33  ;;  %v8159_v27 = vpop.permute.xlu0 %3744 }
 0x5ed   : > { %v3373_v2 = vadd.f32 %v8012_v39, %v3337_v41  ;;  %v3186_v36 = vsel %vm1030_vm7, %v9056_v23, %v3183_v47  ;;  %v3187_v15 = vsel %vm1030_vm7, %v3183_v47, %v7921_v51  ;;  %v9060_v51 = vld [vmem:[#allocation22_spill] sm:$0xff]  ;;  %v9064_v41 = vld [vmem:[#allocation76_spill] sm:$0xff] }
 0x5ee   : > { %4700 = vrot.lane.b32.xlu1 %v4694_v56, %s5360_s30  ;;  %v3155_v37 = vadd.f32 %v3150_v22, %v3119_v30  ;;  %v3156_v26 = vadd.f32 %v3151_v63, %v3120_v58  ;;  %v3405_v22 = vsel %vm383_vm5, %v9067_v34, %v9060_v51  ;;  %v9068_v58 = vld [vmem:[#allocation53_spill] sm:$0xff]  ;;  %v9069_v23 = vld [vmem:[#allocation20_spill] sm:$0xff] }
 0x5ef   : > { %v3392_v0 = vadd.f32 %v9057_v38, %v3373_v2 }
 0x5f0   : > { %v3219_v62 = vpop.permute.xlu1 %3218  ;;  %v3191_v5 = vadd.f32 %v3186_v36, %v3155_v37  ;;  %v3192_v60 = vadd.f32 %v3187_v15, %v3156_v26  ;;  %v8175_v16 = vpop.permute.xlu0 %3778  ;;  %v3424_v36 = vsel %vm383_vm5, %v9069_v23, %v9063_v1  ;;  %v9070_v37 = vld [vmem:[#allocation44_spill] sm:$0xff] }
 0x5f1   : > { %v3222_v8 = vsel %vm1030_vm7, %v9058_v18, %v3219_v62  ;;  %v3223_v31 = vsel %vm1030_vm7, %v3219_v62, %v7939_v29  ;;  %v3411_v6 = vadd.f32 %v9060_v51, %v3392_v0  ;;  %v3443_v26 = vsel %vm383_vm5, %v9070_v37, %v9065_v61 }
 0x5f2   : > { %4704 = vrot.lane.b32.xlu1 %v4696_v52, %s5360_s30  ;;  %v3227_v45 = vadd.f32 %v3222_v8, %v3191_v5  ;;  %v3228_v53 = vadd.f32 %v3223_v31, %v3192_v60  ;;  %v9071_v31 = vld [vmem:[#allocation119_spill] sm:$0xff] }
 0x5f3   : > { %v3430_v35 = vadd.f32 %v9063_v1, %v3411_v6  ;;  %v9072_v60 = vld [vmem:[#allocation51_spill] sm:$0xff]  ;;  %v9077_v1 = vld [vmem:[#allocation9_spill] sm:$0xff] }
 0x5f4   : > { %v3255_v12 = vpop.permute.xlu1 %3254  ;;  %v8186_v25 = vpop.permute.xlu0 %3816  ;;  %v9073_v6 = vld [vmem:[#allocation59_spill] sm:$0xff] }
 0x5f5   : > { %v3258_v10 = vsel %vm1030_vm7, %v9059_v13, %v3255_v12  ;;  %v3259_v43 = vsel %vm1030_vm7, %v3255_v12, %v7956_v59  ;;  %v3449_v62 = vadd.f32 %v9065_v61, %v3430_v35 }
 0x5f6   : > { %v3263_v44 = vadd.f32 %v3258_v10, %v3227_v45  ;;  %v3264_v47 = vadd.f32 %v3259_v43, %v3228_v53  ;;  %v3481_v45 = vsel %vm383_vm5, %v9073_v6, %v9071_v31  ;;  %v9074_v53 = vld [vmem:[#allocation66_spill] sm:$0xff] }
 0x5f7   : > { %v3468_v12 = vadd.f32 %v9068_v58, %v3449_v62 }
 0x5f8   : > { %v3291_v24 = vpop.permute.xlu1 %3290  ;;  %v8200_v63 = vpop.permute.xlu0 %3861 }
 0x5f9   : > { %v3294_v54 = vsel %vm1030_vm7, %v9061_v19, %v3291_v24  ;;  %v3295_v29 = vsel %vm1030_vm7, %v3291_v24, %v7976_v50  ;;  %v3487_v5 = vadd.f32 %v9071_v31, %v3468_v12  ;;  %v3462_v24 = vsel %vm383_vm5, %v9072_v60, %v9068_v58 }
 0x5fa   : > { %v3299_v57 = vadd.f32 %v3294_v54, %v3263_v44  ;;  %v3300_v7 = vadd.f32 %v3295_v29, %v3264_v47  ;;  %v9075_v44 = vld [vmem:[#allocation63_spill] sm:$0xff] }
 0x5fb   : > { %v3506_v19 = vadd.f32 %v9074_v53, %v3487_v5  ;;  %v3500_v47 = vsel %vm383_vm5, %v9075_v44, %v9074_v53 }
 0x5fc   : > { %v3327_v56 = vpop.permute.xlu1 %3326  ;;  %v8216_v13 = vpop.permute.xlu0 %3899 }
 0x5fd   : > { %v3330_v40 = vsel %vm1030_vm7, %v9062_v28, %v3327_v56  ;;  %v3331_v59 = vsel %vm1030_vm7, %v3327_v56, %v7988_v21  ;;  %v9066_v21 = vld [vmem:[#allocation28_spill] sm:$0xff] }
 0x5fe   : > { %v3335_v48 = vadd.f32 %v3330_v40, %v3299_v57  ;;  %v3336_v17 = vadd.f32 %v3331_v59, %v3300_v7  ;;  %v3386_v3 = vsel %vm383_vm5, %v9066_v21, %v9057_v38  ;;  %v9076_v59 = vld [vmem:[#allocation84_spill] sm:$0xff]  ;;  %v9078_v57 = vld [vmem:[#allocation102_spill] sm:$0xff] }
 0x5ff   : > { %v3519_v35 = vsel %vm383_vm5, %v9077_v1, %v9076_v59 }
 0x600   : > { %v3363_v52 = vpop.permute.xlu1 %3362 }
 0x601   : > { %v3366_v50 = vsel %vm1030_vm7, %v9064_v41, %v3363_v52  ;;  %v3367_v49 = vsel %vm1030_vm7, %v3363_v52, %v8012_v39 }
 0x602   : > { %v3371_v9 = vadd.f32 %v3366_v50, %v3335_v48  ;;  %v3372_v11 = vadd.f32 %v3367_v49, %v3336_v17  ;;  %v8233_v48 = vpop.permute.xlu0 %3933  ;;  %v3525_v17 = vadd.f32 %v9076_v59, %v3506_v19 }
 0x604   : > { %v3390_v2 = vadd.f32 %v9066_v21, %v3371_v9  ;;  %v3391_v4 = vadd.f32 %v3386_v3, %v3372_v11  ;;  %v3565_v33 = vpop.permute.xlu1 %3564  ;;  %v9079_v21 = vld [vmem:[#allocation87_spill] sm:$0xff] }
 0x605   : > { %v3569_v7 = vsel %vm1397_vm8, %v3565_v33, %v9078_v57  ;;  %v3568_v62 = vsel %vm1397_vm8, %v8034_v46, %v3565_v33  ;;  %v3605_v3 = vsel %vm1397_vm8, %v8056_v14, %v9079_v21 }
 0x606   : > { %v3409_v39 = vadd.f32 %v9067_v34, %v3390_v2  ;;  %v3410_v30 = vadd.f32 %v3405_v22, %v3391_v4  ;;  %v3575_v50 = vadd.f32 %v3569_v7, %v3525_v17  ;;  %v9080_v2 = vld [vmem:[#allocation103_spill] sm:$0xff]  ;;  %v8245_v34 = vpop.permute.xlu0 %3971 }
 0x608   : > { %v3428_v15 = vadd.f32 %v9069_v23, %v3409_v39  ;;  %v3429_v38 = vadd.f32 %v3424_v36, %v3410_v30  ;;  %v3599_v0 = vpop.permute.xlu1 %3598  ;;  %v3611_v22 = vadd.f32 %v3605_v3, %v3575_v50  ;;  %v9081_v36 = vld [vmem:[#allocation88_spill] sm:$0xff] }
 0x609   : > { %v3604_v58 = vsel %vm1397_vm8, %v3599_v0, %v8056_v14 }
 0x60a   : > { %v3447_v18 = vadd.f32 %v9070_v37, %v3428_v15  ;;  %v3448_v8 = vadd.f32 %v3443_v26, %v3429_v38  ;;  %v3677_v15 = vsel %vm1397_vm8, %v8114_v42, %v9081_v36  ;;  %v9082_v37 = vld [vmem:[#allocation104_spill] sm:$0xff] }
 0x60c   : > { %v3467_v10 = vadd.f32 %v3462_v24, %v3448_v8  ;;  %v3466_v43 = vadd.f32 %v9072_v60, %v3447_v18  ;;  %v3637_v51 = vpop.permute.xlu1 %3636  ;;  %v4006_v8 = vpop.permute.xlu0 %4005 }
 0x60d   : > { %v3641_v4 = vsel %vm1397_vm8, %v3637_v51, %v9080_v2  ;;  %v3640_v38 = vsel %vm1397_vm8, %v8084_v55, %v3637_v51 }
 0x60e   : > { %v3486_v54 = vadd.f32 %v3481_v45, %v3467_v10  ;;  %v3485_v29 = vadd.f32 %v9073_v6, %v3466_v43  ;;  %v9083_v43 = vld [vmem:[#allocation89_spill] sm:$0xff] }
 0x60f   : > { %v3749_v6 = vsel %vm1397_vm8, %v8159_v27, %v9083_v43 }
 0x610   : > { %v3505_v56 = vadd.f32 %v3500_v47, %v3486_v54  ;;  %v3504_v28 = vadd.f32 %v9075_v44, %v3485_v29  ;;  %v3671_v40 = vpop.permute.xlu1 %3670  ;;  %v4044_v45 = vpop.permute.xlu0 %4043 }
 0x611   : > { %v3676_v60 = vsel %vm1397_vm8, %v3671_v40, %v8114_v42 }
 0x612   : > { %v3524_v52 = vadd.f32 %v3519_v35, %v3505_v56  ;;  %v3523_v41 = vadd.f32 %v9077_v1, %v3504_v28  ;;  %v9085_v56 = vld [vmem:[#allocation90_spill] sm:$0xff] }
 0x613   : > { %v3821_v28 = vsel %vm1397_vm8, %v8186_v25, %v9085_v56  ;;  %v9086_v1 = vld [vmem:[#allocation106_spill] sm:$0xff] }
 0x614   : > { %v3573_v49 = vadd.f32 %v8034_v46, %v3523_v41  ;;  %v3709_v61 = vpop.permute.xlu1 %3708  ;;  %v3574_v9 = vadd.f32 %v3568_v62, %v3524_v52  ;;  %v3647_v46 = vadd.f32 %v3641_v4, %v3611_v22  ;;  %v4078_v57 = vpop.permute.xlu0 %4077 }
 0x615   : > { %v3713_v26 = vsel %vm1397_vm8, %v3709_v61, %v9082_v37  ;;  %v3712_v54 = vsel %vm1397_vm8, %v8140_v20, %v3709_v61  ;;  %v9087_v61 = vld [vmem:[#allocation91_spill] sm:$0xff] }
 0x616   : > { %v3609_v11 = vadd.f32 %v3599_v0, %v3573_v49  ;;  %v3610_v12 = vadd.f32 %v3604_v58, %v3574_v9  ;;  %v3683_v5 = vadd.f32 %v3677_v15, %v3647_v46  ;;  %v3904_v62 = vsel %vm1615_vm9, %v8216_v13, %v9087_v61  ;;  %v9090_v15 = vld [vmem:[#allocation108_spill] sm:$0xff] }
 0x618   : > { %v3645_v39 = vadd.f32 %v8084_v55, %v3609_v11  ;;  %v3743_v30 = vpop.permute.xlu1 %3742  ;;  %v3646_v31 = vadd.f32 %v3640_v38, %v3610_v12  ;;  %v3719_v14 = vadd.f32 %v3713_v26, %v3683_v5  ;;  %v9084_v55 = vld [vmem:[#allocation105_spill] sm:$0xff]  ;;  %v9088_v11 = vld [vmem:[#allocation107_spill] sm:$0xff]  ;;  %v4116_v3 = vpop.permute.xlu0 %4115 }
 0x61a   : > { %v3681_v33 = vadd.f32 %v3671_v40, %v3645_v39  ;;  %v3682_v10 = vadd.f32 %v3676_v60, %v3646_v31  ;;  %v3755_v53 = vadd.f32 %v3749_v6, %v3719_v14  ;;  %v3748_v40 = vsel %vm1397_vm8, %v3743_v30, %v8159_v27 }
 0x61c   : > { %v3781_v23 = vpop.permute.xlu1 %3780  ;;  %v3717_v18 = vadd.f32 %v8140_v20, %v3681_v33  ;;  %v3718_v44 = vadd.f32 %v3712_v54, %v3682_v10  ;;  %v8297_v38 = vpop.permute.xlu0 %4448 }
 0x61d   : > { %v3785_v51 = vsel %vm1397_vm8, %v3781_v23, %v9084_v55  ;;  %v3784_v41 = vsel %vm1397_vm8, %v8175_v16, %v3781_v23 }
 0x61e   : > { %v3753_v24 = vadd.f32 %v3743_v30, %v3717_v18  ;;  %v3791_v47 = vadd.f32 %v3785_v51, %v3755_v53  ;;  %v3754_v7 = vadd.f32 %v3748_v40, %v3718_v44  ;;  %v9094_v40 = vld [vmem:[#allocation110_spill] sm:$0xff] }
 0x620   : > { %v3815_v0 = vpop.permute.xlu1 %3814  ;;  %v3789_v29 = vadd.f32 %v8175_v16, %v3753_v24  ;;  %v3827_v17 = vadd.f32 %v3821_v28, %v3791_v47  ;;  %v3790_v49 = vadd.f32 %v3784_v41, %v3754_v7  ;;  %v9091_v24 = vld [vmem:[#allocation93_spill] sm:$0xff]  ;;  %v8305_v6 = vpop.permute.xlu0 %4486  ;;  %v9096_v41 = vld [vmem:[#allocation95_spill] sm:$0xff] }
 0x621   : > { %v3820_v27 = vsel %vm1397_vm8, %v3815_v0, %v8186_v25  ;;  %v9089_v25 = vld [vmem:[#allocation92_spill] sm:$0xff] }
 0x622   : > { %v3825_v59 = vadd.f32 %v3815_v0, %v3789_v29  ;;  %v3826_v22 = vadd.f32 %v3820_v27, %v3790_v49  ;;  %v3976_v33 = vsel %vm1615_vm9, %v8245_v34, %v9089_v25  ;;  %v9104_v25 = vld [vmem:[#allocation41_spill] sm:$0xff] }
 0x624   : > { %v3864_v19 = vpop.permute.xlu1 %3863  ;;  %v3872_v50 = vadd.f32 %v8200_v63, %v3825_v59  ;;  %v9095_v59 = vld [vmem:[#allocation77_spill] sm:$0xff] }
 0x625   : > { %v3868_v35 = vsel %vm1615_vm9, %v3864_v19, %v9086_v1  ;;  %v3867_v16 = vsel %vm1615_vm9, %v8200_v63, %v3864_v19  ;;  %v9092_v19 = vld [vmem:[#allocation109_spill] sm:$0xff]  ;;  %v4156_v1 = vsel %vm1824_vm10, %v9095_v59, %v9094_v40  ;;  %v9114_v40 = vld [vmem:[#allocation98_spill] sm:$0xff] }
 0x626   : > { %v3874_v20 = vadd.f32 %v3868_v35, %v3827_v17  ;;  %v3873_v12 = vadd.f32 %v3867_v16, %v3826_v22  ;;  %v8316_v17 = vpop.permute.xlu0 %4520 }
 0x628   : > { %v3898_v42 = vpop.permute.xlu1 %3897  ;;  %v3910_v2 = vadd.f32 %v3904_v62, %v3874_v20 }
 0x629   : > { %v3908_v9 = vadd.f32 %v3898_v42, %v3872_v50  ;;  %v3903_v30 = vsel %vm1615_vm9, %v3898_v42, %v8216_v13  ;;  %v9097_v50 = vld [vmem:[#allocation8_spill] sm:$0xff] }
 0x62a   : > { %v3909_v37 = vadd.f32 %v3903_v30, %v3873_v12  ;;  %v4192_v49 = vsel %vm1824_vm10, %v9097_v50, %v9096_v41  ;;  %v9103_v12 = vld [vmem:[#allocation46_spill] sm:$0xff] }
 0x62b   : > { %v3944_v58 = vadd.f32 %v8233_v48, %v3908_v9 }
 0x62c   : > { %v3936_v52 = vpop.permute.xlu1 %3935 }
 0x62d   : > { %v3940_v21 = vsel %vm1615_vm9, %v3936_v52, %v9088_v11  ;;  %v3939_v23 = vsel %vm1615_vm9, %v8233_v48, %v3936_v52  ;;  %v4048_v48 = vsel %vm1615_vm9, %v4044_v45, %v9091_v24  ;;  %v9108_v24 = vld [vmem:[#allocation97_spill] sm:$0xff] }
 0x62e   : > { %v3946_v39 = vadd.f32 %v3940_v21, %v3910_v2  ;;  %v3945_v18 = vadd.f32 %v3939_v23, %v3909_v37  ;;  %v9099_v21 = vld [vmem:[#allocation82_spill] sm:$0xff]  ;;  %v9100_v2 = vld [vmem:[#allocation111_spill] sm:$0xff] }
 0x630   : > { %v3970_v4 = vpop.permute.xlu1 %3969  ;;  %v3982_v26 = vadd.f32 %v3976_v33, %v3946_v39 }
 0x631   : > { %v3980_v36 = vadd.f32 %v3970_v4, %v3944_v58  ;;  %v3975_v13 = vsel %vm1615_vm9, %v3970_v4, %v8245_v34  ;;  %v9101_v4 = vld [vmem:[#allocation27_spill] sm:$0xff]  ;;  %v9102_v58 = vld [vmem:[#allocation96_spill] sm:$0xff] }
 0x632   : > { %v3981_v60 = vadd.f32 %v3975_v13, %v3945_v18  ;;  %v4228_v16 = vsel %vm1824_vm10, %v9101_v4, %v9100_v2  ;;  %v4227_v33 = vsel %vm1824_vm10, %v9104_v25, %v9101_v4  ;;  %v9106_v18 = vld [vmem:[#allocation112_spill] sm:$0xff] }
 0x633   : > { %v4016_v0 = vadd.f32 %v4006_v8, %v3980_v36  ;;  %v4559_v36 = vpop.permute.xlu0 %4558 }
 0x634   : > { %v4008_v46 = vpop.permute.xlu1 %4007 }
 0x635   : > { %v4012_v63 = vsel %vm1615_vm9, %v4008_v46, %v9090_v15  ;;  %v4011_v14 = vsel %vm1615_vm9, %v4006_v8, %v4008_v46  ;;  %v9093_v8 = vld [vmem:[#allocation94_spill] sm:$0xff]  ;;  %v4264_v46 = vsel %vm1824_vm10, %v9103_v12, %v9102_v58 }
 0x636   : > { %v4018_v31 = vadd.f32 %v4012_v63, %v3982_v26  ;;  %v4017_v55 = vadd.f32 %v4011_v14, %v3981_v60  ;;  %v4120_v47 = vsel %vm1615_vm9, %v4116_v3, %v9093_v8  ;;  %v9105_v26 = vld [vmem:[#allocation24_spill] sm:$0xff]  ;;  %v9113_v8 = vld [vmem:[#allocation35_spill] sm:$0xff] }
 0x637   : > { %v4263_v13 = vsel %vm1824_vm10, %v9105_v26, %v9103_v12 }
 0x638   : > { %v4042_v5 = vpop.permute.xlu1 %4041  ;;  %v4054_v51 = vadd.f32 %v4048_v48, %v4018_v31  ;;  %v9107_v31 = vld [vmem:[#allocation33_spill] sm:$0xff]  ;;  %v9109_v48 = vld [vmem:[#allocation50_spill] sm:$0xff] }
 0x639   : > { %v4047_v10 = vsel %vm1615_vm9, %v4042_v5, %v4044_v45  ;;  %v4052_v43 = vadd.f32 %v4042_v5, %v4016_v0  ;;  %v4300_v5 = vsel %vm1824_vm10, %v9107_v31, %v9106_v18 }
 0x63a   : > { %v4053_v29 = vadd.f32 %v4047_v10, %v4017_v55  ;;  %v4336_v10 = vsel %vm1824_vm10, %v9109_v48, %v9108_v24 }
 0x63b   : > { %v4088_v42 = vadd.f32 %v4078_v57, %v4052_v43  ;;  %v9110_v43 = vld [vmem:[#allocation55_spill] sm:$0xff] }
 0x63c   : > { %v4080_v53 = vpop.permute.xlu1 %4079  ;;  %v4299_v55 = vsel %vm1824_vm10, %v9110_v43, %v9107_v31 }
 0x63d   : > { %v4083_v34 = vsel %vm1615_vm9, %v4078_v57, %v4080_v53  ;;  %v4084_v54 = vsel %vm1615_vm9, %v4080_v53, %v9092_v19  ;;  %v9098_v57 = vld [vmem:[#allocation21_spill] sm:$0xff] }
 0x63e   : > { %v4090_v44 = vadd.f32 %v4084_v54, %v4054_v51  ;;  %v4089_v56 = vadd.f32 %v4083_v34, %v4053_v29  ;;  %v4155_v61 = vsel %vm1824_vm10, %v9098_v57, %v9095_v59  ;;  %v9111_v54 = vld [vmem:[#allocation31_spill] sm:$0xff]  ;;  %v9115_v59 = vld [vmem:[#allocation61_spill] sm:$0xff] }
 0x63f   : > { %v4335_v29 = vsel %vm1824_vm10, %v9111_v54, %v9109_v48 }
 0x640   : > { %v4126_v28 = vadd.f32 %v4120_v47, %v4090_v44  ;;  %v4114_v45 = vpop.permute.xlu1 %4113  ;;  %v9112_v44 = vld [vmem:[#allocation113_spill] sm:$0xff] }
 0x641   : > { %v4119_v35 = vsel %vm1615_vm9, %v4114_v45, %v4116_v3  ;;  %v4124_v7 = vadd.f32 %v4114_v45, %v4088_v42  ;;  %v4191_v3 = vsel %vm1824_vm10, %v9099_v21, %v9097_v50  ;;  %v4372_v47 = vsel %vm1824_vm10, %v9113_v8, %v9112_v44 }
 0x642   : > { %v4162_v20 = vadd.f32 %v4156_v1, %v4126_v28  ;;  %v4125_v52 = vadd.f32 %v4119_v35, %v4089_v56  ;;  %v4593_v56 = vpop.permute.xlu0 %4592  ;;  %v4408_v1 = vsel %vm1824_vm10, %v9115_v59, %v9114_v40  ;;  %v9116_v35 = vld [vmem:[#allocation57_spill] sm:$0xff] }
 0x643   : > { %v4160_v62 = vadd.f32 %v9098_v57, %v4124_v7  ;;  %v4371_v7 = vsel %vm1824_vm10, %v9116_v35, %v9113_v8  ;;  %v9117_v57 = vld [vmem:[#allocation114_spill] sm:$0xff]  ;;  %v9123_v8 = vld [vmem:[#allocation117_spill] sm:$0xff] }
 0x644   : > { %v4198_v27 = vadd.f32 %v4192_v49, %v4162_v20  ;;  %v4161_v9 = vadd.f32 %v4155_v61, %v4125_v52  ;;  %v4451_v11 = vpop.permute.xlu1 %4450  ;;  %v4407_v49 = vsel %vm1824_vm10, %v7923_v32, %v9115_v59 }
 0x645   : > { %v4196_v22 = vadd.f32 %v9099_v21, %v4160_v62  ;;  %v4455_v61 = vsel %vm2040_vm11, %v4451_v11, %v9117_v57  ;;  %v9118_v21 = vld [vmem:[#allocation99_spill] sm:$0xff]  ;;  %v4454_v2 = vsel %vm2040_vm11, %v8297_v38, %v4451_v11  ;;  %v9124_v57 = vmov 0  }
 0x646   : > { %v4234_v39 = vadd.f32 %v4228_v16, %v4198_v27  ;;  %v4197_v30 = vadd.f32 %v4191_v3, %v4161_v9  ;;  %v4491_v3 = vsel %vm2040_vm11, %v8305_v6, %v9118_v21  ;;  %v4631_v16 = vpop.permute.xlu0 %4630 }
 0x647   : > { %v4232_v23 = vadd.f32 %v9104_v25, %v4196_v22 }
 0x648   : > { %v4233_v15 = vadd.f32 %v4227_v33, %v4197_v30  ;;  %v4270_v63 = vadd.f32 %v4264_v46, %v4234_v39  ;;  %v4485_v37 = vpop.permute.xlu1 %4484 }
 0x649   : > { %v4268_v14 = vadd.f32 %v9105_v26, %v4232_v23  ;;  %v4490_v58 = vsel %vm2040_vm11, %v4485_v37, %v8305_v6  ;;  %v9120_v23 = vld [vmem:[#allocation100_spill] sm:$0xff] }
 0x64a   : > { %v4269_v0 = vadd.f32 %v4263_v13, %v4233_v15  ;;  %v4306_v60 = vadd.f32 %v4300_v5, %v4270_v63  ;;  %v4563_v15 = vsel %vm2040_vm11, %v4559_v36, %v9120_v23  ;;  %v9127_v23 = vmov 3  }
 0x64b   : > { %v4304_v51 = vadd.f32 %v9110_v43, %v4268_v14  ;;  %v9121_v14 = vld [vmem:[#allocation116_spill] sm:$0xff] }
 0x64c   : > { %v4342_v53 = vadd.f32 %v4336_v10, %v4306_v60  ;;  %v4305_v34 = vadd.f32 %v4299_v55, %v4269_v0  ;;  %v4523_v19 = vpop.permute.xlu1 %4522 }
 0x64d   : > { %v4340_v42 = vadd.f32 %v9111_v54, %v4304_v51  ;;  %v4526_v11 = vsel %vm2040_vm11, %v8316_v17, %v4523_v19  ;;  %v9122_v51 = vld [vmem:[#allocation101_spill] sm:$0xff] }
 0x64e   : > { %v4378_v28 = vadd.f32 %v4372_v47, %v4342_v53  ;;  %v4341_v45 = vadd.f32 %v4335_v29, %v4305_v34  ;;  %v4635_v53 = vsel %vm2040_vm11, %v4631_v16, %v9122_v51 }
 0x64f   : > { %v4376_v20 = vadd.f32 %v9116_v35, %v4340_v42 }
 0x650   : > { %v4414_v52 = vadd.f32 %v4408_v1, %v4378_v28  ;;  %v4377_v41 = vadd.f32 %v4371_v7, %v4341_v45  ;;  %v4557_v50 = vpop.permute.xlu1 %4556 }
 0x651   : > { %v4412_v62 = vadd.f32 %v7923_v32, %v4376_v20  ;;  %v9119_v32 = vld [vmem:[#allocation115_spill] sm:$0xff]  ;;  %v4562_v18 = vsel %vm2040_vm11, %v4557_v50, %v4559_v36 }
 0x652   : > { %v4413_v27 = vadd.f32 %v4407_v49, %v4377_v41  ;;  %v4461_v9 = vadd.f32 %v4455_v61, %v4414_v52  ;;  %v4527_v46 = vsel %vm2040_vm11, %v4523_v19, %v9119_v32  ;;  %v362_v49 = vld [vmem:[%s8512_s3] sm:$0xff] }
 0x653   : > { %v4459_v4 = vadd.f32 %v8297_v38, %v4412_v62 }
 0x654   : > { %v4460_v22 = vadd.f32 %v4454_v2, %v4413_v27  ;;  %v4497_v39 = vadd.f32 %v4491_v3, %v4461_v9  ;;  %v4595_v30 = vpop.permute.xlu1 %4594 }
 0x655   : > { %v4495_v12 = vadd.f32 %v4485_v37, %v4459_v4  ;;  %v4665_v37 = vpop.permute.xlu0 %4664  ;;  %v4598_v5 = vsel %vm2040_vm11, %v4593_v56, %v4595_v30  ;;  %v4599_v0 = vsel %vm2040_vm11, %v4595_v30, %v9121_v14  ;;  %v365_v30 = vld [vmem:[%s8515_s6] sm:$0xff] }
 0x656   : > { %v4496_v25 = vadd.f32 %v4490_v58, %v4460_v22  ;;  %v4533_v33 = vadd.f32 %v4527_v46, %v4497_v39  ;;  %v366_v58 = vld [vmem:[%s8516_s7] sm:$0xff] }
 0x657   : > { %v4531_v38 = vadd.f32 %v8316_v17, %v4495_v12  ;;  %v9129_v14 = vld [vmem:[#allocation10_spill] sm:$0xff] }
 0x658   : > { %v4532_v63 = vadd.f32 %v4526_v11, %v4496_v25  ;;  %v4569_v26 = vadd.f32 %v4563_v15, %v4533_v33  ;;  %v4629_v13 = vpop.permute.xlu1 %4628  ;;  %v9125_v25 = vmov 1   ;;  %v9126_v33 = vmov 2  }
 0x659   : > { %v4567_v6 = vadd.f32 %v4557_v50, %v4531_v38  ;;  %v4634_v43 = vsel %vm2040_vm11, %v4629_v13, %v4631_v16  ;;  %v4703_v19 = vpop.permute.xlu0 %4702 }
 0x65a   : > { %v4568_v31 = vadd.f32 %v4562_v18, %v4532_v63  ;;  %v4605_v48 = vadd.f32 %v4599_v0, %v4569_v26 }
 0x65b   : > { %v4603_v60 = vadd.f32 %v4593_v56, %v4567_v6 }
 0x65c   : > { %v4604_v24 = vadd.f32 %v4598_v5, %v4568_v31  ;;  %v4667_v10 = vpop.permute.xlu1 %4666  ;;  %v4641_v54 = vadd.f32 %v4635_v53, %v4605_v48  ;;  %v9133_v53 = vld [vmem:[#allocation14_spill] sm:$0xff] }
 0x65d   : > { %v4639_v17 = vadd.f32 %v4629_v13, %v4603_v60  ;;  %v4670_v36 = vsel %vm2040_vm11, %v4665_v37, %v4667_v10  ;;  %v4671_v47 = vsel %vm2040_vm11, %v4667_v10, %v9123_v8  ;;  %v9130_v60 = vld [vmem:[#allocation13_spill] sm:$0xff]  ;;  %v9131_v10 = vld [vmem:[#allocation16_spill] sm:$0xff] }
 0x65e   : > { %v4640_v55 = vadd.f32 %v4634_v43, %v4604_v24  ;;  %v4677_v45 = vadd.f32 %v4671_v47, %v4641_v54  ;;  %v9135_v8 = vld [vmem:[#allocation17_spill] sm:$0xff] }
 0x65f   : > { %v4675_v34 = vadd.f32 %v4665_v37, %v4639_v17  ;;  %v9128_v37 = vld [vmem:[#allocation12_spill] sm:$0xff]  ;;  %v9132_v17 = vld [vmem:[#allocation11_spill] sm:$0xff] }
 0x660   : > { %v4676_v29 = vadd.f32 %v4670_v36, %v4640_v55  ;;  %v4701_v44 = vpop.permute.xlu1 %4700 }
 0x661   : > { %v4706_v42 = vsel %vm2040_vm11, %v4701_v44, %v4703_v19  ;;  %v4711_v56 = vadd.f32 %v4701_v44, %v4675_v34  ;;  %v9134_v34 = vld [vmem:[#allocation15_spill] sm:$0xff] }
 0x662   : > { %v4712_v28 = vadd.f32 %v4706_v42, %v4676_v29 }
 0x663   : > { %4717 = vrot.lane.b32.xlu0 %v4711_v56, %s5350_s25 }
 0x664   : > { %v4705_v40 = vpop.permute.xlu1 %4704  ;;  %4719 = vrot.lane.b32.xlu1 %v4712_v28, %s5350_s25 }
 0x665   : > { %v4707_v59 = vsel %vm2040_vm11, %v4703_v19, %v4705_v40 }
 0x666   : > { %v4713_v1 = vadd.f32 %v4707_v59, %v4677_v45 }
 0x668   : > { %4721 = vrot.lane.b32.xlu0 %v4713_v1, %s5350_s25 }
 0x6d5   : > { %v4718_v35 = vpop.permute.xlu0 %4717 }
 0x6d6   : > { %v4720_v7 = vpop.permute.xlu1 %4719 }
 0x6d7   : > { %v4723_v52 = vsel %vm1989_vm4, %v4718_v35, %v4720_v7 }
 0x6da   : > { %v4722_v20 = vpop.permute.xlu0 %4721 }
 0x6db   : > { %v4724_v41 = vsel %vm1989_vm4, %v4720_v7, %v4722_v20 }
 0x6dc   : > { %v4727_v50 = vadd.f32 %v4724_v41, %v4723_v52 }
 0x6de   : > { %4728 = vadd.xlane.f32.xlu1 %v4727_v50 }
 0x6ef   : > { %4813 = vperm.xlu1 %5241, %v362_v49  }
 0x6f3   : > { %5242 = vset.pattern.permute.xlu1 %v9124_v57 }
 0x6f4   : > { %4773 = vperm.xlu1 %5242, %v365_v30  }
 0x6f8   : > { %4781 = vperm.xlu1 %5242, %v366_v58  }
 0x76b   : > { %v4729_v61 = vpop.xlane.xlu1 %4728 }
 0x76c   : > { %v4730_v62 = vrot.slane %v4729_v61, 4 }
 0x76e   : > { %v4731_v27 = vadd.f32 %v4730_v62, %v4729_v61 }
 0x76f   : > { %v4814_v5 = vpop.permute.xlu1 %4813 }
 0x770   : > { %v4732_v9 = vrot.slane %v4731_v27, 2  ;;  %v4816_v43 = vmul.f32 %v4814_v5, %v9131_v10  ;;  %v4817_v47 = vmul.f32 %v4814_v5, %v9135_v8 }
 0x772   : > { %v4733_v21 = vadd.f32 %v4732_v9, %v4731_v27 }
 0x773   : > { %v4774_v20 = vpop.permute.xlu1 %4773 }
 0x774   : > { %v4734_v3 = vrot.slane %v4733_v21, 1 }
 0x776   : > { %v4735_v2 = vadd.f32 %v4734_v3, %v4733_v21 }
 0x777   : > { %v4782_v50 = vpop.permute.xlu1 %4781 }
 0x778   : > { %v4736_v4 = vmul.f32 0.00048828125, %v4735_v2 }
 0x77a   : > { %v4737_v16 = vsub.f32 %v4711_v56, %v4736_v4  ;;  %v4738_v39 = vsub.f32 %v4712_v28, %v4736_v4  ;;  %v4739_v32 = vsub.f32 %v4713_v1, %v4736_v4 }
 0x77c   : > { %v4740_v22 = vmul.f32 %v4737_v16, %v4737_v16  ;;  %v4741_v12 = vmul.f32 %v4738_v39, %v4738_v39  ;;  %v4742_v46 = vmul.f32 %v4739_v32, %v4739_v32 }
 0x77e   : > { %4746 = vrot.lane.b32.xlu0 %v4740_v22, %s5350_s25 }
 0x782   : > { %4748 = vrot.lane.b32.xlu0 %v4741_v12, %s5350_s25 }
 0x786   : > { %4750 = vrot.lane.b32.xlu0 %v4742_v46, %s5350_s25 }
 0x78a   : > { %4789 = vperm.xlu0 %5238, %v362_v49  }
 0x78e   : > { %5239 = vset.pattern.permute.xlu0 %v9125_v25 }
 0x78f   : > { %4797 = vperm.xlu0 %5239, %v362_v49  }
 0x793   : > { %5240 = vset.pattern.permute.xlu0 %v9126_v33 }
 0x794   : > { %4805 = vperm.xlu0 %5240, %v362_v49  }
 0x798   : > { %5243 = vset.pattern.permute.xlu0 %v9127_v23 }
 0x7f0   : > { %v4747_v15 = vpop.permute.xlu0 %4746 }
 0x7f4   : > { %v4749_v11 = vpop.permute.xlu0 %4748 }
 0x7f5   : > { %v4752_v63 = vsel %vm1989_vm4, %v4747_v15, %v4749_v11 }
 0x7f8   : > { %v4751_v38 = vpop.permute.xlu0 %4750 }
 0x7f9   : > { %v4753_v26 = vsel %vm1989_vm4, %v4749_v11, %v4751_v38 }
 0x7fa   : > { %v4756_v13 = vadd.f32 %v4753_v26, %v4752_v63  ;;  %v9136_v63 = vld [vmem:[#allocation118_spill] sm:$0xff] }
 0x7fc   : > { %4757 = vadd.xlane.f32.xlu0 %v4756_v13 }
 0x809   : > { %v4790_v18 = vpop.permute.xlu0 %4789 }
 0x80a   : > { %v4792_v0 = vmul.f32 %v4790_v18, %v9129_v14  ;;  %v4793_v55 = vmul.f32 %v4790_v18, %v9132_v17 }
 0x80e   : > { %v4798_v6 = vpop.permute.xlu0 %4797 }
 0x80f   : > { %v4800_v31 = vmul.f32 %v4798_v6, %v9128_v37  ;;  %v4801_v24 = vmul.f32 %v4798_v6, %v9130_v60 }
 0x811   : > { %v4802_v51 = vadd.f32 %v4800_v31, %v4792_v0  ;;  %v4803_v54 = vadd.f32 %v4801_v24, %v4793_v55 }
 0x813   : > { %v4806_v48 = vpop.permute.xlu0 %4805 }
 0x814   : > { %v4808_v36 = vmul.f32 %v4806_v48, %v9133_v53  ;;  %v4809_v19 = vmul.f32 %v4806_v48, %v9134_v34 }
 0x816   : > { %v4810_v29 = vadd.f32 %v4808_v36, %v4802_v51  ;;  %v4811_v44 = vadd.f32 %v4809_v19, %v4803_v54 }
 0x818   : > { %v4818_v42 = vadd.f32 %v4816_v43, %v4810_v29  ;;  %v4819_v56 = vadd.f32 %v4817_v47, %v4811_v44 }
 0x81a   : > { %4822 = vrot.lane.b32.xlu1 %v4818_v42, %s5347_s21 }
 0x81e   : > { %4824 = vrot.lane.b32.xlu1 %v4819_v56, %s5347_s21 }
 0x889   : > { %v4758_v28 = vpop.xlane.xlu0 %4757 }
 0x88a   : > { %v4759_v45 = vrot.slane %v4758_v28, 4 }
 0x88c   : > { %v4760_v40 = vadd.f32 %v4759_v45, %v4758_v28  ;;  %v4823_v49 = vpop.permute.xlu1 %4822 }
 0x88e   : > { %v4761_v59 = vrot.slane %v4760_v40, 2 }
 0x890   : > { %v4762_v1 = vadd.f32 %v4761_v59, %v4760_v40  ;;  %v4825_v2 = vpop.permute.xlu1 %4824 }
 0x891   : > { %v4826_v58 = vsel %vm383_vm5, %v4823_v49, %v4825_v2 }
 0x892   : > { %v4763_v35 = vrot.slane %v4762_v1, 1 }
 0x894   : > { %v4764_v7 = vadd.f32 %v4763_v35, %v4762_v1 }
 0x896   : > { %v4765_v52 = vmul.f32 0.00048828125, %v4764_v7 }
 0x898   : > { %v4766_v41 = vadd.f32 1e-05, %v4765_v52 }
 0x89a   : > { %5246 = vrsqrt.f32 %v4766_v41 }
 0x8a4   : > { %v5247_v57 = vpop.eup %5246 }
 0x8a5   : > { %v4768_v61 = vmul.f32 %v5247_v57, %v4737_v16  ;;  %v4769_v62 = vmul.f32 %v5247_v57, %v4738_v39  ;;  %v4770_v27 = vmul.f32 %v5247_v57, %v4739_v32 }
 0x8a7   : > { %v4776_v9 = vmul.f32 %v4774_v20, %v4768_v61  ;;  %v4777_v21 = vmul.f32 %v4774_v20, %v4769_v62  ;;  %v4778_v3 = vmul.f32 %v4774_v20, %v4770_v27 }
 0x8a9   : > { %v4784_v4 = vadd.f32 %v4782_v50, %v4776_v9  ;;  %v4785_v22 = vadd.f32 %v4782_v50, %v4777_v21  ;;  %v4786_v30 = vadd.f32 %v4782_v50, %v4778_v3 }
 0x8ab   : > { %v4830_v12 = vadd.f32 %v4823_v49, %v4784_v4  ;;  %v4831_v46 = vadd.f32 %v4826_v58, %v4785_v22  ;;  %v4832_v33 = vadd.f32 %v4825_v2, %v4786_v30 }
 0x8ad   : > { %v4833_v25 = vmax.f32 %v4830_v12, 0.0  ;;  %v4834_v23 = vmax.f32 %v4831_v46, 0.0  ;;  %v4835_v16 = vmax.f32 %v4832_v33, 0.0 }
 0x8af   : > { %4839 = vrot.lane.b32.xlu0 %v4833_v25, %s5350_s25  ;;  %4841 = vrot.lane.b32.xlu1 %v4834_v23, %s5350_s25 }
 0x8b3   : > { %4843 = vrot.lane.b32.xlu1 %v4835_v16, %s5350_s25 }
 0x921   : > { %v4840_v39 = vpop.permute.xlu0 %4839  ;;  %v4842_v32 = vpop.permute.xlu1 %4841 }
 0x922   : > { %v4845_v15 = vsel %vm1989_vm4, %v4840_v39, %v4842_v32 }
 0x923   : > { %4871 = vrot.lane.b32.xlu1 %v4845_v15, %s5323_s12 }
 0x925   : > { %v4844_v11 = vpop.permute.xlu1 %4843 }
 0x926   : > { %v4846_v38 = vsel %vm1989_vm4, %v4842_v32, %v4844_v11 }
 0x927   : > { %4859 = vrot.lane.b32.xlu0 %v4846_v38, %s8847_s27  ;;  %4873 = vrot.lane.b32.xlu1 %v4846_v38, %s5323_s12 }
 0x92b   : > { %4875 = vrot.lane.b32.xlu1 %v9136_v63, %s5323_s12  ;;  %s350_s12 = sand.u32 1, %s5303_s14  }
 0x92c   : > { %s4995_s21 = sshll.u32 %s350_s12, 4 }
 0x92f   : > { %4861 = vrot.lane.b32.xlu1 %v9136_v63, %s8847_s27 }
 0x933   : > { %4857 = vrot.lane.b32.xlu1 %v4845_v15, %s8847_s27  ;;  %s5004_s27 = sshll.u32 %s5475_s17, 8  ;;  %s4918_s17 = scalar_lea.sflag [#allocation4], %s350_s12 }
 0x934   : > { %s8465_s28 = scalar_lea.hbm %s8519_s10, %s5004_s27 }
 0x995   : > { %v4872_v26 = vpop.permute.xlu1 %4871 }
 0x999   : > { %v4874_v13 = vpop.permute.xlu1 %4873  ;;  %v4860_v60 = vpop.permute.xlu0 %4859 }
 0x99a   : > { %v4877_v18 = vsel %vm587_vm1, %v4872_v26, %v4874_v13 }
 0x99b   : > { %v4882_v6 = vmax.f32 %v4845_v15, %v4877_v18 }
 0x99d   : > { %4888 = vrot.lane.b32.xlu0 %v4882_v6, %s8883_s20  ;;  %v4876_v37 = vpop.permute.xlu1 %4875 }
 0x99e   : > { %v4878_v31 = vsel %vm587_vm1, %v4874_v13, %v4876_v37  ;;  %v4884_v5 = vmax.f32 %v9136_v63, %v4876_v37 }
 0x99f   : > { %v4883_v14 = vmax.f32 %v4846_v38, %v4878_v31 }
 0x9a1   : > { %4892 = vrot.lane.b32.xlu0 %v4884_v5, %s8883_s20  ;;  %4890 = vrot.lane.b32.xlu1 %v4883_v14, %s8883_s20  ;;  %v4862_v0 = vpop.permute.xlu1 %4861  ;;  %s352_s20 = scalar_lea.vmem [#allocation3], %s4995_s21  ;;  %s5255_s21 = scalar_lea.vmem %s5254_s18, 512 }
 0x9a2   : > { %v4864_v43 = vsel %vm1397_vm8, %v4860_v60, %v4862_v0  ;;  %s4932_s26 = sshll.u32 %s352_s20, 4  ;;  %s8467_s26 = int_to_ptr.vmem [resolvable:$true] %s4932_s26 }
 0x9a3   : > { %v4870_v51 = vmax.f32 %v4835_v16, %v4864_v43  ;;  %p5256_p0 = scmp.lt.s32.totalorder %s8467_s26, %s5254_s18 }
 0x9a5   : > { %v4858_v24 = vpop.permute.xlu1 %4857 }
 0x9a6   : > { %v4868_v48 = vmax.f32 %v4833_v25, %v4858_v24  ;;  %v4863_v17 = vsel %vm1397_vm8, %v4858_v24, %v4860_v60 }
 0x9a7   : > { %v4869_v53 = vmax.f32 %v4834_v23, %v4863_v17 }
 0xa0f   : > { %v4889_v10 = vpop.permute.xlu0 %4888 }
 0xa10   : > { %v4899_v55 = vmax.f32 %v4868_v48, %v4889_v10 }
 0xa12   : > { %4905 = vrot.lane.b32.xlu1 %v4899_v55, %s5350_s25 }
 0xa13   : > { %v4893_v36 = vpop.permute.xlu0 %4892  ;;  %v4891_v34 = vpop.permute.xlu1 %4890 }
 0xa14   : > { %v4894_v19 = vsel %vm1824_vm10, %v4889_v10, %v4891_v34  ;;  %v4895_v54 = vsel %vm1824_vm10, %v4891_v34, %v4893_v36 }
 0xa15   : > { %v4900_v29 = vmax.f32 %v4869_v53, %v4894_v19  ;;  %v4901_v44 = vmax.f32 %v4870_v51, %v4895_v54 }
 0xa17   : > { %4909 = vrot.lane.b32.xlu1 %v4901_v44, %s5350_s25  ;;  %4907 = vrot.lane.b32.xlu0 %v4900_v29, %s5350_s25  ;;  %s5249_s25 = scalar_lea.vmem %s8467_s26, 256 }
 0xa18   : > { %p5250_p11 = scmp.ne.s32.totalorder %s8467_s26, %s5249_s25  ;;  %p5257_p1 = scmp.lt.s32.totalorder %s5255_s21, %s5249_s25 }
 0xa1a   : > { %p5251_p12 = pnand %p5250_p11, %p5492_p5  ;;  %p5258_p2 = por %p5257_p1, %p5256_p0 }
 0xa1c   : > { %p5252_p13 = pneg %p5251_p12 }
 0xa1e   : > { %p5259_p3 = pnand %p5258_p2, %p5252_p13 }
 0xa84   : > { %v4906_v8 = vpop.permute.xlu1 %4905 }
 0xa89   : > { %v4908_v47 = vpop.permute.xlu0 %4907  ;;  %v4910_v42 = vpop.permute.xlu1 %4909 }
 0xa8a   : > { %v4911_v56 = vsel %vm1989_vm4, %v4906_v8, %v4908_v47  ;;  %v4912_v28 = vsel %vm1989_vm4, %v4908_v47, %v4910_v42 }
 0xa8b   : > { %4915 = vst [vmem:[%s352_s20] sm:$0xff] %v4911_v56  ;;  %4916 = vst [vmem:[%s352_s20 + $0x8] sm:$0xff] %v4912_v28 }
 0xa8c   : > { %5262 = shalt.err (!%p5259_p3)
}
 0xa8d   : > { %s5263_s12 = scalar_lea.hbm %s8465_s28, 256  ;;  %s5267_s30 = scalar_lea.hbm %s8519_s10, 512 }
 0xa8e   : > { %p5264_p4 = scmp.ne.s32.totalorder %s8465_s28, %s5263_s12  ;;  %p5268_p9 = scmp.lt.u32.totalorder %s8465_s28, %s8519_s10 }
 0xa8f   : > { %p5269_p10 = scmp.lt.u32.totalorder %s5267_s30, %s5263_s12  ;;  %p5271_p12 = scmp.lt.u32.totalorder %s5263_s12, %s8465_s28 }
 0xa90   : > { %p5265_p7 = pnand %p5264_p4, %p5492_p5 }
 0xa91   : > { %p5270_p11 = por %p5269_p10, %p5268_p9 }
 0xa92   : > { %p5266_p8 = pneg %p5265_p7 }
 0xa93   : > { %p5272_p13 = por %p5271_p12, %p5270_p11 }
 0xa95   : > { %p5273_p0 = pnand %p5272_p13, %p5266_p8 }
 0xa97   : > { %5276 = shalt.err (!%p5273_p0)
}
 0xa98   : > { %5005 = dma.vmem_to_hbm [thread:$0]  (%p5492_p5), %s8467_s26, 256, %s8465_s28, %s4918_s17  }
 0xa99 PF: > { %p5011_p1 = scmp.ge.s32.totalorder %s5311_s16, 2  ;;  %s4944_s25 = sand.u32 1, %s5299_s13  }
 0xa9a   : > { %s4945_s18 = scalar_lea.sflag [#allocation4], %s4944_s25 }
 0xa9b   : > { %p5008_p2 = pnand %p5011_p1, %p5496_p6 }
 0xa9d   : > { %5294 = dma.done.wait (!%p5008_p2), %s4945_s18, 256  }
 0xa9e   : > { %5296 = vsyncadd (!%p5008_p2), %s4945_s18, 4294967040  ;;  %p20_p3 = scmp.ge.s32.totalorder %s5479_s19, 4   ;;  %s9137_s13 = smov %s5303_s14 }
 0xa9f   : > { %s9138_s14 = smov %s5307_s15  ;;  %s9139_s15 = smov %s5490_s22 }
 0xaa0   : > { %s9140_s16 = smov %s5479_s19  ;;  %22 = sbr.rel (!%p20_p3) target bundleno = 3 (0x3), region = 95 }
 0xaa7   :  { %4950 = vsyncpa [#allocation4], 1 }
 0xaa8   :  { %4952 = vsyncpa [#allocation4 + $0x1], 1 }

</bundles_post_ra>
